<compile_context>
chip_gen: v7x
topology: tpu7x:2x2x1
jax: 0.10.0
libtpu: 0.0.40
codegen_flags: <defaults>
</compile_context>

<pallas_src>
import jax
import jax.numpy as jnp
from jax.experimental import pallas as pl
from jax.experimental.pallas import tpu as pltpu

# ---- module constants (from __init__ / forward) ----
IN_CH = 1
PATCH_W = 64          # kernel height (patch_size_w, applied to the H axis)
PATCH_H = 16          # kernel width  (patch_size_h, applied to the W axis)
EMB = 1024
IMG_SIZE = 384 * 512
RAW_H, RAW_W = 342, 500
PAD_H, PAD_W = 384, 512                            # after ZeroPad2d((6, 6, 21, 21))
NP_H, NP_W = PAD_H // PATCH_W, PAD_W // PATCH_H    # 6, 32
N_PATCH = NP_H * NP_W                              # 192
K = IN_CH * PATCH_W * PATCH_H                      # 1024 (flattened patch)
N_POS = IMG_SIZE // EMB + 1                        # 193 = 1 cls row + 192 patches

TN = 512                                           # EMB tile (multiple of 128)
assert EMB % TN == 0


def _patch_embed_kernel(p_ref, w_ref, pos_ref, b_ref, cls_ref, o_ref):
    # p_ref:   (192, 1024) bf16  flattened patches for one batch element
    # w_ref:   (1024, TN)  bf16  weight slice (K, TN)
    # pos_ref: (193, TN)   f32   position embedding slice (row 0 = cls row)
    # b_ref:   (1, TN)     f32   conv bias slice
    # cls_ref: (1, TN)     f32   cls token slice
    # o_ref:   (193, TN)   f32   output tile (row 0 = cls, rows 1.. = patches)
    proj = jnp.dot(p_ref[...], w_ref[...], preferred_element_type=jnp.float32)
    # cls row: cls_token + position[0]
    o_ref[0:1, :] = cls_ref[...] + pos_ref[0:1, :]
    # patch rows: conv projection + conv bias + position[1:]
    o_ref[pl.ds(1, N_PATCH), :] = (
        proj + b_ref[...] + pos_ref[pl.ds(1, N_PATCH), :]
    )


def _patch_embedding_forward(x, conv_w, conv_b, cls_token, position):
    """Replicates PatchEmbedding.forward.

    x: any float32 array whose size is a multiple of 1*342*500
       (forward does x.view(-1, 1, 342, 500)).
    conv_w: (EMB, 1, 64, 16), conv_b: (EMB,)
    cls_token: (1, 1, EMB), position: (193, EMB)
    returns: (B, 193, EMB) float32
    """
    x = x.reshape(-1, IN_CH, RAW_H, RAW_W)
    B = x.shape[0]
    x = x[:, 0]                                            # (B, 342, 500)
    # nn.ZeroPad2d((left=6, right=6, top=21, bottom=21))
    x = jnp.pad(x, ((0, 0), (21, 21), (6, 6)))             # (B, 384, 512)

    # patchify: conv weight is indexed (e, 0, kh, kw) -> flatten each patch
    # row-major over (kh, kw); token order matches Rearrange 'b e h w -> b (h w) e'.
    patches = (
        x.reshape(B, NP_H, PATCH_W, NP_W, PATCH_H)
        .transpose(0, 1, 3, 2, 4)
        .reshape(B, N_PATCH, K)
        .astype(jnp.bfloat16)
    )

    w_mat = conv_w.reshape(EMB, K).T.astype(jnp.bfloat16)  # (K, EMB) bf16
    pos = position.astype(jnp.float32)                     # (193, EMB) f32
    bias = conv_b.reshape(1, EMB).astype(jnp.float32)      # (1, EMB) f32
    cls = cls_token.reshape(1, EMB).astype(jnp.float32)    # (1, EMB) f32

    bytes_accessed = (
        B * N_PATCH * K * 2          # patches (bf16)
        + K * EMB * 2                # weight (bf16), resident across batch
        + N_POS * EMB * 4            # position (f32)
        + 2 * EMB * 4                # conv bias + cls token (f32)
        + B * N_POS * EMB * 4        # output (f32)
    )

    out = pl.pallas_call(
        _patch_embed_kernel,
        out_shape=jax.ShapeDtypeStruct((B, N_POS, EMB), jnp.float32),
        # EMB tile OUTER, batch INNER: weight/position block index is constant
        # across the batch -> DMA'd EMB//TN times total (residency).
        grid=(EMB // TN, B),
        in_specs=[
            pl.BlockSpec((pl.Squeezed(), N_PATCH, K), lambda n, b: (b, 0, 0)),
            pl.BlockSpec((K, TN), lambda n, b: (0, n)),
            pl.BlockSpec((N_POS, TN), lambda n, b: (0, n)),
            pl.BlockSpec((1, TN), lambda n, b: (0, n)),
            pl.BlockSpec((1, TN), lambda n, b: (0, n)),
        ],
        out_specs=pl.BlockSpec((pl.Squeezed(), N_POS, TN), lambda n, b: (b, 0, n)),
        compiler_params=pltpu.CompilerParams(
            dimension_semantics=("parallel", "parallel"),
            vmem_limit_bytes=32 << 20,   # blocks ~4.3 MiB double-buffered; safe on v5e/v6e/v7x
        ),
        cost_estimate=pl.CostEstimate(
            flops=2 * B * N_PATCH * K * EMB,
            transcendentals=0,
            bytes_accessed=bytes_accessed,
        ),
    )(patches, w_mat, pos, bias, cls)
    return out


patch_embedding_forward = jax.jit(_patch_embedding_forward)


if __name__ == "__main__":
    key = jax.random.PRNGKey(0)
    k_x, k_w, k_b, k_cls, k_pos = jax.random.split(key, 5)

    B = 2
    x = jax.random.normal(k_x, (B, IN_CH, RAW_H, RAW_W), dtype=jnp.float32)

    # deterministic synthetic parameters (shapes from __init__)
    conv_w = jax.random.normal(k_w, (EMB, IN_CH, PATCH_W, PATCH_H), jnp.float32) * 0.02
    conv_b = jax.random.normal(k_b, (EMB,), jnp.float32) * 0.02
    cls_token = jax.random.normal(k_cls, (1, 1, EMB), jnp.float32)
    position = jax.random.normal(k_pos, (N_POS, EMB), jnp.float32)

    out = patch_embedding_forward(x, conv_w, conv_b, cls_token, position)
    out = jax.block_until_ready(out)
    assert out.shape == (B, N_POS, EMB), out.shape

    # sanity check vs. pure-JAX f32 reference of the same math
    # (tolerance loosened for bf16 MXU operands; accumulation is f32)
    xp = jnp.pad(x[:, 0], ((0, 0), (21, 21), (6, 6)))
    ref_patches = (
        xp.reshape(B, NP_H, PATCH_W, NP_W, PATCH_H)
        .transpose(0, 1, 3, 2, 4)
        .reshape(B, N_PATCH, K)
    )
    ref_tok = jnp.einsum("bnk,ek->bne", ref_patches, conv_w.reshape(EMB, K)) + conv_b
    ref = jnp.concatenate(
        [jnp.broadcast_to(cls_token, (B, 1, EMB)), ref_tok], axis=1
    ) + position
    assert jnp.allclose(out, ref, atol=5e-2, rtol=5e-2)

    print("KERNEL_OK")
</pallas_src>

<mosaic_0001>
module attributes {stable_mosaic.version = 11 : i64} {
  func.func @_patch_embed_kernel(%arg0: i32, %arg1: i32, %arg2: memref<1x192x1024xbf16, #tpu.memory_space<vmem>>, %arg3: memref<1024x512xbf16, #tpu.memory_space<vmem>>, %arg4: memref<193x512xf32, #tpu.memory_space<vmem>>, %arg5: memref<1x512xf32, #tpu.memory_space<vmem>>, %arg6: memref<1x512xf32, #tpu.memory_space<vmem>>, %arg7: memref<1x193x512xf32, #tpu.memory_space<vmem>>) attributes {dimension_semantics = [#tpu.dimension_semantics<parallel>, #tpu.dimension_semantics<parallel>], iteration_bounds = array<i64: 2, 2>, scalar_prefetch = 0 : i64, scratch_operands = 0 : i64, tpu.core_type = #tpu.core_type<tc>, window_params = [{transform_indices = @transform_0, window_bounds = array<i64: 1, 192, 1024>}, {transform_indices = @transform_1, window_bounds = array<i64: 1024, 512>}, {transform_indices = @transform_2, window_bounds = array<i64: 193, 512>}, {transform_indices = @transform_3, window_bounds = array<i64: 1, 512>}, {transform_indices = @transform_4, window_bounds = array<i64: 1, 512>}, {transform_indices = @transform_5, window_bounds = array<i64: 1, 193, 512>}]} {
    %c0 = arith.constant 0 : index
    %c0_0 = arith.constant 0 : index
    %c0_1 = arith.constant 0 : index
    %0 = vector.load %arg2[%c0, %c0_0, %c0_1] : memref<1x192x1024xbf16, #tpu.memory_space<vmem>>, vector<1x192x1024xbf16>
    %1 = vector.shape_cast %0 : vector<1x192x1024xbf16> to vector<192x1024xbf16>
    %c0_2 = arith.constant 0 : index
    %c0_3 = arith.constant 0 : index
    %2 = vector.load %arg3[%c0_2, %c0_3] : memref<1024x512xbf16, #tpu.memory_space<vmem>>, vector<1024x512xbf16>
    %cst = arith.constant dense<0.000000e+00> : vector<192x512xf32>
    %3 = tpu.matmul %1, %2, %cst {dimension_numbers = #tpu.dot_dimension_numbers<[1], [0], [0], [1], [0, 0, 1, 1], [], []>} : vector<192x1024xbf16>, vector<1024x512xbf16>, vector<192x512xf32> -> vector<192x512xf32>
    %c0_4 = arith.constant 0 : index
    %c0_5 = arith.constant 0 : index
    %4 = vector.load %arg6[%c0_4, %c0_5] : memref<1x512xf32, #tpu.memory_space<vmem>>, vector<1x512xf32>
    %c0_6 = arith.constant 0 : index
    %c0_7 = arith.constant 0 : index
    %5 = vector.load %arg4[%c0_6, %c0_7] : memref<193x512xf32, #tpu.memory_space<vmem>>, vector<1x512xf32>
    %6 = arith.addf %4, %5 : vector<1x512xf32>
    %c0_8 = arith.constant 0 : index
    %c0_9 = arith.constant 0 : index
    %c0_10 = arith.constant 0 : index
    %7 = vector.load %arg7[%c0_8, %c0_9, %c0_10] : memref<1x193x512xf32, #tpu.memory_space<vmem>>, vector<1x1x512xf32>
    %8 = vector.shape_cast %7 : vector<1x1x512xf32> to vector<1x512xf32>
    %9 = vector.shape_cast %6 : vector<1x512xf32> to vector<1x1x512xf32>
    tpu.vector_store %arg7[%c0_8, %c0_9, %c0_10], %9 {strides = array<i32>} : memref<1x193x512xf32, #tpu.memory_space<vmem>>, vector<1x1x512xf32>,
    %c0_11 = arith.constant 0 : index
    %c0_12 = arith.constant 0 : index
    %10 = vector.load %arg5[%c0_11, %c0_12] : memref<1x512xf32, #tpu.memory_space<vmem>>, vector<1x512xf32>
    %11 = vector.broadcast %10 : vector<1x512xf32> to vector<192x512xf32>
    %12 = arith.addf %3, %11 : vector<192x512xf32>
    %c1 = arith.constant 1 : index
    %c0_13 = arith.constant 0 : index
    %13 = vector.load %arg4[%c1, %c0_13] : memref<193x512xf32, #tpu.memory_space<vmem>>, vector<192x512xf32>
    %14 = arith.addf %12, %13 : vector<192x512xf32>
    %c0_14 = arith.constant 0 : index
    %c1_15 = arith.constant 1 : index
    %c0_16 = arith.constant 0 : index
    %15 = vector.load %arg7[%c0_14, %c1_15, %c0_16] : memref<1x193x512xf32, #tpu.memory_space<vmem>>, vector<1x192x512xf32>
    %16 = vector.shape_cast %15 : vector<1x192x512xf32> to vector<192x512xf32>
    %17 = vector.shape_cast %14 : vector<192x512xf32> to vector<1x192x512xf32>
    tpu.vector_store %arg7[%c0_14, %c1_15, %c0_16], %17 {strides = array<i32>} : memref<1x193x512xf32, #tpu.memory_space<vmem>>, vector<1x192x512xf32>,
    return
  }
  func.func @transform_0(%arg0: i32, %arg1: i32) -> (i32, i32, i32) {
    %c0_i32 = arith.constant 0 : i32
    %c0_i32_0 = arith.constant 0 : i32
    %c0_i32_1 = arith.constant 0 : i32
    return %arg1, %c0_i32, %c0_i32_0 : i32, i32, i32
  }
  func.func @transform_1(%arg0: i32, %arg1: i32) -> (i32, i32) {
    %c0_i32 = arith.constant 0 : i32
    %c0_i32_0 = arith.constant 0 : i32
    return %c0_i32, %arg0 : i32, i32
  }
  func.func @transform_2(%arg0: i32, %arg1: i32) -> (i32, i32) {
    %c0_i32 = arith.constant 0 : i32
    %c0_i32_0 = arith.constant 0 : i32
    return %c0_i32, %arg0 : i32, i32
  }
  func.func @transform_3(%arg0: i32, %arg1: i32) -> (i32, i32) {
    %c0_i32 = arith.constant 0 : i32
    %c0_i32_0 = arith.constant 0 : i32
    return %c0_i32, %arg0 : i32, i32
  }
  func.func @transform_4(%arg0: i32, %arg1: i32) -> (i32, i32) {
    %c0_i32 = arith.constant 0 : i32
    %c0_i32_0 = arith.constant 0 : i32
    return %c0_i32, %arg0 : i32, i32
  }
  func.func @transform_5(%arg0: i32, %arg1: i32) -> (i32, i32, i32) {
    %c0_i32 = arith.constant 0 : i32
    %c0_i32_0 = arith.constant 0 : i32
    return %arg1, %c0_i32, %arg0 : i32, i32, i32
  }
}

</mosaic_0001>

<bundles_post_ra>
// kernel: _patch_embedding_forward.1
= control target key start
LH: loop header
LB: loop body
LE: loop exit
PB: predicated region body
PF: predicated region fallthrough
CT: control target
= control target key end

     0   :  { %s7168_s18 = smov 0   ;;  %s7170_s19 = smov 0   ;;  %s9415_s0 = inlined_call_operand.vmem [shape: bf16[2,192,1024], index: 0, kind: input, shape index: {}]   ;;  %s9416_s1 = inlined_call_operand.vmem [shape: bf16[1024,1024], index: 1, kind: input, shape index: {}]   ;;  %s9417_s2 = inlined_call_operand.vmem [shape: f32[193,1024], index: 2, kind: input, shape index: {}]   ;;  %s9418_s3 = inlined_call_operand.vmem [shape: f32[1,1024], index: 3, kind: input, shape index: {}]   ;;  %s9419_s4 = inlined_call_operand.vmem [shape: f32[1,1024], index: 4, kind: input, shape index: {}]   ;;  %s9420_s5 = inlined_call_operand.vmem [shape: f32[2,193,1024], index: 5, kind: output, shape index: {}]  }
   0x1   :  { %s7172_s20 = smov 0   ;;  %s7174_s21 = smov 0  }
   0x2   :  { %s7176_s22 = smov 0   ;;  %s7178_s23 = smov 0  }
   0x3   :  { %s7180_s24 = smov 0   ;;  %s7182_s25 = smov 0  }
   0x4   :  { %s7184_s26 = smov 0  }
   0x5 LB: > { %s24_s27 = sadd.s32 1, %s7128_s24  ;;  %s27_s28 = sadd.s32 1, %s7132_s25  ;;  %s7136_s26 = sphi %s7184_s26, %s15_s26   ;;  %s7132_s25 = sphi %s7182_s25, %s9548_s25   ;;  %s7128_s24 = sphi %s7180_s24, %s9547_s24   ;;  %s7124_s23 = sphi %s7178_s23, %s9546_s23   ;;  %s7120_s22 = sphi %s7176_s22, %s9545_s22   ;;  %s7116_s21 = sphi %s7174_s21, %s9544_s21   ;;  %s7112_s20 = sphi %s7172_s20, %s9543_s20   ;;  %s7108_s19 = sphi %s7170_s19, %s9542_s19   ;;  %s7104_s18 = sphi %s7168_s18, %s9541_s18  }
   0x6   : > { %p25_p0 = scmp.ge.s32.totalorder %s24_s27, 2  ;;  %p67_p1 = scmp.ne.s32.totalorder %s7116_s21, %s7112_s20 }
   0x7   : > { %s5849_s29 = sadd.s32 4294967295, %s7136_s26   ;;  %p68_p2 = scmp.eq.s32.totalorder %s7136_s26, 0 }
   0x8   : > { %s9550_s27 = smov (%p25_p0, %s24_s27), 0  ;;  %s9552_s28 = smov (!%p25_p0, %s27_s28), %s7132_s25 }
   0x9   : > { %p29_p3 = scmp.ge.s32.totalorder %s9552_s28, 2  ;;  %s161_s30 = ssub.s32 %s7128_s24, %s9550_s27 }
   0xa   : > { %p7224_p4 = por %p68_p2, %p67_p1  ;;  %p176_p5 = scmp.ne.s32.totalorder %s7108_s19, %s7104_s18 }
   0xb   : > { %s9554_s28 = smov (%p29_p3, %s9552_s28), 0  ;;  %s60_s7 = sadd.s32 1, %s7116_s21 }
   0xc   : > { %p177_p6 = scmp.eq.s32.totalorder %s5849_s29, 3  ;;  %s57_s8 = ssub.s32 %s7132_s25, %s9554_s28 }
   0xd   : > { %s166_s9 = sadd.s32 1, %s7108_s19  ;;  %p58_p7 = scmp.eq.s32.totalorder %s57_s8, 0 }
   0xe   : > { %s163_s10 = sor.u32 %s161_s30, %s57_s8  ;;  %p7236_p9 = por %p177_p6, %p176_p5 }
   0xf   : > { %p164_p8 = scmp.eq.s32.totalorder %s163_s10, 0  ;;  %p5852_p10 = scmp.ge.s32.totalorder %s7136_s26, 4 }
  0x10   : > { %s7241_s12 = scalar_select %p58_p7, %s7116_s21, %s60_s7  }
  0x11   : > { %s7244_s13 = scalar_select %p164_p8, %s7108_s19, %s166_s9  }
  0x12   : > { %199 = sbr.rel (%p5852_p10) target bundleno = 212 (0xd4), region = 16 }
  0x19   : > { %210 = sbr.rel (!%p7224_p4) target bundleno = 157 (0x9d), region = 24  ;;  %s212_s14 = sand.u32 (%p7224_p4), 1, %s7116_s21  }
  0x1a   : > { %s6219_s15 = sshll.u32 (%p7224_p4), %s7132_s25, 4  ;;  %s5853_s16 = sshll.u32 (%p7224_p4), %s212_s14, 11 }
  0x1b   : > { %s7254_s30 = scalar_lea.vmem (%p7224_p4), %s9416_s1, %s6219_s15  ;;  %s7259_s7 = scalar_lea.vmem (%p7224_p4), [#allocation2], %s5853_s16 }
  0x1c   : > { %v230_v0 = vld [vmem:[%s7254_s30] sm:$0xff] (%p7224_p4)  ;;  %v232_v1 = vld [vmem:[%s7254_s30 + $0x8] sm:$0xff] (%p7224_p4) }
  0x1d   : > { %v234_v2 = vld [vmem:[%s7254_s30 + $0x20] sm:$0xff] (%p7224_p4)  ;;  %231 = vst [vmem:[%s7259_s7] sm:$0xff] (%p7224_p4), %v230_v0  ;;  %233 = vst [vmem:[%s7259_s7 + $0x8] sm:$0xff] (%p7224_p4), %v232_v1  ;;  %v236_v3 = vld [vmem:[%s7254_s30 + $0x28] sm:$0xff] (%p7224_p4) }
  0x1e   : > { %235 = vst [vmem:[%s7259_s7 + $0x10] sm:$0xff] (%p7224_p4), %v234_v2  ;;  %v238_v4 = vld [vmem:[%s7254_s30 + $0x40] sm:$0xff] (%p7224_p4)  ;;  %v240_v5 = vld [vmem:[%s7254_s30 + $0x48] sm:$0xff] (%p7224_p4)  ;;  %237 = vst [vmem:[%s7259_s7 + $0x18] sm:$0xff] (%p7224_p4), %v236_v3 }
  0x1f   : > { %239 = vst [vmem:[%s7259_s7 + $0x20] sm:$0xff] (%p7224_p4), %v238_v4  ;;  %241 = vst [vmem:[%s7259_s7 + $0x28] sm:$0xff] (%p7224_p4), %v240_v5  ;;  %v242_v6 = vld [vmem:[%s7254_s30 + $0x60] sm:$0xff] (%p7224_p4)  ;;  %v244_v7 = vld [vmem:[%s7254_s30 + $0x68] sm:$0xff] (%p7224_p4) }
  0x20   : > { %v246_v8 = vld [vmem:[%s7254_s30 + $0x80] sm:$0xff]  ;;  %243 = vst [vmem:[%s7259_s7 + $0x30] sm:$0xff] %v242_v6  ;;  %245 = vst [vmem:[%s7259_s7 + $0x38] sm:$0xff] %v244_v7  ;;  %v248_v9 = vld [vmem:[%s7254_s30 + $0x88] sm:$0xff] }
  0x21   : > { %247 = vst [vmem:[%s7259_s7 + $0x40] sm:$0xff] %v246_v8  ;;  %v250_v10 = vld [vmem:[%s7254_s30 + $0xa0] sm:$0xff]  ;;  %v252_v11 = vld [vmem:[%s7254_s30 + $0xa8] sm:$0xff]  ;;  %249 = vst [vmem:[%s7259_s7 + $0x48] sm:$0xff] %v248_v9 }
  0x22   : > { %251 = vst [vmem:[%s7259_s7 + $0x50] sm:$0xff] %v250_v10  ;;  %253 = vst [vmem:[%s7259_s7 + $0x58] sm:$0xff] %v252_v11  ;;  %v254_v12 = vld [vmem:[%s7254_s30 + $0xc0] sm:$0xff]  ;;  %v256_v13 = vld [vmem:[%s7254_s30 + $0xc8] sm:$0xff] }
  0x23   : > { %v258_v14 = vld [vmem:[%s7254_s30 + $0xe0] sm:$0xff]  ;;  %255 = vst [vmem:[%s7259_s7 + $0x60] sm:$0xff] %v254_v12  ;;  %257 = vst [vmem:[%s7259_s7 + $0x68] sm:$0xff] %v256_v13  ;;  %v260_v15 = vld [vmem:[%s7254_s30 + $0xe8] sm:$0xff] }
  0x24   : > { %259 = vst [vmem:[%s7259_s7 + $0x70] sm:$0xff] %v258_v14  ;;  %v262_v16 = vld [vmem:[%s7254_s30 + $0x100] sm:$0xff]  ;;  %v264_v17 = vld [vmem:[%s7254_s30 + $0x108] sm:$0xff]  ;;  %261 = vst [vmem:[%s7259_s7 + $0x78] sm:$0xff] %v260_v15 }
  0x25   : > { %263 = vst [vmem:[%s7259_s7 + $0x80] sm:$0xff] %v262_v16  ;;  %265 = vst [vmem:[%s7259_s7 + $0x88] sm:$0xff] %v264_v17  ;;  %v266_v18 = vld [vmem:[%s7254_s30 + $0x120] sm:$0xff]  ;;  %v268_v19 = vld [vmem:[%s7254_s30 + $0x128] sm:$0xff] }
  0x26   : > { %v270_v20 = vld [vmem:[%s7254_s30 + $0x140] sm:$0xff]  ;;  %267 = vst [vmem:[%s7259_s7 + $0x90] sm:$0xff] %v266_v18  ;;  %269 = vst [vmem:[%s7259_s7 + $0x98] sm:$0xff] %v268_v19  ;;  %v272_v21 = vld [vmem:[%s7254_s30 + $0x148] sm:$0xff] }
  0x27   : > { %271 = vst [vmem:[%s7259_s7 + $0xa0] sm:$0xff] %v270_v20  ;;  %v274_v22 = vld [vmem:[%s7254_s30 + $0x160] sm:$0xff]  ;;  %v276_v23 = vld [vmem:[%s7254_s30 + $0x168] sm:$0xff]  ;;  %273 = vst [vmem:[%s7259_s7 + $0xa8] sm:$0xff] %v272_v21 }
  0x28   : > { %275 = vst [vmem:[%s7259_s7 + $0xb0] sm:$0xff] %v274_v22  ;;  %277 = vst [vmem:[%s7259_s7 + $0xb8] sm:$0xff] %v276_v23  ;;  %v278_v24 = vld [vmem:[%s7254_s30 + $0x180] sm:$0xff]  ;;  %v280_v25 = vld [vmem:[%s7254_s30 + $0x188] sm:$0xff] }
  0x29   : > { %v282_v26 = vld [vmem:[%s7254_s30 + $0x1a0] sm:$0xff]  ;;  %279 = vst [vmem:[%s7259_s7 + $0xc0] sm:$0xff] %v278_v24  ;;  %281 = vst [vmem:[%s7259_s7 + $0xc8] sm:$0xff] %v280_v25  ;;  %v284_v27 = vld [vmem:[%s7254_s30 + $0x1a8] sm:$0xff] }
  0x2a   : > { %283 = vst [vmem:[%s7259_s7 + $0xd0] sm:$0xff] %v282_v26  ;;  %v286_v28 = vld [vmem:[%s7254_s30 + $0x1c0] sm:$0xff]  ;;  %v288_v29 = vld [vmem:[%s7254_s30 + $0x1c8] sm:$0xff]  ;;  %285 = vst [vmem:[%s7259_s7 + $0xd8] sm:$0xff] %v284_v27 }
  0x2b   : > { %287 = vst [vmem:[%s7259_s7 + $0xe0] sm:$0xff] %v286_v28  ;;  %289 = vst [vmem:[%s7259_s7 + $0xe8] sm:$0xff] %v288_v29  ;;  %v290_v30 = vld [vmem:[%s7254_s30 + $0x1e0] sm:$0xff]  ;;  %v292_v31 = vld [vmem:[%s7254_s30 + $0x1e8] sm:$0xff] }
  0x2c   : > { %v294_v32 = vld [vmem:[%s7254_s30 + $0x200] sm:$0xff]  ;;  %291 = vst [vmem:[%s7259_s7 + $0xf0] sm:$0xff] %v290_v30  ;;  %293 = vst [vmem:[%s7259_s7 + $0xf8] sm:$0xff] %v292_v31  ;;  %v296_v33 = vld [vmem:[%s7254_s30 + $0x208] sm:$0xff] }
  0x2d   : > { %295 = vst [vmem:[%s7259_s7 + $0x100] sm:$0xff] %v294_v32  ;;  %v298_v34 = vld [vmem:[%s7254_s30 + $0x220] sm:$0xff]  ;;  %v300_v35 = vld [vmem:[%s7254_s30 + $0x228] sm:$0xff]  ;;  %297 = vst [vmem:[%s7259_s7 + $0x108] sm:$0xff] %v296_v33 }
  0x2e   : > { %299 = vst [vmem:[%s7259_s7 + $0x110] sm:$0xff] %v298_v34  ;;  %301 = vst [vmem:[%s7259_s7 + $0x118] sm:$0xff] %v300_v35  ;;  %v302_v36 = vld [vmem:[%s7254_s30 + $0x240] sm:$0xff]  ;;  %v304_v37 = vld [vmem:[%s7254_s30 + $0x248] sm:$0xff] }
  0x2f   : > { %v306_v38 = vld [vmem:[%s7254_s30 + $0x260] sm:$0xff]  ;;  %303 = vst [vmem:[%s7259_s7 + $0x120] sm:$0xff] %v302_v36  ;;  %305 = vst [vmem:[%s7259_s7 + $0x128] sm:$0xff] %v304_v37  ;;  %v308_v39 = vld [vmem:[%s7254_s30 + $0x268] sm:$0xff] }
  0x30   : > { %307 = vst [vmem:[%s7259_s7 + $0x130] sm:$0xff] %v306_v38  ;;  %v310_v40 = vld [vmem:[%s7254_s30 + $0x280] sm:$0xff]  ;;  %v312_v41 = vld [vmem:[%s7254_s30 + $0x288] sm:$0xff]  ;;  %309 = vst [vmem:[%s7259_s7 + $0x138] sm:$0xff] %v308_v39 }
  0x31   : > { %311 = vst [vmem:[%s7259_s7 + $0x140] sm:$0xff] %v310_v40  ;;  %313 = vst [vmem:[%s7259_s7 + $0x148] sm:$0xff] %v312_v41  ;;  %v314_v42 = vld [vmem:[%s7254_s30 + $0x2a0] sm:$0xff]  ;;  %v316_v43 = vld [vmem:[%s7254_s30 + $0x2a8] sm:$0xff] }
  0x32   : > { %v318_v44 = vld [vmem:[%s7254_s30 + $0x2c0] sm:$0xff]  ;;  %315 = vst [vmem:[%s7259_s7 + $0x150] sm:$0xff] %v314_v42  ;;  %317 = vst [vmem:[%s7259_s7 + $0x158] sm:$0xff] %v316_v43  ;;  %v320_v45 = vld [vmem:[%s7254_s30 + $0x2c8] sm:$0xff] }
  0x33   : > { %319 = vst [vmem:[%s7259_s7 + $0x160] sm:$0xff] %v318_v44  ;;  %v322_v46 = vld [vmem:[%s7254_s30 + $0x2e0] sm:$0xff]  ;;  %v324_v47 = vld [vmem:[%s7254_s30 + $0x2e8] sm:$0xff]  ;;  %321 = vst [vmem:[%s7259_s7 + $0x168] sm:$0xff] %v320_v45 }
  0x34   : > { %323 = vst [vmem:[%s7259_s7 + $0x170] sm:$0xff] %v322_v46  ;;  %325 = vst [vmem:[%s7259_s7 + $0x178] sm:$0xff] %v324_v47  ;;  %v326_v48 = vld [vmem:[%s7254_s30 + $0x300] sm:$0xff]  ;;  %v328_v49 = vld [vmem:[%s7254_s30 + $0x308] sm:$0xff] }
  0x35   : > { %v330_v50 = vld [vmem:[%s7254_s30 + $0x320] sm:$0xff]  ;;  %327 = vst [vmem:[%s7259_s7 + $0x180] sm:$0xff] %v326_v48  ;;  %329 = vst [vmem:[%s7259_s7 + $0x188] sm:$0xff] %v328_v49  ;;  %v332_v51 = vld [vmem:[%s7254_s30 + $0x328] sm:$0xff] }
  0x36   : > { %331 = vst [vmem:[%s7259_s7 + $0x190] sm:$0xff] %v330_v50  ;;  %v334_v52 = vld [vmem:[%s7254_s30 + $0x340] sm:$0xff]  ;;  %v336_v53 = vld [vmem:[%s7254_s30 + $0x348] sm:$0xff]  ;;  %333 = vst [vmem:[%s7259_s7 + $0x198] sm:$0xff] %v332_v51 }
  0x37   : > { %335 = vst [vmem:[%s7259_s7 + $0x1a0] sm:$0xff] %v334_v52  ;;  %337 = vst [vmem:[%s7259_s7 + $0x1a8] sm:$0xff] %v336_v53  ;;  %v338_v54 = vld [vmem:[%s7254_s30 + $0x360] sm:$0xff]  ;;  %v340_v55 = vld [vmem:[%s7254_s30 + $0x368] sm:$0xff] }
  0x38   : > { %v342_v56 = vld [vmem:[%s7254_s30 + $0x380] sm:$0xff]  ;;  %339 = vst [vmem:[%s7259_s7 + $0x1b0] sm:$0xff] %v338_v54  ;;  %341 = vst [vmem:[%s7259_s7 + $0x1b8] sm:$0xff] %v340_v55  ;;  %v344_v57 = vld [vmem:[%s7254_s30 + $0x388] sm:$0xff] }
  0x39   : > { %343 = vst [vmem:[%s7259_s7 + $0x1c0] sm:$0xff] %v342_v56  ;;  %v346_v58 = vld [vmem:[%s7254_s30 + $0x3a0] sm:$0xff]  ;;  %v348_v59 = vld [vmem:[%s7254_s30 + $0x3a8] sm:$0xff]  ;;  %345 = vst [vmem:[%s7259_s7 + $0x1c8] sm:$0xff] %v344_v57 }
  0x3a   : > { %347 = vst [vmem:[%s7259_s7 + $0x1d0] sm:$0xff] %v346_v58  ;;  %349 = vst [vmem:[%s7259_s7 + $0x1d8] sm:$0xff] %v348_v59  ;;  %v350_v60 = vld [vmem:[%s7254_s30 + $0x3c0] sm:$0xff]  ;;  %v352_v61 = vld [vmem:[%s7254_s30 + $0x3c8] sm:$0xff] }
  0x3b   : > { %v354_v62 = vld [vmem:[%s7254_s30 + $0x3e0] sm:$0xff]  ;;  %351 = vst [vmem:[%s7259_s7 + $0x1e0] sm:$0xff] %v350_v60  ;;  %353 = vst [vmem:[%s7259_s7 + $0x1e8] sm:$0xff] %v352_v61  ;;  %v356_v63 = vld [vmem:[%s7254_s30 + $0x3e8] sm:$0xff] }
  0x3c   : > { %355 = vst [vmem:[%s7259_s7 + $0x1f0] sm:$0xff] %v354_v62  ;;  %v358_v0 = vld [vmem:[%s7254_s30 + $0x400] sm:$0xff]  ;;  %v360_v1 = vld [vmem:[%s7254_s30 + $0x408] sm:$0xff]  ;;  %357 = vst [vmem:[%s7259_s7 + $0x1f8] sm:$0xff] %v356_v63 }
  0x3d   : > { %359 = vst [vmem:[%s7259_s7 + $0x200] sm:$0xff] %v358_v0  ;;  %361 = vst [vmem:[%s7259_s7 + $0x208] sm:$0xff] %v360_v1  ;;  %v362_v2 = vld [vmem:[%s7254_s30 + $0x420] sm:$0xff]  ;;  %v364_v3 = vld [vmem:[%s7254_s30 + $0x428] sm:$0xff] }
  0x3e   : > { %v366_v4 = vld [vmem:[%s7254_s30 + $0x440] sm:$0xff]  ;;  %363 = vst [vmem:[%s7259_s7 + $0x210] sm:$0xff] %v362_v2  ;;  %365 = vst [vmem:[%s7259_s7 + $0x218] sm:$0xff] %v364_v3  ;;  %v368_v5 = vld [vmem:[%s7254_s30 + $0x448] sm:$0xff] }
  0x3f   : > { %367 = vst [vmem:[%s7259_s7 + $0x220] sm:$0xff] %v366_v4  ;;  %v370_v6 = vld [vmem:[%s7254_s30 + $0x460] sm:$0xff]  ;;  %v372_v7 = vld [vmem:[%s7254_s30 + $0x468] sm:$0xff]  ;;  %369 = vst [vmem:[%s7259_s7 + $0x228] sm:$0xff] %v368_v5 }
  0x40   : > { %371 = vst [vmem:[%s7259_s7 + $0x230] sm:$0xff] %v370_v6  ;;  %373 = vst [vmem:[%s7259_s7 + $0x238] sm:$0xff] %v372_v7  ;;  %v374_v8 = vld [vmem:[%s7254_s30 + $0x480] sm:$0xff]  ;;  %v376_v9 = vld [vmem:[%s7254_s30 + $0x488] sm:$0xff] }
  0x41   : > { %v378_v10 = vld [vmem:[%s7254_s30 + $0x4a0] sm:$0xff]  ;;  %375 = vst [vmem:[%s7259_s7 + $0x240] sm:$0xff] %v374_v8  ;;  %377 = vst [vmem:[%s7259_s7 + $0x248] sm:$0xff] %v376_v9  ;;  %v380_v11 = vld [vmem:[%s7254_s30 + $0x4a8] sm:$0xff] }
  0x42   : > { %379 = vst [vmem:[%s7259_s7 + $0x250] sm:$0xff] %v378_v10  ;;  %v382_v12 = vld [vmem:[%s7254_s30 + $0x4c0] sm:$0xff]  ;;  %v384_v13 = vld [vmem:[%s7254_s30 + $0x4c8] sm:$0xff]  ;;  %381 = vst [vmem:[%s7259_s7 + $0x258] sm:$0xff] %v380_v11 }
  0x43   : > { %383 = vst [vmem:[%s7259_s7 + $0x260] sm:$0xff] %v382_v12  ;;  %385 = vst [vmem:[%s7259_s7 + $0x268] sm:$0xff] %v384_v13  ;;  %v386_v14 = vld [vmem:[%s7254_s30 + $0x4e0] sm:$0xff]  ;;  %v388_v15 = vld [vmem:[%s7254_s30 + $0x4e8] sm:$0xff] }
  0x44   : > { %v390_v16 = vld [vmem:[%s7254_s30 + $0x500] sm:$0xff]  ;;  %387 = vst [vmem:[%s7259_s7 + $0x270] sm:$0xff] %v386_v14  ;;  %389 = vst [vmem:[%s7259_s7 + $0x278] sm:$0xff] %v388_v15  ;;  %v392_v17 = vld [vmem:[%s7254_s30 + $0x508] sm:$0xff] }
  0x45   : > { %391 = vst [vmem:[%s7259_s7 + $0x280] sm:$0xff] %v390_v16  ;;  %v394_v18 = vld [vmem:[%s7254_s30 + $0x520] sm:$0xff]  ;;  %v396_v19 = vld [vmem:[%s7254_s30 + $0x528] sm:$0xff]  ;;  %393 = vst [vmem:[%s7259_s7 + $0x288] sm:$0xff] %v392_v17 }
  0x46   : > { %395 = vst [vmem:[%s7259_s7 + $0x290] sm:$0xff] %v394_v18  ;;  %397 = vst [vmem:[%s7259_s7 + $0x298] sm:$0xff] %v396_v19  ;;  %v398_v20 = vld [vmem:[%s7254_s30 + $0x540] sm:$0xff]  ;;  %v400_v21 = vld [vmem:[%s7254_s30 + $0x548] sm:$0xff] }
  0x47   : > { %v402_v22 = vld [vmem:[%s7254_s30 + $0x560] sm:$0xff]  ;;  %399 = vst [vmem:[%s7259_s7 + $0x2a0] sm:$0xff] %v398_v20  ;;  %401 = vst [vmem:[%s7259_s7 + $0x2a8] sm:$0xff] %v400_v21  ;;  %v404_v23 = vld [vmem:[%s7254_s30 + $0x568] sm:$0xff] }
  0x48   : > { %403 = vst [vmem:[%s7259_s7 + $0x2b0] sm:$0xff] %v402_v22  ;;  %v406_v24 = vld [vmem:[%s7254_s30 + $0x580] sm:$0xff]  ;;  %v408_v25 = vld [vmem:[%s7254_s30 + $0x588] sm:$0xff]  ;;  %405 = vst [vmem:[%s7259_s7 + $0x2b8] sm:$0xff] %v404_v23 }
  0x49   : > { %407 = vst [vmem:[%s7259_s7 + $0x2c0] sm:$0xff] %v406_v24  ;;  %409 = vst [vmem:[%s7259_s7 + $0x2c8] sm:$0xff] %v408_v25  ;;  %v410_v26 = vld [vmem:[%s7254_s30 + $0x5a0] sm:$0xff]  ;;  %v412_v27 = vld [vmem:[%s7254_s30 + $0x5a8] sm:$0xff] }
  0x4a   : > { %v414_v28 = vld [vmem:[%s7254_s30 + $0x5c0] sm:$0xff]  ;;  %411 = vst [vmem:[%s7259_s7 + $0x2d0] sm:$0xff] %v410_v26  ;;  %413 = vst [vmem:[%s7259_s7 + $0x2d8] sm:$0xff] %v412_v27  ;;  %v416_v29 = vld [vmem:[%s7254_s30 + $0x5c8] sm:$0xff] }
  0x4b   : > { %415 = vst [vmem:[%s7259_s7 + $0x2e0] sm:$0xff] %v414_v28  ;;  %v418_v30 = vld [vmem:[%s7254_s30 + $0x5e0] sm:$0xff]  ;;  %v420_v31 = vld [vmem:[%s7254_s30 + $0x5e8] sm:$0xff]  ;;  %417 = vst [vmem:[%s7259_s7 + $0x2e8] sm:$0xff] %v416_v29 }
  0x4c   : > { %419 = vst [vmem:[%s7259_s7 + $0x2f0] sm:$0xff] %v418_v30  ;;  %421 = vst [vmem:[%s7259_s7 + $0x2f8] sm:$0xff] %v420_v31  ;;  %v422_v32 = vld [vmem:[%s7254_s30 + $0x600] sm:$0xff]  ;;  %v424_v33 = vld [vmem:[%s7254_s30 + $0x608] sm:$0xff] }
  0x4d   : > { %v426_v34 = vld [vmem:[%s7254_s30 + $0x620] sm:$0xff]  ;;  %423 = vst [vmem:[%s7259_s7 + $0x300] sm:$0xff] %v422_v32  ;;  %425 = vst [vmem:[%s7259_s7 + $0x308] sm:$0xff] %v424_v33  ;;  %v428_v35 = vld [vmem:[%s7254_s30 + $0x628] sm:$0xff] }
  0x4e   : > { %427 = vst [vmem:[%s7259_s7 + $0x310] sm:$0xff] %v426_v34  ;;  %v430_v36 = vld [vmem:[%s7254_s30 + $0x640] sm:$0xff]  ;;  %v432_v37 = vld [vmem:[%s7254_s30 + $0x648] sm:$0xff]  ;;  %429 = vst [vmem:[%s7259_s7 + $0x318] sm:$0xff] %v428_v35 }
  0x4f   : > { %431 = vst [vmem:[%s7259_s7 + $0x320] sm:$0xff] %v430_v36  ;;  %433 = vst [vmem:[%s7259_s7 + $0x328] sm:$0xff] %v432_v37  ;;  %v434_v38 = vld [vmem:[%s7254_s30 + $0x660] sm:$0xff]  ;;  %v436_v39 = vld [vmem:[%s7254_s30 + $0x668] sm:$0xff] }
  0x50   : > { %v438_v40 = vld [vmem:[%s7254_s30 + $0x680] sm:$0xff]  ;;  %435 = vst [vmem:[%s7259_s7 + $0x330] sm:$0xff] %v434_v38  ;;  %437 = vst [vmem:[%s7259_s7 + $0x338] sm:$0xff] %v436_v39  ;;  %v440_v41 = vld [vmem:[%s7254_s30 + $0x688] sm:$0xff] }
  0x51   : > { %439 = vst [vmem:[%s7259_s7 + $0x340] sm:$0xff] %v438_v40  ;;  %v442_v42 = vld [vmem:[%s7254_s30 + $0x6a0] sm:$0xff]  ;;  %v444_v43 = vld [vmem:[%s7254_s30 + $0x6a8] sm:$0xff]  ;;  %441 = vst [vmem:[%s7259_s7 + $0x348] sm:$0xff] %v440_v41 }
  0x52   : > { %443 = vst [vmem:[%s7259_s7 + $0x350] sm:$0xff] %v442_v42  ;;  %445 = vst [vmem:[%s7259_s7 + $0x358] sm:$0xff] %v444_v43  ;;  %v446_v44 = vld [vmem:[%s7254_s30 + $0x6c0] sm:$0xff]  ;;  %v448_v45 = vld [vmem:[%s7254_s30 + $0x6c8] sm:$0xff] }
  0x53   : > { %v450_v46 = vld [vmem:[%s7254_s30 + $0x6e0] sm:$0xff]  ;;  %447 = vst [vmem:[%s7259_s7 + $0x360] sm:$0xff] %v446_v44  ;;  %449 = vst [vmem:[%s7259_s7 + $0x368] sm:$0xff] %v448_v45  ;;  %v452_v47 = vld [vmem:[%s7254_s30 + $0x6e8] sm:$0xff] }
  0x54   : > { %451 = vst [vmem:[%s7259_s7 + $0x370] sm:$0xff] %v450_v46  ;;  %v454_v48 = vld [vmem:[%s7254_s30 + $0x700] sm:$0xff]  ;;  %v456_v49 = vld [vmem:[%s7254_s30 + $0x708] sm:$0xff]  ;;  %453 = vst [vmem:[%s7259_s7 + $0x378] sm:$0xff] %v452_v47 }
  0x55   : > { %455 = vst [vmem:[%s7259_s7 + $0x380] sm:$0xff] %v454_v48  ;;  %457 = vst [vmem:[%s7259_s7 + $0x388] sm:$0xff] %v456_v49  ;;  %v458_v50 = vld [vmem:[%s7254_s30 + $0x720] sm:$0xff]  ;;  %v460_v51 = vld [vmem:[%s7254_s30 + $0x728] sm:$0xff] }
  0x56   : > { %v462_v52 = vld [vmem:[%s7254_s30 + $0x740] sm:$0xff]  ;;  %459 = vst [vmem:[%s7259_s7 + $0x390] sm:$0xff] %v458_v50  ;;  %461 = vst [vmem:[%s7259_s7 + $0x398] sm:$0xff] %v460_v51  ;;  %v464_v53 = vld [vmem:[%s7254_s30 + $0x748] sm:$0xff] }
  0x57   : > { %463 = vst [vmem:[%s7259_s7 + $0x3a0] sm:$0xff] %v462_v52  ;;  %v466_v54 = vld [vmem:[%s7254_s30 + $0x760] sm:$0xff]  ;;  %v468_v55 = vld [vmem:[%s7254_s30 + $0x768] sm:$0xff]  ;;  %465 = vst [vmem:[%s7259_s7 + $0x3a8] sm:$0xff] %v464_v53 }
  0x58   : > { %467 = vst [vmem:[%s7259_s7 + $0x3b0] sm:$0xff] %v466_v54  ;;  %469 = vst [vmem:[%s7259_s7 + $0x3b8] sm:$0xff] %v468_v55  ;;  %v470_v56 = vld [vmem:[%s7254_s30 + $0x780] sm:$0xff]  ;;  %v472_v57 = vld [vmem:[%s7254_s30 + $0x788] sm:$0xff] }
  0x59   : > { %v474_v58 = vld [vmem:[%s7254_s30 + $0x7a0] sm:$0xff]  ;;  %471 = vst [vmem:[%s7259_s7 + $0x3c0] sm:$0xff] %v470_v56  ;;  %473 = vst [vmem:[%s7259_s7 + $0x3c8] sm:$0xff] %v472_v57  ;;  %v476_v59 = vld [vmem:[%s7254_s30 + $0x7a8] sm:$0xff] }
  0x5a   : > { %475 = vst [vmem:[%s7259_s7 + $0x3d0] sm:$0xff] %v474_v58  ;;  %v478_v60 = vld [vmem:[%s7254_s30 + $0x7c0] sm:$0xff]  ;;  %v480_v61 = vld [vmem:[%s7254_s30 + $0x7c8] sm:$0xff]  ;;  %477 = vst [vmem:[%s7259_s7 + $0x3d8] sm:$0xff] %v476_v59 }
  0x5b   : > { %479 = vst [vmem:[%s7259_s7 + $0x3e0] sm:$0xff] %v478_v60  ;;  %481 = vst [vmem:[%s7259_s7 + $0x3e8] sm:$0xff] %v480_v61  ;;  %v482_v62 = vld [vmem:[%s7254_s30 + $0x7e0] sm:$0xff]  ;;  %v484_v63 = vld [vmem:[%s7254_s30 + $0x7e8] sm:$0xff] }
  0x5c   : > { %v486_v0 = vld [vmem:[%s7254_s30 + $0x800] sm:$0xff]  ;;  %483 = vst [vmem:[%s7259_s7 + $0x3f0] sm:$0xff] %v482_v62  ;;  %485 = vst [vmem:[%s7259_s7 + $0x3f8] sm:$0xff] %v484_v63  ;;  %v488_v1 = vld [vmem:[%s7254_s30 + $0x808] sm:$0xff] }
  0x5d   : > { %487 = vst [vmem:[%s7259_s7 + $0x400] sm:$0xff] %v486_v0  ;;  %v490_v2 = vld [vmem:[%s7254_s30 + $0x820] sm:$0xff]  ;;  %v492_v3 = vld [vmem:[%s7254_s30 + $0x828] sm:$0xff]  ;;  %489 = vst [vmem:[%s7259_s7 + $0x408] sm:$0xff] %v488_v1 }
  0x5e   : > { %491 = vst [vmem:[%s7259_s7 + $0x410] sm:$0xff] %v490_v2  ;;  %493 = vst [vmem:[%s7259_s7 + $0x418] sm:$0xff] %v492_v3  ;;  %v494_v4 = vld [vmem:[%s7254_s30 + $0x840] sm:$0xff]  ;;  %v496_v5 = vld [vmem:[%s7254_s30 + $0x848] sm:$0xff] }
  0x5f   : > { %v498_v6 = vld [vmem:[%s7254_s30 + $0x860] sm:$0xff]  ;;  %495 = vst [vmem:[%s7259_s7 + $0x420] sm:$0xff] %v494_v4  ;;  %497 = vst [vmem:[%s7259_s7 + $0x428] sm:$0xff] %v496_v5  ;;  %v500_v7 = vld [vmem:[%s7254_s30 + $0x868] sm:$0xff] }
  0x60   : > { %499 = vst [vmem:[%s7259_s7 + $0x430] sm:$0xff] %v498_v6  ;;  %v502_v8 = vld [vmem:[%s7254_s30 + $0x880] sm:$0xff]  ;;  %v504_v9 = vld [vmem:[%s7254_s30 + $0x888] sm:$0xff]  ;;  %501 = vst [vmem:[%s7259_s7 + $0x438] sm:$0xff] %v500_v7 }
  0x61   : > { %503 = vst [vmem:[%s7259_s7 + $0x440] sm:$0xff] %v502_v8  ;;  %505 = vst [vmem:[%s7259_s7 + $0x448] sm:$0xff] %v504_v9  ;;  %v506_v10 = vld [vmem:[%s7254_s30 + $0x8a0] sm:$0xff]  ;;  %v508_v11 = vld [vmem:[%s7254_s30 + $0x8a8] sm:$0xff] }
  0x62   : > { %v510_v12 = vld [vmem:[%s7254_s30 + $0x8c0] sm:$0xff]  ;;  %507 = vst [vmem:[%s7259_s7 + $0x450] sm:$0xff] %v506_v10  ;;  %509 = vst [vmem:[%s7259_s7 + $0x458] sm:$0xff] %v508_v11  ;;  %v512_v13 = vld [vmem:[%s7254_s30 + $0x8c8] sm:$0xff] }
  0x63   : > { %511 = vst [vmem:[%s7259_s7 + $0x460] sm:$0xff] %v510_v12  ;;  %v514_v14 = vld [vmem:[%s7254_s30 + $0x8e0] sm:$0xff]  ;;  %v516_v15 = vld [vmem:[%s7254_s30 + $0x8e8] sm:$0xff]  ;;  %513 = vst [vmem:[%s7259_s7 + $0x468] sm:$0xff] %v512_v13 }
  0x64   : > { %515 = vst [vmem:[%s7259_s7 + $0x470] sm:$0xff] %v514_v14  ;;  %517 = vst [vmem:[%s7259_s7 + $0x478] sm:$0xff] %v516_v15  ;;  %v518_v16 = vld [vmem:[%s7254_s30 + $0x900] sm:$0xff]  ;;  %v520_v17 = vld [vmem:[%s7254_s30 + $0x908] sm:$0xff] }
  0x65   : > { %v522_v18 = vld [vmem:[%s7254_s30 + $0x920] sm:$0xff]  ;;  %519 = vst [vmem:[%s7259_s7 + $0x480] sm:$0xff] %v518_v16  ;;  %521 = vst [vmem:[%s7259_s7 + $0x488] sm:$0xff] %v520_v17  ;;  %v524_v19 = vld [vmem:[%s7254_s30 + $0x928] sm:$0xff] }
  0x66   : > { %523 = vst [vmem:[%s7259_s7 + $0x490] sm:$0xff] %v522_v18  ;;  %v526_v20 = vld [vmem:[%s7254_s30 + $0x940] sm:$0xff]  ;;  %v528_v21 = vld [vmem:[%s7254_s30 + $0x948] sm:$0xff]  ;;  %525 = vst [vmem:[%s7259_s7 + $0x498] sm:$0xff] %v524_v19 }
  0x67   : > { %527 = vst [vmem:[%s7259_s7 + $0x4a0] sm:$0xff] %v526_v20  ;;  %529 = vst [vmem:[%s7259_s7 + $0x4a8] sm:$0xff] %v528_v21  ;;  %v530_v22 = vld [vmem:[%s7254_s30 + $0x960] sm:$0xff]  ;;  %v532_v23 = vld [vmem:[%s7254_s30 + $0x968] sm:$0xff] }
  0x68   : > { %v534_v24 = vld [vmem:[%s7254_s30 + $0x980] sm:$0xff]  ;;  %531 = vst [vmem:[%s7259_s7 + $0x4b0] sm:$0xff] %v530_v22  ;;  %533 = vst [vmem:[%s7259_s7 + $0x4b8] sm:$0xff] %v532_v23  ;;  %v536_v25 = vld [vmem:[%s7254_s30 + $0x988] sm:$0xff] }
  0x69   : > { %535 = vst [vmem:[%s7259_s7 + $0x4c0] sm:$0xff] %v534_v24  ;;  %v538_v26 = vld [vmem:[%s7254_s30 + $0x9a0] sm:$0xff]  ;;  %v540_v27 = vld [vmem:[%s7254_s30 + $0x9a8] sm:$0xff]  ;;  %537 = vst [vmem:[%s7259_s7 + $0x4c8] sm:$0xff] %v536_v25 }
  0x6a   : > { %539 = vst [vmem:[%s7259_s7 + $0x4d0] sm:$0xff] %v538_v26  ;;  %541 = vst [vmem:[%s7259_s7 + $0x4d8] sm:$0xff] %v540_v27  ;;  %v542_v28 = vld [vmem:[%s7254_s30 + $0x9c0] sm:$0xff]  ;;  %v544_v29 = vld [vmem:[%s7254_s30 + $0x9c8] sm:$0xff] }
  0x6b   : > { %v546_v30 = vld [vmem:[%s7254_s30 + $0x9e0] sm:$0xff]  ;;  %543 = vst [vmem:[%s7259_s7 + $0x4e0] sm:$0xff] %v542_v28  ;;  %545 = vst [vmem:[%s7259_s7 + $0x4e8] sm:$0xff] %v544_v29  ;;  %v548_v31 = vld [vmem:[%s7254_s30 + $0x9e8] sm:$0xff] }
  0x6c   : > { %547 = vst [vmem:[%s7259_s7 + $0x4f0] sm:$0xff] %v546_v30  ;;  %v550_v32 = vld [vmem:[%s7254_s30 + $0xa00] sm:$0xff]  ;;  %v552_v33 = vld [vmem:[%s7254_s30 + $0xa08] sm:$0xff]  ;;  %549 = vst [vmem:[%s7259_s7 + $0x4f8] sm:$0xff] %v548_v31 }
  0x6d   : > { %551 = vst [vmem:[%s7259_s7 + $0x500] sm:$0xff] %v550_v32  ;;  %553 = vst [vmem:[%s7259_s7 + $0x508] sm:$0xff] %v552_v33  ;;  %v554_v34 = vld [vmem:[%s7254_s30 + $0xa20] sm:$0xff]  ;;  %v556_v35 = vld [vmem:[%s7254_s30 + $0xa28] sm:$0xff] }
  0x6e   : > { %v558_v36 = vld [vmem:[%s7254_s30 + $0xa40] sm:$0xff]  ;;  %555 = vst [vmem:[%s7259_s7 + $0x510] sm:$0xff] %v554_v34  ;;  %557 = vst [vmem:[%s7259_s7 + $0x518] sm:$0xff] %v556_v35  ;;  %v560_v37 = vld [vmem:[%s7254_s30 + $0xa48] sm:$0xff] }
  0x6f   : > { %559 = vst [vmem:[%s7259_s7 + $0x520] sm:$0xff] %v558_v36  ;;  %v562_v38 = vld [vmem:[%s7254_s30 + $0xa60] sm:$0xff]  ;;  %v564_v39 = vld [vmem:[%s7254_s30 + $0xa68] sm:$0xff]  ;;  %561 = vst [vmem:[%s7259_s7 + $0x528] sm:$0xff] %v560_v37 }
  0x70   : > { %563 = vst [vmem:[%s7259_s7 + $0x530] sm:$0xff] %v562_v38  ;;  %565 = vst [vmem:[%s7259_s7 + $0x538] sm:$0xff] %v564_v39  ;;  %v566_v40 = vld [vmem:[%s7254_s30 + $0xa80] sm:$0xff]  ;;  %v568_v41 = vld [vmem:[%s7254_s30 + $0xa88] sm:$0xff] }
  0x71   : > { %v570_v42 = vld [vmem:[%s7254_s30 + $0xaa0] sm:$0xff]  ;;  %567 = vst [vmem:[%s7259_s7 + $0x540] sm:$0xff] %v566_v40  ;;  %569 = vst [vmem:[%s7259_s7 + $0x548] sm:$0xff] %v568_v41  ;;  %v572_v43 = vld [vmem:[%s7254_s30 + $0xaa8] sm:$0xff] }
  0x72   : > { %571 = vst [vmem:[%s7259_s7 + $0x550] sm:$0xff] %v570_v42  ;;  %v574_v44 = vld [vmem:[%s7254_s30 + $0xac0] sm:$0xff]  ;;  %v576_v45 = vld [vmem:[%s7254_s30 + $0xac8] sm:$0xff]  ;;  %573 = vst [vmem:[%s7259_s7 + $0x558] sm:$0xff] %v572_v43 }
  0x73   : > { %575 = vst [vmem:[%s7259_s7 + $0x560] sm:$0xff] %v574_v44  ;;  %577 = vst [vmem:[%s7259_s7 + $0x568] sm:$0xff] %v576_v45  ;;  %v578_v46 = vld [vmem:[%s7254_s30 + $0xae0] sm:$0xff]  ;;  %v580_v47 = vld [vmem:[%s7254_s30 + $0xae8] sm:$0xff] }
  0x74   : > { %v582_v48 = vld [vmem:[%s7254_s30 + $0xb00] sm:$0xff]  ;;  %579 = vst [vmem:[%s7259_s7 + $0x570] sm:$0xff] %v578_v46  ;;  %581 = vst [vmem:[%s7259_s7 + $0x578] sm:$0xff] %v580_v47  ;;  %v584_v49 = vld [vmem:[%s7254_s30 + $0xb08] sm:$0xff] }
  0x75   : > { %583 = vst [vmem:[%s7259_s7 + $0x580] sm:$0xff] %v582_v48  ;;  %v586_v50 = vld [vmem:[%s7254_s30 + $0xb20] sm:$0xff]  ;;  %v588_v51 = vld [vmem:[%s7254_s30 + $0xb28] sm:$0xff]  ;;  %585 = vst [vmem:[%s7259_s7 + $0x588] sm:$0xff] %v584_v49 }
  0x76   : > { %587 = vst [vmem:[%s7259_s7 + $0x590] sm:$0xff] %v586_v50  ;;  %589 = vst [vmem:[%s7259_s7 + $0x598] sm:$0xff] %v588_v51  ;;  %v590_v52 = vld [vmem:[%s7254_s30 + $0xb40] sm:$0xff]  ;;  %v592_v53 = vld [vmem:[%s7254_s30 + $0xb48] sm:$0xff] }
  0x77   : > { %v594_v54 = vld [vmem:[%s7254_s30 + $0xb60] sm:$0xff]  ;;  %591 = vst [vmem:[%s7259_s7 + $0x5a0] sm:$0xff] %v590_v52  ;;  %593 = vst [vmem:[%s7259_s7 + $0x5a8] sm:$0xff] %v592_v53  ;;  %v596_v55 = vld [vmem:[%s7254_s30 + $0xb68] sm:$0xff] }
  0x78   : > { %595 = vst [vmem:[%s7259_s7 + $0x5b0] sm:$0xff] %v594_v54  ;;  %v598_v56 = vld [vmem:[%s7254_s30 + $0xb80] sm:$0xff]  ;;  %v600_v57 = vld [vmem:[%s7254_s30 + $0xb88] sm:$0xff]  ;;  %597 = vst [vmem:[%s7259_s7 + $0x5b8] sm:$0xff] %v596_v55 }
  0x79   : > { %599 = vst [vmem:[%s7259_s7 + $0x5c0] sm:$0xff] %v598_v56  ;;  %601 = vst [vmem:[%s7259_s7 + $0x5c8] sm:$0xff] %v600_v57  ;;  %v602_v58 = vld [vmem:[%s7254_s30 + $0xba0] sm:$0xff]  ;;  %v604_v59 = vld [vmem:[%s7254_s30 + $0xba8] sm:$0xff] }
  0x7a   : > { %v606_v60 = vld [vmem:[%s7254_s30 + $0xbc0] sm:$0xff]  ;;  %603 = vst [vmem:[%s7259_s7 + $0x5d0] sm:$0xff] %v602_v58  ;;  %605 = vst [vmem:[%s7259_s7 + $0x5d8] sm:$0xff] %v604_v59  ;;  %v608_v61 = vld [vmem:[%s7254_s30 + $0xbc8] sm:$0xff] }
  0x7b   : > { %607 = vst [vmem:[%s7259_s7 + $0x5e0] sm:$0xff] %v606_v60  ;;  %v610_v62 = vld [vmem:[%s7254_s30 + $0xbe0] sm:$0xff]  ;;  %v612_v63 = vld [vmem:[%s7254_s30 + $0xbe8] sm:$0xff]  ;;  %609 = vst [vmem:[%s7259_s7 + $0x5e8] sm:$0xff] %v608_v61 }
  0x7c   : > { %611 = vst [vmem:[%s7259_s7 + $0x5f0] sm:$0xff] %v610_v62  ;;  %613 = vst [vmem:[%s7259_s7 + $0x5f8] sm:$0xff] %v612_v63  ;;  %v614_v0 = vld [vmem:[%s7254_s30 + $0xc00] sm:$0xff]  ;;  %v616_v1 = vld [vmem:[%s7254_s30 + $0xc08] sm:$0xff] }
  0x7d   : > { %v618_v2 = vld [vmem:[%s7254_s30 + $0xc20] sm:$0xff]  ;;  %615 = vst [vmem:[%s7259_s7 + $0x600] sm:$0xff] %v614_v0  ;;  %617 = vst [vmem:[%s7259_s7 + $0x608] sm:$0xff] %v616_v1  ;;  %v620_v3 = vld [vmem:[%s7254_s30 + $0xc28] sm:$0xff] }
  0x7e   : > { %619 = vst [vmem:[%s7259_s7 + $0x610] sm:$0xff] %v618_v2  ;;  %v622_v4 = vld [vmem:[%s7254_s30 + $0xc40] sm:$0xff]  ;;  %v624_v5 = vld [vmem:[%s7254_s30 + $0xc48] sm:$0xff]  ;;  %621 = vst [vmem:[%s7259_s7 + $0x618] sm:$0xff] %v620_v3 }
  0x7f   : > { %623 = vst [vmem:[%s7259_s7 + $0x620] sm:$0xff] %v622_v4  ;;  %625 = vst [vmem:[%s7259_s7 + $0x628] sm:$0xff] %v624_v5  ;;  %v626_v6 = vld [vmem:[%s7254_s30 + $0xc60] sm:$0xff]  ;;  %v628_v7 = vld [vmem:[%s7254_s30 + $0xc68] sm:$0xff] }
  0x80   : > { %v630_v8 = vld [vmem:[%s7254_s30 + $0xc80] sm:$0xff]  ;;  %627 = vst [vmem:[%s7259_s7 + $0x630] sm:$0xff] %v626_v6  ;;  %629 = vst [vmem:[%s7259_s7 + $0x638] sm:$0xff] %v628_v7  ;;  %v632_v9 = vld [vmem:[%s7254_s30 + $0xc88] sm:$0xff] }
  0x81   : > { %631 = vst [vmem:[%s7259_s7 + $0x640] sm:$0xff] %v630_v8  ;;  %v634_v10 = vld [vmem:[%s7254_s30 + $0xca0] sm:$0xff]  ;;  %v636_v11 = vld [vmem:[%s7254_s30 + $0xca8] sm:$0xff]  ;;  %633 = vst [vmem:[%s7259_s7 + $0x648] sm:$0xff] %v632_v9 }
  0x82   : > { %635 = vst [vmem:[%s7259_s7 + $0x650] sm:$0xff] %v634_v10  ;;  %637 = vst [vmem:[%s7259_s7 + $0x658] sm:$0xff] %v636_v11  ;;  %v638_v12 = vld [vmem:[%s7254_s30 + $0xcc0] sm:$0xff]  ;;  %v640_v13 = vld [vmem:[%s7254_s30 + $0xcc8] sm:$0xff] }
  0x83   : > { %v642_v14 = vld [vmem:[%s7254_s30 + $0xce0] sm:$0xff]  ;;  %639 = vst [vmem:[%s7259_s7 + $0x660] sm:$0xff] %v638_v12  ;;  %641 = vst [vmem:[%s7259_s7 + $0x668] sm:$0xff] %v640_v13  ;;  %v644_v15 = vld [vmem:[%s7254_s30 + $0xce8] sm:$0xff] }
  0x84   : > { %643 = vst [vmem:[%s7259_s7 + $0x670] sm:$0xff] %v642_v14  ;;  %v646_v16 = vld [vmem:[%s7254_s30 + $0xd00] sm:$0xff]  ;;  %v648_v17 = vld [vmem:[%s7254_s30 + $0xd08] sm:$0xff]  ;;  %645 = vst [vmem:[%s7259_s7 + $0x678] sm:$0xff] %v644_v15 }
  0x85   : > { %647 = vst [vmem:[%s7259_s7 + $0x680] sm:$0xff] %v646_v16  ;;  %649 = vst [vmem:[%s7259_s7 + $0x688] sm:$0xff] %v648_v17  ;;  %v650_v18 = vld [vmem:[%s7254_s30 + $0xd20] sm:$0xff]  ;;  %v652_v19 = vld [vmem:[%s7254_s30 + $0xd28] sm:$0xff] }
  0x86   : > { %v654_v20 = vld [vmem:[%s7254_s30 + $0xd40] sm:$0xff]  ;;  %651 = vst [vmem:[%s7259_s7 + $0x690] sm:$0xff] %v650_v18  ;;  %653 = vst [vmem:[%s7259_s7 + $0x698] sm:$0xff] %v652_v19  ;;  %v656_v21 = vld [vmem:[%s7254_s30 + $0xd48] sm:$0xff] }
  0x87   : > { %655 = vst [vmem:[%s7259_s7 + $0x6a0] sm:$0xff] %v654_v20  ;;  %v658_v22 = vld [vmem:[%s7254_s30 + $0xd60] sm:$0xff]  ;;  %v660_v23 = vld [vmem:[%s7254_s30 + $0xd68] sm:$0xff]  ;;  %657 = vst [vmem:[%s7259_s7 + $0x6a8] sm:$0xff] %v656_v21 }
  0x88   : > { %659 = vst [vmem:[%s7259_s7 + $0x6b0] sm:$0xff] %v658_v22  ;;  %661 = vst [vmem:[%s7259_s7 + $0x6b8] sm:$0xff] %v660_v23  ;;  %v662_v24 = vld [vmem:[%s7254_s30 + $0xd80] sm:$0xff]  ;;  %v664_v25 = vld [vmem:[%s7254_s30 + $0xd88] sm:$0xff] }
  0x89   : > { %v666_v26 = vld [vmem:[%s7254_s30 + $0xda0] sm:$0xff]  ;;  %663 = vst [vmem:[%s7259_s7 + $0x6c0] sm:$0xff] %v662_v24  ;;  %665 = vst [vmem:[%s7259_s7 + $0x6c8] sm:$0xff] %v664_v25  ;;  %v668_v27 = vld [vmem:[%s7254_s30 + $0xda8] sm:$0xff] }
  0x8a   : > { %667 = vst [vmem:[%s7259_s7 + $0x6d0] sm:$0xff] %v666_v26  ;;  %v670_v28 = vld [vmem:[%s7254_s30 + $0xdc0] sm:$0xff]  ;;  %v672_v29 = vld [vmem:[%s7254_s30 + $0xdc8] sm:$0xff]  ;;  %669 = vst [vmem:[%s7259_s7 + $0x6d8] sm:$0xff] %v668_v27 }
  0x8b   : > { %671 = vst [vmem:[%s7259_s7 + $0x6e0] sm:$0xff] %v670_v28  ;;  %673 = vst [vmem:[%s7259_s7 + $0x6e8] sm:$0xff] %v672_v29  ;;  %v674_v30 = vld [vmem:[%s7254_s30 + $0xde0] sm:$0xff]  ;;  %v676_v31 = vld [vmem:[%s7254_s30 + $0xde8] sm:$0xff] }
  0x8c   : > { %v678_v32 = vld [vmem:[%s7254_s30 + $0xe00] sm:$0xff]  ;;  %675 = vst [vmem:[%s7259_s7 + $0x6f0] sm:$0xff] %v674_v30  ;;  %677 = vst [vmem:[%s7259_s7 + $0x6f8] sm:$0xff] %v676_v31  ;;  %v680_v33 = vld [vmem:[%s7254_s30 + $0xe08] sm:$0xff] }
  0x8d   : > { %679 = vst [vmem:[%s7259_s7 + $0x700] sm:$0xff] %v678_v32  ;;  %v682_v34 = vld [vmem:[%s7254_s30 + $0xe20] sm:$0xff]  ;;  %v684_v35 = vld [vmem:[%s7254_s30 + $0xe28] sm:$0xff]  ;;  %681 = vst [vmem:[%s7259_s7 + $0x708] sm:$0xff] %v680_v33 }
  0x8e   : > { %683 = vst [vmem:[%s7259_s7 + $0x710] sm:$0xff] %v682_v34  ;;  %685 = vst [vmem:[%s7259_s7 + $0x718] sm:$0xff] %v684_v35  ;;  %v686_v36 = vld [vmem:[%s7254_s30 + $0xe40] sm:$0xff]  ;;  %v688_v37 = vld [vmem:[%s7254_s30 + $0xe48] sm:$0xff] }
  0x8f   : > { %v690_v38 = vld [vmem:[%s7254_s30 + $0xe60] sm:$0xff]  ;;  %687 = vst [vmem:[%s7259_s7 + $0x720] sm:$0xff] %v686_v36  ;;  %689 = vst [vmem:[%s7259_s7 + $0x728] sm:$0xff] %v688_v37  ;;  %v692_v39 = vld [vmem:[%s7254_s30 + $0xe68] sm:$0xff] }
  0x90   : > { %691 = vst [vmem:[%s7259_s7 + $0x730] sm:$0xff] %v690_v38  ;;  %v694_v40 = vld [vmem:[%s7254_s30 + $0xe80] sm:$0xff]  ;;  %v696_v41 = vld [vmem:[%s7254_s30 + $0xe88] sm:$0xff]  ;;  %693 = vst [vmem:[%s7259_s7 + $0x738] sm:$0xff] %v692_v39 }
  0x91   : > { %695 = vst [vmem:[%s7259_s7 + $0x740] sm:$0xff] %v694_v40  ;;  %697 = vst [vmem:[%s7259_s7 + $0x748] sm:$0xff] %v696_v41  ;;  %v698_v42 = vld [vmem:[%s7254_s30 + $0xea0] sm:$0xff]  ;;  %v700_v43 = vld [vmem:[%s7254_s30 + $0xea8] sm:$0xff] }
  0x92   : > { %v702_v44 = vld [vmem:[%s7254_s30 + $0xec0] sm:$0xff]  ;;  %699 = vst [vmem:[%s7259_s7 + $0x750] sm:$0xff] %v698_v42  ;;  %701 = vst [vmem:[%s7259_s7 + $0x758] sm:$0xff] %v700_v43  ;;  %v704_v45 = vld [vmem:[%s7254_s30 + $0xec8] sm:$0xff] }
  0x93   : > { %703 = vst [vmem:[%s7259_s7 + $0x760] sm:$0xff] %v702_v44  ;;  %v706_v46 = vld [vmem:[%s7254_s30 + $0xee0] sm:$0xff]  ;;  %v708_v47 = vld [vmem:[%s7254_s30 + $0xee8] sm:$0xff]  ;;  %705 = vst [vmem:[%s7259_s7 + $0x768] sm:$0xff] %v704_v45 }
  0x94   : > { %707 = vst [vmem:[%s7259_s7 + $0x770] sm:$0xff] %v706_v46  ;;  %709 = vst [vmem:[%s7259_s7 + $0x778] sm:$0xff] %v708_v47  ;;  %v710_v48 = vld [vmem:[%s7254_s30 + $0xf00] sm:$0xff]  ;;  %v712_v49 = vld [vmem:[%s7254_s30 + $0xf08] sm:$0xff] }
  0x95   : > { %v714_v50 = vld [vmem:[%s7254_s30 + $0xf20] sm:$0xff]  ;;  %711 = vst [vmem:[%s7259_s7 + $0x780] sm:$0xff] %v710_v48  ;;  %713 = vst [vmem:[%s7259_s7 + $0x788] sm:$0xff] %v712_v49  ;;  %v716_v51 = vld [vmem:[%s7254_s30 + $0xf28] sm:$0xff] }
  0x96   : > { %715 = vst [vmem:[%s7259_s7 + $0x790] sm:$0xff] %v714_v50  ;;  %v718_v52 = vld [vmem:[%s7254_s30 + $0xf40] sm:$0xff]  ;;  %v720_v53 = vld [vmem:[%s7254_s30 + $0xf48] sm:$0xff]  ;;  %717 = vst [vmem:[%s7259_s7 + $0x798] sm:$0xff] %v716_v51 }
  0x97   : > { %719 = vst [vmem:[%s7259_s7 + $0x7a0] sm:$0xff] %v718_v52  ;;  %721 = vst [vmem:[%s7259_s7 + $0x7a8] sm:$0xff] %v720_v53  ;;  %v722_v54 = vld [vmem:[%s7254_s30 + $0xf60] sm:$0xff]  ;;  %v724_v55 = vld [vmem:[%s7254_s30 + $0xf68] sm:$0xff] }
  0x98   : > { %v726_v56 = vld [vmem:[%s7254_s30 + $0xf80] sm:$0xff]  ;;  %723 = vst [vmem:[%s7259_s7 + $0x7b0] sm:$0xff] %v722_v54  ;;  %725 = vst [vmem:[%s7259_s7 + $0x7b8] sm:$0xff] %v724_v55  ;;  %v728_v57 = vld [vmem:[%s7254_s30 + $0xf88] sm:$0xff] }
  0x99   : > { %727 = vst [vmem:[%s7259_s7 + $0x7c0] sm:$0xff] %v726_v56  ;;  %v730_v58 = vld [vmem:[%s7254_s30 + $0xfa0] sm:$0xff]  ;;  %v732_v59 = vld [vmem:[%s7254_s30 + $0xfa8] sm:$0xff]  ;;  %729 = vst [vmem:[%s7259_s7 + $0x7c8] sm:$0xff] %v728_v57 }
  0x9a   : > { %731 = vst [vmem:[%s7259_s7 + $0x7d0] sm:$0xff] %v730_v58  ;;  %733 = vst [vmem:[%s7259_s7 + $0x7d8] sm:$0xff] %v732_v59  ;;  %v734_v60 = vld [vmem:[%s7254_s30 + $0xfc0] sm:$0xff]  ;;  %v736_v61 = vld [vmem:[%s7254_s30 + $0xfc8] sm:$0xff] }
  0x9b   : > { %v738_v62 = vld [vmem:[%s7254_s30 + $0xfe0] sm:$0xff]  ;;  %735 = vst [vmem:[%s7259_s7 + $0x7e0] sm:$0xff] %v734_v60  ;;  %737 = vst [vmem:[%s7259_s7 + $0x7e8] sm:$0xff] %v736_v61  ;;  %v740_v63 = vld [vmem:[%s7254_s30 + $0xfe8] sm:$0xff] }
  0x9c   : > { %739 = vst [vmem:[%s7259_s7 + $0x7f0] sm:$0xff] %v738_v62  ;;  %741 = vst [vmem:[%s7259_s7 + $0x7f8] sm:$0xff] %v740_v63 }
  0x9d PF: > { %747 = sbr.rel (!%p7224_p4) target bundleno = 212 (0xd4), region = 47  ;;  %s749_s8 = sand.u32 (%p7224_p4), 1, %s7116_s21  }
  0x9e   : > { %s6220_s9 = sshll.u32 (%p7224_p4), %s7132_s25, 5  ;;  %s6605_s10 = smul.u32 (%p7224_p4), 800, %s749_s8 }
  0x9f   : > { %s7777_s16 = scalar_lea.vmem (%p7224_p4), %s9417_s2, %s6220_s9 }
  0xa0   : > { %v767_v0 = vld [vmem:[%s7777_s16] sm:$0xff] (%p7224_p4)  ;;  %v769_v1 = vld [vmem:[%s7777_s16 + $0x8] sm:$0xff] (%p7224_p4)  ;;  %v771_v2 = vld [vmem:[%s7777_s16 + $0x10] sm:$0xff] (%p7224_p4)  ;;  %s7785_s6 = scalar_lea.vmem (%p7224_p4), [#allocation3], %s6605_s10 }
  0xa1   : > { %v773_v3 = vld [vmem:[%s7777_s16 + $0x18] sm:$0xff] (%p7224_p4)  ;;  %v775_v4 = vld [vmem:[%s7777_s16 + $0x40] sm:$0xff] (%p7224_p4)  ;;  %v777_v5 = vld [vmem:[%s7777_s16 + $0x48] sm:$0xff] (%p7224_p4)  ;;  %768 = vst [vmem:[%s7785_s6] sm:$0xff] (%p7224_p4), %v767_v0 }
  0xa2   : > { %770 = vst [vmem:[%s7785_s6 + $0x8] sm:$0xff] (%p7224_p4), %v769_v1  ;;  %772 = vst [vmem:[%s7785_s6 + $0x10] sm:$0xff] (%p7224_p4), %v771_v2  ;;  %v779_v6 = vld [vmem:[%s7777_s16 + $0x50] sm:$0xff] (%p7224_p4)  ;;  %v781_v7 = vld [vmem:[%s7777_s16 + $0x58] sm:$0xff] (%p7224_p4) }
  0xa3   : > { %774 = vst [vmem:[%s7785_s6 + $0x18] sm:$0xff] (%p7224_p4), %v773_v3  ;;  %776 = vst [vmem:[%s7785_s6 + $0x20] sm:$0xff] (%p7224_p4), %v775_v4  ;;  %v783_v8 = vld [vmem:[%s7777_s16 + $0x80] sm:$0xff] (%p7224_p4)  ;;  %v785_v9 = vld [vmem:[%s7777_s16 + $0x88] sm:$0xff] (%p7224_p4) }
  0xa4   : > { %778 = vst [vmem:[%s7785_s6 + $0x28] sm:$0xff] %v777_v5  ;;  %780 = vst [vmem:[%s7785_s6 + $0x30] sm:$0xff] %v779_v6  ;;  %v787_v10 = vld [vmem:[%s7777_s16 + $0x90] sm:$0xff]  ;;  %v789_v11 = vld [vmem:[%s7777_s16 + $0x98] sm:$0xff] }
  0xa5   : > { %782 = vst [vmem:[%s7785_s6 + $0x38] sm:$0xff] %v781_v7  ;;  %784 = vst [vmem:[%s7785_s6 + $0x40] sm:$0xff] %v783_v8  ;;  %v791_v12 = vld [vmem:[%s7777_s16 + $0xc0] sm:$0xff]  ;;  %v793_v13 = vld [vmem:[%s7777_s16 + $0xc8] sm:$0xff] }
  0xa6   : > { %786 = vst [vmem:[%s7785_s6 + $0x48] sm:$0xff] %v785_v9  ;;  %788 = vst [vmem:[%s7785_s6 + $0x50] sm:$0xff] %v787_v10  ;;  %v795_v14 = vld [vmem:[%s7777_s16 + $0xd0] sm:$0xff]  ;;  %v797_v15 = vld [vmem:[%s7777_s16 + $0xd8] sm:$0xff] }
  0xa7   : > { %790 = vst [vmem:[%s7785_s6 + $0x58] sm:$0xff] %v789_v11  ;;  %792 = vst [vmem:[%s7785_s6 + $0x60] sm:$0xff] %v791_v12  ;;  %v799_v16 = vld [vmem:[%s7777_s16 + $0x100] sm:$0xff]  ;;  %v801_v17 = vld [vmem:[%s7777_s16 + $0x108] sm:$0xff] }
  0xa8   : > { %794 = vst [vmem:[%s7785_s6 + $0x68] sm:$0xff] %v793_v13  ;;  %796 = vst [vmem:[%s7785_s6 + $0x70] sm:$0xff] %v795_v14  ;;  %v803_v18 = vld [vmem:[%s7777_s16 + $0x110] sm:$0xff]  ;;  %v805_v19 = vld [vmem:[%s7777_s16 + $0x118] sm:$0xff] }
  0xa9   : > { %798 = vst [vmem:[%s7785_s6 + $0x78] sm:$0xff] %v797_v15  ;;  %800 = vst [vmem:[%s7785_s6 + $0x80] sm:$0xff] %v799_v16  ;;  %v807_v20 = vld [vmem:[%s7777_s16 + $0x140] sm:$0xff]  ;;  %v809_v21 = vld [vmem:[%s7777_s16 + $0x148] sm:$0xff] }
  0xaa   : > { %802 = vst [vmem:[%s7785_s6 + $0x88] sm:$0xff] %v801_v17  ;;  %804 = vst [vmem:[%s7785_s6 + $0x90] sm:$0xff] %v803_v18  ;;  %v811_v22 = vld [vmem:[%s7777_s16 + $0x150] sm:$0xff]  ;;  %v813_v23 = vld [vmem:[%s7777_s16 + $0x158] sm:$0xff] }
  0xab   : > { %806 = vst [vmem:[%s7785_s6 + $0x98] sm:$0xff] %v805_v19  ;;  %808 = vst [vmem:[%s7785_s6 + $0xa0] sm:$0xff] %v807_v20  ;;  %v815_v24 = vld [vmem:[%s7777_s16 + $0x180] sm:$0xff]  ;;  %v817_v25 = vld [vmem:[%s7777_s16 + $0x188] sm:$0xff] }
  0xac   : > { %810 = vst [vmem:[%s7785_s6 + $0xa8] sm:$0xff] %v809_v21  ;;  %812 = vst [vmem:[%s7785_s6 + $0xb0] sm:$0xff] %v811_v22  ;;  %v819_v26 = vld [vmem:[%s7777_s16 + $0x190] sm:$0xff]  ;;  %v821_v27 = vld [vmem:[%s7777_s16 + $0x198] sm:$0xff] }
  0xad   : > { %814 = vst [vmem:[%s7785_s6 + $0xb8] sm:$0xff] %v813_v23  ;;  %816 = vst [vmem:[%s7785_s6 + $0xc0] sm:$0xff] %v815_v24  ;;  %v823_v28 = vld [vmem:[%s7777_s16 + $0x1c0] sm:$0xff]  ;;  %v825_v29 = vld [vmem:[%s7777_s16 + $0x1c8] sm:$0xff] }
  0xae   : > { %818 = vst [vmem:[%s7785_s6 + $0xc8] sm:$0xff] %v817_v25  ;;  %820 = vst [vmem:[%s7785_s6 + $0xd0] sm:$0xff] %v819_v26  ;;  %v827_v30 = vld [vmem:[%s7777_s16 + $0x1d0] sm:$0xff]  ;;  %v829_v31 = vld [vmem:[%s7777_s16 + $0x1d8] sm:$0xff] }
  0xaf   : > { %822 = vst [vmem:[%s7785_s6 + $0xd8] sm:$0xff] %v821_v27  ;;  %824 = vst [vmem:[%s7785_s6 + $0xe0] sm:$0xff] %v823_v28  ;;  %v831_v32 = vld [vmem:[%s7777_s16 + $0x200] sm:$0xff]  ;;  %v833_v33 = vld [vmem:[%s7777_s16 + $0x208] sm:$0xff] }
  0xb0   : > { %826 = vst [vmem:[%s7785_s6 + $0xe8] sm:$0xff] %v825_v29  ;;  %828 = vst [vmem:[%s7785_s6 + $0xf0] sm:$0xff] %v827_v30  ;;  %v835_v34 = vld [vmem:[%s7777_s16 + $0x210] sm:$0xff]  ;;  %v837_v35 = vld [vmem:[%s7777_s16 + $0x218] sm:$0xff] }
  0xb1   : > { %830 = vst [vmem:[%s7785_s6 + $0xf8] sm:$0xff] %v829_v31  ;;  %832 = vst [vmem:[%s7785_s6 + $0x100] sm:$0xff] %v831_v32  ;;  %v839_v36 = vld [vmem:[%s7777_s16 + $0x240] sm:$0xff]  ;;  %v841_v37 = vld [vmem:[%s7777_s16 + $0x248] sm:$0xff] }
  0xb2   : > { %834 = vst [vmem:[%s7785_s6 + $0x108] sm:$0xff] %v833_v33  ;;  %836 = vst [vmem:[%s7785_s6 + $0x110] sm:$0xff] %v835_v34  ;;  %v843_v38 = vld [vmem:[%s7777_s16 + $0x250] sm:$0xff]  ;;  %v845_v39 = vld [vmem:[%s7777_s16 + $0x258] sm:$0xff] }
  0xb3   : > { %838 = vst [vmem:[%s7785_s6 + $0x118] sm:$0xff] %v837_v35  ;;  %840 = vst [vmem:[%s7785_s6 + $0x120] sm:$0xff] %v839_v36  ;;  %v847_v40 = vld [vmem:[%s7777_s16 + $0x280] sm:$0xff]  ;;  %v849_v41 = vld [vmem:[%s7777_s16 + $0x288] sm:$0xff] }
  0xb4   : > { %842 = vst [vmem:[%s7785_s6 + $0x128] sm:$0xff] %v841_v37  ;;  %844 = vst [vmem:[%s7785_s6 + $0x130] sm:$0xff] %v843_v38  ;;  %v851_v42 = vld [vmem:[%s7777_s16 + $0x290] sm:$0xff]  ;;  %v853_v43 = vld [vmem:[%s7777_s16 + $0x298] sm:$0xff] }
  0xb5   : > { %846 = vst [vmem:[%s7785_s6 + $0x138] sm:$0xff] %v845_v39  ;;  %848 = vst [vmem:[%s7785_s6 + $0x140] sm:$0xff] %v847_v40  ;;  %v855_v44 = vld [vmem:[%s7777_s16 + $0x2c0] sm:$0xff]  ;;  %v857_v45 = vld [vmem:[%s7777_s16 + $0x2c8] sm:$0xff] }
  0xb6   : > { %850 = vst [vmem:[%s7785_s6 + $0x148] sm:$0xff] %v849_v41  ;;  %852 = vst [vmem:[%s7785_s6 + $0x150] sm:$0xff] %v851_v42  ;;  %v859_v46 = vld [vmem:[%s7777_s16 + $0x2d0] sm:$0xff]  ;;  %v861_v47 = vld [vmem:[%s7777_s16 + $0x2d8] sm:$0xff] }
  0xb7   : > { %854 = vst [vmem:[%s7785_s6 + $0x158] sm:$0xff] %v853_v43  ;;  %856 = vst [vmem:[%s7785_s6 + $0x160] sm:$0xff] %v855_v44  ;;  %v863_v48 = vld [vmem:[%s7777_s16 + $0x300] sm:$0xff]  ;;  %v865_v49 = vld [vmem:[%s7777_s16 + $0x308] sm:$0xff] }
  0xb8   : > { %858 = vst [vmem:[%s7785_s6 + $0x168] sm:$0xff] %v857_v45  ;;  %860 = vst [vmem:[%s7785_s6 + $0x170] sm:$0xff] %v859_v46  ;;  %v867_v50 = vld [vmem:[%s7777_s16 + $0x310] sm:$0xff]  ;;  %v869_v51 = vld [vmem:[%s7777_s16 + $0x318] sm:$0xff] }
  0xb9   : > { %862 = vst [vmem:[%s7785_s6 + $0x178] sm:$0xff] %v861_v47  ;;  %864 = vst [vmem:[%s7785_s6 + $0x180] sm:$0xff] %v863_v48  ;;  %v871_v52 = vld [vmem:[%s7777_s16 + $0x340] sm:$0xff]  ;;  %v873_v53 = vld [vmem:[%s7777_s16 + $0x348] sm:$0xff] }
  0xba   : > { %866 = vst [vmem:[%s7785_s6 + $0x188] sm:$0xff] %v865_v49  ;;  %868 = vst [vmem:[%s7785_s6 + $0x190] sm:$0xff] %v867_v50  ;;  %v875_v54 = vld [vmem:[%s7777_s16 + $0x350] sm:$0xff]  ;;  %v877_v55 = vld [vmem:[%s7777_s16 + $0x358] sm:$0xff] }
  0xbb   : > { %870 = vst [vmem:[%s7785_s6 + $0x198] sm:$0xff] %v869_v51  ;;  %872 = vst [vmem:[%s7785_s6 + $0x1a0] sm:$0xff] %v871_v52  ;;  %v879_v56 = vld [vmem:[%s7777_s16 + $0x380] sm:$0xff]  ;;  %v881_v57 = vld [vmem:[%s7777_s16 + $0x388] sm:$0xff] }
  0xbc   : > { %874 = vst [vmem:[%s7785_s6 + $0x1a8] sm:$0xff] %v873_v53  ;;  %876 = vst [vmem:[%s7785_s6 + $0x1b0] sm:$0xff] %v875_v54  ;;  %v883_v58 = vld [vmem:[%s7777_s16 + $0x390] sm:$0xff]  ;;  %v885_v59 = vld [vmem:[%s7777_s16 + $0x398] sm:$0xff] }
  0xbd   : > { %878 = vst [vmem:[%s7785_s6 + $0x1b8] sm:$0xff] %v877_v55  ;;  %880 = vst [vmem:[%s7785_s6 + $0x1c0] sm:$0xff] %v879_v56  ;;  %v887_v60 = vld [vmem:[%s7777_s16 + $0x3c0] sm:$0xff]  ;;  %v889_v61 = vld [vmem:[%s7777_s16 + $0x3c8] sm:$0xff] }
  0xbe   : > { %882 = vst [vmem:[%s7785_s6 + $0x1c8] sm:$0xff] %v881_v57  ;;  %884 = vst [vmem:[%s7785_s6 + $0x1d0] sm:$0xff] %v883_v58  ;;  %v891_v62 = vld [vmem:[%s7777_s16 + $0x3d0] sm:$0xff]  ;;  %v893_v63 = vld [vmem:[%s7777_s16 + $0x3d8] sm:$0xff] }
  0xbf   : > { %886 = vst [vmem:[%s7785_s6 + $0x1d8] sm:$0xff] %v885_v59  ;;  %888 = vst [vmem:[%s7785_s6 + $0x1e0] sm:$0xff] %v887_v60  ;;  %v895_v0 = vld [vmem:[%s7777_s16 + $0x400] sm:$0xff]  ;;  %v897_v1 = vld [vmem:[%s7777_s16 + $0x408] sm:$0xff] }
  0xc0   : > { %890 = vst [vmem:[%s7785_s6 + $0x1e8] sm:$0xff] %v889_v61  ;;  %892 = vst [vmem:[%s7785_s6 + $0x1f0] sm:$0xff] %v891_v62  ;;  %v899_v2 = vld [vmem:[%s7777_s16 + $0x410] sm:$0xff]  ;;  %v901_v3 = vld [vmem:[%s7777_s16 + $0x418] sm:$0xff] }
  0xc1   : > { %894 = vst [vmem:[%s7785_s6 + $0x1f8] sm:$0xff] %v893_v63  ;;  %896 = vst [vmem:[%s7785_s6 + $0x200] sm:$0xff] %v895_v0  ;;  %v903_v4 = vld [vmem:[%s7777_s16 + $0x440] sm:$0xff]  ;;  %v905_v5 = vld [vmem:[%s7777_s16 + $0x448] sm:$0xff] }
  0xc2   : > { %898 = vst [vmem:[%s7785_s6 + $0x208] sm:$0xff] %v897_v1  ;;  %900 = vst [vmem:[%s7785_s6 + $0x210] sm:$0xff] %v899_v2  ;;  %v907_v6 = vld [vmem:[%s7777_s16 + $0x450] sm:$0xff]  ;;  %v909_v7 = vld [vmem:[%s7777_s16 + $0x458] sm:$0xff] }
  0xc3   : > { %902 = vst [vmem:[%s7785_s6 + $0x218] sm:$0xff] %v901_v3  ;;  %904 = vst [vmem:[%s7785_s6 + $0x220] sm:$0xff] %v903_v4  ;;  %v911_v8 = vld [vmem:[%s7777_s16 + $0x480] sm:$0xff]  ;;  %v913_v9 = vld [vmem:[%s7777_s16 + $0x488] sm:$0xff] }
  0xc4   : > { %906 = vst [vmem:[%s7785_s6 + $0x228] sm:$0xff] %v905_v5  ;;  %908 = vst [vmem:[%s7785_s6 + $0x230] sm:$0xff] %v907_v6  ;;  %v915_v10 = vld [vmem:[%s7777_s16 + $0x490] sm:$0xff]  ;;  %v917_v11 = vld [vmem:[%s7777_s16 + $0x498] sm:$0xff] }
  0xc5   : > { %910 = vst [vmem:[%s7785_s6 + $0x238] sm:$0xff] %v909_v7  ;;  %912 = vst [vmem:[%s7785_s6 + $0x240] sm:$0xff] %v911_v8  ;;  %v919_v12 = vld [vmem:[%s7777_s16 + $0x4c0] sm:$0xff]  ;;  %v921_v13 = vld [vmem:[%s7777_s16 + $0x4c8] sm:$0xff] }
  0xc6   : > { %914 = vst [vmem:[%s7785_s6 + $0x248] sm:$0xff] %v913_v9  ;;  %916 = vst [vmem:[%s7785_s6 + $0x250] sm:$0xff] %v915_v10  ;;  %v923_v14 = vld [vmem:[%s7777_s16 + $0x4d0] sm:$0xff]  ;;  %v925_v15 = vld [vmem:[%s7777_s16 + $0x4d8] sm:$0xff] }
  0xc7   : > { %918 = vst [vmem:[%s7785_s6 + $0x258] sm:$0xff] %v917_v11  ;;  %920 = vst [vmem:[%s7785_s6 + $0x260] sm:$0xff] %v919_v12  ;;  %v927_v16 = vld [vmem:[%s7777_s16 + $0x500] sm:$0xff]  ;;  %v929_v17 = vld [vmem:[%s7777_s16 + $0x508] sm:$0xff] }
  0xc8   : > { %922 = vst [vmem:[%s7785_s6 + $0x268] sm:$0xff] %v921_v13  ;;  %924 = vst [vmem:[%s7785_s6 + $0x270] sm:$0xff] %v923_v14  ;;  %v931_v18 = vld [vmem:[%s7777_s16 + $0x510] sm:$0xff]  ;;  %v933_v19 = vld [vmem:[%s7777_s16 + $0x518] sm:$0xff] }
  0xc9   : > { %926 = vst [vmem:[%s7785_s6 + $0x278] sm:$0xff] %v925_v15  ;;  %928 = vst [vmem:[%s7785_s6 + $0x280] sm:$0xff] %v927_v16  ;;  %v935_v20 = vld [vmem:[%s7777_s16 + $0x540] sm:$0xff]  ;;  %v937_v21 = vld [vmem:[%s7777_s16 + $0x548] sm:$0xff] }
  0xca   : > { %930 = vst [vmem:[%s7785_s6 + $0x288] sm:$0xff] %v929_v17  ;;  %932 = vst [vmem:[%s7785_s6 + $0x290] sm:$0xff] %v931_v18  ;;  %v939_v22 = vld [vmem:[%s7777_s16 + $0x550] sm:$0xff]  ;;  %v941_v23 = vld [vmem:[%s7777_s16 + $0x558] sm:$0xff] }
  0xcb   : > { %934 = vst [vmem:[%s7785_s6 + $0x298] sm:$0xff] %v933_v19  ;;  %936 = vst [vmem:[%s7785_s6 + $0x2a0] sm:$0xff] %v935_v20  ;;  %v943_v24 = vld [vmem:[%s7777_s16 + $0x580] sm:$0xff]  ;;  %v945_v25 = vld [vmem:[%s7777_s16 + $0x588] sm:$0xff] }
  0xcc   : > { %938 = vst [vmem:[%s7785_s6 + $0x2a8] sm:$0xff] %v937_v21  ;;  %940 = vst [vmem:[%s7785_s6 + $0x2b0] sm:$0xff] %v939_v22  ;;  %v947_v26 = vld [vmem:[%s7777_s16 + $0x590] sm:$0xff]  ;;  %v949_v27 = vld [vmem:[%s7777_s16 + $0x598] sm:$0xff] }
  0xcd   : > { %942 = vst [vmem:[%s7785_s6 + $0x2b8] sm:$0xff] %v941_v23  ;;  %944 = vst [vmem:[%s7785_s6 + $0x2c0] sm:$0xff] %v943_v24  ;;  %v951_v28 = vld [vmem:[%s7777_s16 + $0x5c0] sm:$0xff]  ;;  %v953_v29 = vld [vmem:[%s7777_s16 + $0x5c8] sm:$0xff] }
  0xce   : > { %946 = vst [vmem:[%s7785_s6 + $0x2c8] sm:$0xff] %v945_v25  ;;  %948 = vst [vmem:[%s7785_s6 + $0x2d0] sm:$0xff] %v947_v26  ;;  %v955_v30 = vld [vmem:[%s7777_s16 + $0x5d0] sm:$0xff]  ;;  %v957_v31 = vld [vmem:[%s7777_s16 + $0x5d8] sm:$0xff] }
  0xcf   : > { %950 = vst [vmem:[%s7785_s6 + $0x2d8] sm:$0xff] %v949_v27  ;;  %952 = vst [vmem:[%s7785_s6 + $0x2e0] sm:$0xff] %v951_v28  ;;  %v959_v32 = vld [vmem:[%s7777_s16 + $0x600] sm:$0xff]  ;;  %v961_v33 = vld [vmem:[%s7777_s16 + $0x608] sm:$0xff] }
  0xd0   : > { %954 = vst [vmem:[%s7785_s6 + $0x2e8] sm:$0xff] %v953_v29  ;;  %956 = vst [vmem:[%s7785_s6 + $0x2f0] sm:$0xff] %v955_v30  ;;  %v963_v34 = vld [vmem:[%s7777_s16 + $0x610] sm:$0xff]  ;;  %v965_v35 = vld [vmem:[%s7777_s16 + $0x618] sm:$0xff] }
  0xd1   : > { %958 = vst [vmem:[%s7785_s6 + $0x2f8] sm:$0xff] %v957_v31  ;;  %960 = vst [vmem:[%s7785_s6 + $0x300] sm:$0xff] %v959_v32 }
  0xd2   : > { %962 = vst [vmem:[%s7785_s6 + $0x308] sm:$0xff] %v961_v33  ;;  %964 = vst [vmem:[%s7785_s6 + $0x310] sm:$0xff] %v963_v34 }
  0xd3   : > { %966 = vst [vmem:[%s7785_s6 + $0x318] sm:$0xff] %v965_v35 }
  0xd4 PF: > { %p5858_p11 = scmp.ge.s32.totalorder %s7136_s26, 1  ;;  %p987_p12 = scmp.lt.s32.totalorder %s7136_s26, 5 }
  0xd6   : > { %p988_p13 = pnand %p5858_p11, %p987_p12 }
  0xd8   : > { %991 = sbr.rel (%p988_p13) target bundleno = 945 (0x3b1), region = 78 }
  0xdf   : > { %s994_s17 = sand.u32 1, %s7112_s20   ;;  %p1044_p0 = scmp.lt.s32.totalorder %s7120_s22, 1  ;;  %vm4629_vm1 = vcmask 1046528   ;;  %vm5114_vm2 = vcmask 1040384  }
  0xe0   : > { %s5859_s29 = sshll.u32 %s994_s17, 11  ;;  %s6606_s15 = smul.u32 800, %s994_s17 }
  0xe1   : > { %s7986_s30 = scalar_lea.vmem [#allocation2], %s5859_s29  ;;  %s8320_s16 = sshll.u32 %s7124_s23, 2 }
  0xe2   : > { %v6682_v36 = vld [vmem:[%s7986_s30 + $0x4] ss:$16 sps:$4 sm:$0xff]   ;;  %v6684_v37 = vld [vmem:[%s7986_s30 + $0xc] ss:$16 sps:$4 sm:$0xff]   ;;  %v6686_v38 = vld [vmem:[%s7986_s30] ss:$16 sps:$4 sm:$0xff]  }
  0xe3   : > { %3205 = vmatprep.subr.bf16.mxu0 %v6682_v36  ;;  %v6687_v39 = vld [vmem:[%s7986_s30 + $0x8] ss:$16 sps:$4 sm:$0xff]   ;;  %3817 = vmatprep.subr.bf16.mxu1 %v6684_v37  ;;  %v6688_v40 = vld [vmem:[%s7986_s30 + $0x24] ss:$16 sps:$4 sm:$0xff]   ;;  %v6690_v41 = vld [vmem:[%s7986_s30 + $0x2c] ss:$16 sps:$4 sm:$0xff]  }
  0xe4   : > { %3206 = vmatpush1.bf16.msra.mxu0 %v6686_v38  ;;  %3818 = vmatpush1.bf16.msra.mxu1 %v6687_v39  ;;  %v6692_v42 = vld [vmem:[%s7986_s30 + $0x20] ss:$16 sps:$4 sm:$0xff]   ;;  %v6693_v43 = vld [vmem:[%s7986_s30 + $0x28] ss:$16 sps:$4 sm:$0xff]   ;;  %v6694_v44 = vld [vmem:[%s7986_s30 + $0x44] ss:$16 sps:$4 sm:$0xff]  }
  0xe5   : > { %3207 = vmatprep.subr.bf16.mxu0 %v6688_v40  ;;  %3819 = vmatprep.subr.bf16.mxu1 %v6690_v41  ;;  %v6696_v45 = vld [vmem:[%s7986_s30 + $0x4c] ss:$16 sps:$4 sm:$0xff]   ;;  %v6698_v46 = vld [vmem:[%s7986_s30 + $0x40] ss:$16 sps:$4 sm:$0xff]   ;;  %v6699_v47 = vld [vmem:[%s7986_s30 + $0x48] ss:$16 sps:$4 sm:$0xff]  }
  0xe6   : > { %v6700_v48 = vld [vmem:[%s7986_s30 + $0x64] ss:$16 sps:$4 sm:$0xff]   ;;  %v6702_v49 = vld [vmem:[%s7986_s30 + $0x6c] ss:$16 sps:$4 sm:$0xff]   ;;  %v6704_v50 = vld [vmem:[%s7986_s30 + $0x60] ss:$16 sps:$4 sm:$0xff]  }
  0xe7   : > { %v6705_v51 = vld [vmem:[%s7986_s30 + $0x68] ss:$16 sps:$4 sm:$0xff]   ;;  %v6706_v52 = vld [vmem:[%s7986_s30 + $0x84] ss:$16 sps:$4 sm:$0xff]   ;;  %v6708_v53 = vld [vmem:[%s7986_s30 + $0x8c] ss:$16 sps:$4 sm:$0xff]  }
  0xe8   : > { %3208 = vmatpush1.bf16.msra.mxu0 %v6692_v42  ;;  %3820 = vmatpush1.bf16.msra.mxu1 %v6693_v43  ;;  %v6710_v54 = vld [vmem:[%s7986_s30 + $0x80] ss:$16 sps:$4 sm:$0xff]   ;;  %v6711_v55 = vld [vmem:[%s7986_s30 + $0x88] ss:$16 sps:$4 sm:$0xff]   ;;  %v6712_v56 = vld [vmem:[%s7986_s30 + $0xa4] ss:$16 sps:$4 sm:$0xff]  }
  0xe9   : > { %3209 = vmatprep.subr.bf16.mxu0 %v6694_v44  ;;  %3821 = vmatprep.subr.bf16.mxu1 %v6696_v45  ;;  %v6714_v57 = vld [vmem:[%s7986_s30 + $0xac] ss:$16 sps:$4 sm:$0xff]   ;;  %v6716_v58 = vld [vmem:[%s7986_s30 + $0xa0] ss:$16 sps:$4 sm:$0xff]   ;;  %v6717_v59 = vld [vmem:[%s7986_s30 + $0xa8] ss:$16 sps:$4 sm:$0xff]  }
  0xea   : > { %v6718_v60 = vld [vmem:[%s7986_s30 + $0xc4] ss:$16 sps:$4 sm:$0xff]   ;;  %v6720_v61 = vld [vmem:[%s7986_s30 + $0xcc] ss:$16 sps:$4 sm:$0xff]   ;;  %v6722_v62 = vld [vmem:[%s7986_s30 + $0xc0] ss:$16 sps:$4 sm:$0xff]  }
  0xeb   : > { %v6723_v63 = vld [vmem:[%s7986_s30 + $0xc8] ss:$16 sps:$4 sm:$0xff]   ;;  %v6724_v0 = vld [vmem:[%s7986_s30 + $0xe4] ss:$16 sps:$4 sm:$0xff]   ;;  %v6726_v1 = vld [vmem:[%s7986_s30 + $0xec] ss:$16 sps:$4 sm:$0xff]  }
  0xec   : > { %3210 = vmatpush1.bf16.msra.mxu0 %v6698_v46  ;;  %3822 = vmatpush1.bf16.msra.mxu1 %v6699_v47  ;;  %v6728_v2 = vld [vmem:[%s7986_s30 + $0xe0] ss:$16 sps:$4 sm:$0xff]   ;;  %v6729_v3 = vld [vmem:[%s7986_s30 + $0xe8] ss:$16 sps:$4 sm:$0xff]   ;;  %v6730_v4 = vld [vmem:[%s7986_s30 + $0x104] ss:$16 sps:$4 sm:$0xff]  }
  0xed   : > { %3211 = vmatprep.subr.bf16.mxu0 %v6700_v48  ;;  %3823 = vmatprep.subr.bf16.mxu1 %v6702_v49  ;;  %v6732_v5 = vld [vmem:[%s7986_s30 + $0x10c] ss:$16 sps:$4 sm:$0xff]   ;;  %v6734_v6 = vld [vmem:[%s7986_s30 + $0x100] ss:$16 sps:$4 sm:$0xff]   ;;  %v6735_v7 = vld [vmem:[%s7986_s30 + $0x108] ss:$16 sps:$4 sm:$0xff]  }
  0xee   : > { %s1045_s7 = scalar_select %p1044_p0, %s7120_s22, 1  ;;  %v6736_v8 = vld [vmem:[%s7986_s30 + $0x124] ss:$16 sps:$4 sm:$0xff]   ;;  %v6738_v9 = vld [vmem:[%s7986_s30 + $0x12c] ss:$16 sps:$4 sm:$0xff]  }
  0xef   : > { %v6740_v10 = vld [vmem:[%s7986_s30 + $0x120] ss:$16 sps:$4 sm:$0xff]   ;;  %v6741_v11 = vld [vmem:[%s7986_s30 + $0x128] ss:$16 sps:$4 sm:$0xff]   ;;  %v6742_v12 = vld [vmem:[%s7986_s30 + $0x144] ss:$16 sps:$4 sm:$0xff]  }
  0xf0   : > { %3212 = vmatpush1.bf16.msra.mxu0 %v6704_v50  ;;  %3824 = vmatpush1.bf16.msra.mxu1 %v6705_v51  ;;  %s6608_s8 = smul.u32 768, %s1045_s7  ;;  %v6744_v13 = vld [vmem:[%s7986_s30 + $0x14c] ss:$16 sps:$4 sm:$0xff]   ;;  %v6746_v14 = vld [vmem:[%s7986_s30 + $0x140] ss:$16 sps:$4 sm:$0xff]   ;;  %s1041_s6 = sand.u32 1, %s7104_s18  }
  0xf1   : > { %3213 = vmatprep.subr.bf16.mxu0 %v6706_v52  ;;  %3825 = vmatprep.subr.bf16.mxu1 %v6708_v53  ;;  %v6747_v15 = vld [vmem:[%s7986_s30 + $0x148] ss:$16 sps:$4 sm:$0xff]   ;;  %v6748_v16 = vld [vmem:[%s7986_s30 + $0x164] ss:$16 sps:$4 sm:$0xff]   ;;  %v6750_v17 = vld [vmem:[%s7986_s30 + $0x16c] ss:$16 sps:$4 sm:$0xff]  }
  0xf2   : > { %s8037_s14 = scalar_lea.vmem %s9415_s0, %s6608_s8  ;;  %v6752_v20 = vld [vmem:[%s7986_s30 + $0x160] ss:$16 sps:$4 sm:$0xff]   ;;  %v6753_v21 = vld [vmem:[%s7986_s30 + $0x168] ss:$16 sps:$4 sm:$0xff]   ;;  %v6754_v23 = vld [vmem:[%s7986_s30 + $0x184] ss:$16 sps:$4 sm:$0xff]  }
  0xf3   : > { %v1062_v18 = vld [vmem:[%s8037_s14] sm:$0xff]  ;;  %v6756_v24 = vld [vmem:[%s7986_s30 + $0x18c] ss:$16 sps:$4 sm:$0xff]   ;;  %v6759_v26 = vld [vmem:[%s7986_s30 + $0x188] ss:$16 sps:$4 sm:$0xff]   ;;  %p1052_p1 = scmp.lt.s32.totalorder %s8320_s16, 7 }
  0xf4   : > { %3214 = vmatpush1.bf16.msra.mxu0 %v6710_v54  ;;  %3826 = vmatpush1.bf16.msra.mxu1 %v6711_v55  ;;  %v1066_v19 = vld [vmem:[%s8037_s14 + $0x20] sm:$0xff]  ;;  %v6762_v28 = vld [vmem:[%s7986_s30 + $0x1ac] ss:$16 sps:$4 sm:$0xff]   ;;  %v6765_v30 = vld [vmem:[%s7986_s30 + $0x1a8] ss:$16 sps:$4 sm:$0xff]   ;;  %s6607_s17 = smul.u32 800, %s1041_s6 }
  0xf5   : > { %3215 = vmatprep.subr.bf16.mxu0 %v6712_v56  ;;  %3827 = vmatprep.subr.bf16.mxu1 %v6714_v57  ;;  %v5864_v22 = vcombine.high %v1062_v18, %v1066_v19  ;;  %v6758_v25 = vld [vmem:[%s7986_s30 + $0x180] ss:$16 sps:$4 sm:$0xff]   ;;  %v6760_v27 = vld [vmem:[%s7986_s30 + $0x1a4] ss:$16 sps:$4 sm:$0xff]   ;;  %v6768_v32 = vld [vmem:[%s7986_s30 + $0x1cc] ss:$16 sps:$4 sm:$0xff]   ;;  %v5863_v42 = vcombine.low %v1062_v18, %v1066_v19 }
  0xf6   : > { %v6764_v29 = vld [vmem:[%s7986_s30 + $0x1a0] ss:$16 sps:$4 sm:$0xff]   ;;  %v6766_v31 = vld [vmem:[%s7986_s30 + $0x1c4] ss:$16 sps:$4 sm:$0xff]   ;;  %v6771_v34 = vld [vmem:[%s7986_s30 + $0x1c8] ss:$16 sps:$4 sm:$0xff]  }
  0xf7   : > { %3237 = vmatprep.mubr.bf16.mxu0 %v5864_v22  ;;  %3849 = vmatprep.mubr.bf16.mxu1 %v5864_v22  ;;  %v6770_v33 = vld [vmem:[%s7986_s30 + $0x1c0] ss:$16 sps:$4 sm:$0xff]   ;;  %v6772_v35 = vld [vmem:[%s7986_s30 + $0x1e4] ss:$16 sps:$4 sm:$0xff]   ;;  %v6774_v36 = vld [vmem:[%s7986_s30 + $0x1ec] ss:$16 sps:$4 sm:$0xff]  }
  0xf8   : > { %3216 = vmatpush1.bf16.msra.mxu0 %v6716_v58  ;;  %3828 = vmatpush1.bf16.msra.mxu1 %v6717_v59  ;;  %v6776_v37 = vld [vmem:[%s7986_s30 + $0x1e0] ss:$16 sps:$4 sm:$0xff]   ;;  %v6777_v38 = vld [vmem:[%s7986_s30 + $0x1e8] ss:$16 sps:$4 sm:$0xff]   ;;  %v6780_v39 = vld [vmem:[%s7986_s30 + $0x204] ss:$16 sps:$4 sm:$0xff]  }
  0xf9   : > { %3217 = vmatprep.subr.bf16.mxu0 %v6718_v60  ;;  %3829 = vmatprep.subr.bf16.mxu1 %v6720_v61  ;;  %v6783_v40 = vld [vmem:[%s7986_s30 + $0x20c] ss:$16 sps:$4 sm:$0xff]   ;;  %v1070_v41 = vld [vmem:[%s8037_s14 + $0x40] sm:$0xff]  ;;  %v6781_v45 = vld [vmem:[%s7986_s30 + $0x208] ss:$16 sps:$4 sm:$0xff]   ;;  %s1053_s20 = scalar_select %p1052_p1, %s8320_s16, 7 }
  0xfa   : > { %v1074_v43 = vld [vmem:[%s8037_s14 + $0x60] sm:$0xff]  ;;  %v6789_v47 = vld [vmem:[%s7986_s30 + $0x22c] ss:$16 sps:$4 sm:$0xff]   ;;  %v6787_v50 = vld [vmem:[%s7986_s30 + $0x228] ss:$16 sps:$4 sm:$0xff]   ;;  %s8330_s23 = scalar_lea.vmem [#allocation3], %s6606_s15 }
  0xfb   : > { %v6778_v44 = vld [vmem:[%s7986_s30 + $0x200] ss:$16 sps:$4 sm:$0xff]   ;;  %v6786_v46 = vld [vmem:[%s7986_s30 + $0x224] ss:$16 sps:$4 sm:$0xff]   ;;  %v5872_v48 = vcombine.high %v1070_v41, %v1074_v43  ;;  %v6795_v52 = vld [vmem:[%s7986_s30 + $0x24c] ss:$16 sps:$4 sm:$0xff]   ;;  %v5871_v55 = vcombine.low %v1070_v41, %v1074_v43  ;;  %s1059_s9 = scalar_lea.vmem %s9419_s4, %s1053_s20 }
  0xfc   : > { %3218 = vmatpush1.bf16.msra.mxu0 %v6722_v62  ;;  %3830 = vmatpush1.bf16.msra.mxu1 %v6723_v63  ;;  %v6784_v49 = vld [vmem:[%s7986_s30 + $0x220] ss:$16 sps:$4 sm:$0xff]   ;;  %v6792_v51 = vld [vmem:[%s7986_s30 + $0x244] ss:$16 sps:$4 sm:$0xff]   ;;  %v6793_v57 = vld [vmem:[%s7986_s30 + $0x248] ss:$16 sps:$4 sm:$0xff]  }
  0xfd   : > { %3219 = vmatprep.subr.bf16.mxu0 %v6724_v0  ;;  %3831 = vmatprep.subr.bf16.mxu1 %v6726_v1  ;;  %v1078_v53 = vld [vmem:[%s8037_s14 + $0x80] sm:$0xff]  ;;  %v6801_v60 = vld [vmem:[%s7986_s30 + $0x26c] ss:$16 sps:$4 sm:$0xff]   ;;  %v6799_v62 = vld [vmem:[%s7986_s30 + $0x268] ss:$16 sps:$4 sm:$0xff]   ;;  %s8346_s10 = scalar_lea.vmem [#allocation4], %s6607_s17 }
  0xfe   : > { %v1082_v54 = vld [vmem:[%s8037_s14 + $0xa0] sm:$0xff]  ;;  %v6817_v18 = vld [vmem:[%s7986_s30 + $0x2c8] ss:$16 sps:$4 sm:$0xff]  }
  0xff   : > { %v6790_v56 = vld [vmem:[%s7986_s30 + $0x240] ss:$16 sps:$4 sm:$0xff]   ;;  %v5880_v58 = vcombine.high %v1078_v53, %v1082_v54  ;;  %v6798_v59 = vld [vmem:[%s7986_s30 + $0x264] ss:$16 sps:$4 sm:$0xff]  }
 0x100   : > { %3220 = vmatpush1.bf16.msra.mxu0 %v6728_v2  ;;  %3832 = vmatpush1.bf16.msra.mxu1 %v6729_v3  ;;  %v6796_v61 = vld [vmem:[%s7986_s30 + $0x260] ss:$16 sps:$4 sm:$0xff]   ;;  %v6804_v1 = vld [vmem:[%s7986_s30 + $0x284] ss:$16 sps:$4 sm:$0xff]   ;;  %v6807_v2 = vld [vmem:[%s7986_s30 + $0x28c] ss:$16 sps:$4 sm:$0xff]   ;;  %v5879_v3 = vcombine.low %v1078_v53, %v1082_v54 }
 0x101   : > { %3221 = vmatprep.subr.bf16.mxu0 %v6730_v4  ;;  %3833 = vmatprep.subr.bf16.mxu1 %v6732_v5  ;;  %v1086_v63 = vld [vmem:[%s8037_s14 + $0xc0] sm:$0xff]  ;;  %v6853_v54 = vld [vmem:[%s7986_s30 + $0x388] ss:$16 sps:$4 sm:$0xff]  }
 0x102   : > { %v1090_v0 = vld [vmem:[%s8037_s14 + $0xe0] sm:$0xff] }
 0x103   : > { %v5888_v4 = vcombine.high %v1086_v63, %v1090_v0  ;;  %v6802_v5 = vld [vmem:[%s7986_s30 + $0x280] ss:$16 sps:$4 sm:$0xff]   ;;  %v6822_v19 = vld [vmem:[%s7986_s30 + $0x2e4] ss:$16 sps:$4 sm:$0xff]  }
 0x104   : > { %3222 = vmatpush1.bf16.msra.mxu0 %v6734_v6  ;;  %3834 = vmatpush1.bf16.msra.mxu1 %v6735_v7  ;;  %v6805_v6 = vld [vmem:[%s7986_s30 + $0x288] ss:$16 sps:$4 sm:$0xff]   ;;  %v6810_v7 = vld [vmem:[%s7986_s30 + $0x2a4] ss:$16 sps:$4 sm:$0xff]   ;;  %v6838_v41 = vld [vmem:[%s7986_s30 + $0x340] ss:$16 sps:$4 sm:$0xff]  }
 0x105   : > { %3223 = vmatprep.subr.bf16.mxu0 %v6736_v8  ;;  %3835 = vmatprep.subr.bf16.mxu1 %v6738_v9  ;;  %v6813_v8 = vld [vmem:[%s7986_s30 + $0x2ac] ss:$16 sps:$4 sm:$0xff]   ;;  %v6808_v9 = vld [vmem:[%s7986_s30 + $0x2a0] ss:$16 sps:$4 sm:$0xff]   ;;  %v6846_v43 = vld [vmem:[%s7986_s30 + $0x364] ss:$16 sps:$4 sm:$0xff]  }
 0x106   : > { %v1106_v22 = vld [vmem:[%s8037_s14 + $0x160] sm:$0xff] }
 0x107   : > { %v6850_v53 = vld [vmem:[%s7986_s30 + $0x380] ss:$16 sps:$4 sm:$0xff]  }
 0x108   : > { %3224 = vmatpush1.bf16.msra.mxu0 %v6740_v10  ;;  %3836 = vmatpush1.bf16.msra.mxu1 %v6741_v11  ;;  %v6811_v10 = vld [vmem:[%s7986_s30 + $0x2a8] ss:$16 sps:$4 sm:$0xff]   ;;  %v1094_v11 = vld [vmem:[%s8037_s14 + $0x100] sm:$0xff] }
 0x109   : > { %3225 = vmatprep.subr.bf16.mxu0 %v6742_v12  ;;  %3837 = vmatprep.subr.bf16.mxu1 %v6744_v13  ;;  %v1098_v12 = vld [vmem:[%s8037_s14 + $0x120] sm:$0xff] }
 0x10a   : > { %v6816_v13 = vld [vmem:[%s7986_s30 + $0x2c4] ss:$16 sps:$4 sm:$0xff]  }
 0x10c   : > { %3226 = vmatpush1.bf16.msra.mxu0 %v6746_v14  ;;  %3838 = vmatpush1.bf16.msra.mxu1 %v6747_v15  ;;  %v6819_v14 = vld [vmem:[%s7986_s30 + $0x2cc] ss:$16 sps:$4 sm:$0xff]   ;;  %v5887_v15 = vcombine.low %v1086_v63, %v1090_v0 }
 0x10d   : > { %3227 = vmatprep.subr.bf16.mxu0 %v6748_v16  ;;  %3839 = vmatprep.subr.bf16.mxu1 %v6750_v17  ;;  %v5896_v16 = vcombine.high %v1094_v11, %v1098_v12  ;;  %v6814_v17 = vld [vmem:[%s7986_s30 + $0x2c0] ss:$16 sps:$4 sm:$0xff]  }
 0x110   : > { %3228 = vmatpush1.bf16.msra.mxu0 %v6752_v20  ;;  %3840 = vmatpush1.bf16.msra.mxu1 %v6753_v21  ;;  %v6825_v20 = vld [vmem:[%s7986_s30 + $0x2ec] ss:$16 sps:$4 sm:$0xff]   ;;  %v1102_v21 = vld [vmem:[%s8037_s14 + $0x140] sm:$0xff] }
 0x111   : > { %3229 = vmatprep.subr.bf16.mxu0 %v6754_v23  ;;  %3841 = vmatprep.subr.bf16.mxu1 %v6756_v24  ;;  %v6820_v23 = vld [vmem:[%s7986_s30 + $0x2e0] ss:$16 sps:$4 sm:$0xff]   ;;  %v6823_v24 = vld [vmem:[%s7986_s30 + $0x2e8] ss:$16 sps:$4 sm:$0xff]  }
 0x114   : > { %3230 = vmatpush1.bf16.msra.mxu0 %v6758_v25  ;;  %3842 = vmatpush1.bf16.msra.mxu1 %v6759_v26  ;;  %v6828_v25 = vld [vmem:[%s7986_s30 + $0x304] ss:$16 sps:$4 sm:$0xff]   ;;  %v6831_v26 = vld [vmem:[%s7986_s30 + $0x30c] ss:$16 sps:$4 sm:$0xff]  }
 0x115   : > { %3231 = vmatprep.subr.bf16.mxu0 %v6760_v27  ;;  %3843 = vmatprep.subr.bf16.mxu1 %v6762_v28  ;;  %v5895_v27 = vcombine.low %v1094_v11, %v1098_v12  ;;  %v5904_v28 = vcombine.high %v1102_v21, %v1106_v22 }
 0x118   : > { %3232 = vmatpush1.bf16.msra.mxu0 %v6764_v29  ;;  %3844 = vmatpush1.bf16.msra.mxu1 %v6765_v30  ;;  %v6826_v29 = vld [vmem:[%s7986_s30 + $0x300] ss:$16 sps:$4 sm:$0xff]   ;;  %v6829_v30 = vld [vmem:[%s7986_s30 + $0x308] ss:$16 sps:$4 sm:$0xff]  }
 0x119   : > { %3233 = vmatprep.subr.bf16.mxu0 %v6766_v31  ;;  %3845 = vmatprep.subr.bf16.mxu1 %v6768_v32  ;;  %v6834_v31 = vld [vmem:[%s7986_s30 + $0x324] ss:$16 sps:$4 sm:$0xff]   ;;  %v6837_v32 = vld [vmem:[%s7986_s30 + $0x32c] ss:$16 sps:$4 sm:$0xff]  }
 0x11c   : > { %3234 = vmatpush1.bf16.msra.mxu0 %v6770_v33  ;;  %3846 = vmatpush1.bf16.msra.mxu1 %v6771_v34  ;;  %v1110_v33 = vld [vmem:[%s8037_s14 + $0x180] sm:$0xff] }
 0x11d   : > { %3235 = vmatprep.subr.bf16.mxu0 %v6772_v35  ;;  %3847 = vmatprep.subr.bf16.mxu1 %v6774_v36  ;;  %v1114_v34 = vld [vmem:[%s8037_s14 + $0x1a0] sm:$0xff]  ;;  %v6835_v36 = vld [vmem:[%s7986_s30 + $0x328] ss:$16 sps:$4 sm:$0xff]  }
 0x11e   : > { %v6832_v35 = vld [vmem:[%s7986_s30 + $0x320] ss:$16 sps:$4 sm:$0xff]  }
 0x120   : > { %3236 = vmatpush1.bf16.msra.mxu0 %v6776_v37  ;;  %3848 = vmatpush1.bf16.msra.mxu1 %v6777_v38  ;;  %v6840_v37 = vld [vmem:[%s7986_s30 + $0x344] ss:$16 sps:$4 sm:$0xff]   ;;  %v6843_v38 = vld [vmem:[%s7986_s30 + $0x34c] ss:$16 sps:$4 sm:$0xff]  }
 0x121   : > { %3358 = vmatprep.subr.bf16.mxu0 %v6780_v39  ;;  %3970 = vmatprep.subr.bf16.mxu1 %v6783_v40  ;;  %v5903_v39 = vcombine.low %v1102_v21, %v1106_v22  ;;  %v5912_v40 = vcombine.high %v1110_v33, %v1114_v34  ;;  %v1063_v21 = vld [vmem:[%s8037_s14 + $0x8] sm:$0xff] }
 0x122   : > { %v1067_v22 = vld [vmem:[%s8037_s14 + $0x28] sm:$0xff] }
 0x123   : > { %3238 = vmatmul.mubr.bf16.vlgmr.msra.gmra.mrb[0].mxu0 %v5863_v42  ;;  %3850 = vmatmul.mubr.bf16.vlgmr.msra.gmra.mrb[0].mxu1 %v5863_v42  ;;  %v6841_v42 = vld [vmem:[%s7986_s30 + $0x348] ss:$16 sps:$4 sm:$0xff]  }
 0x124   : > { %3359 = vmatpush1.bf16.msra.mxu0 %v6778_v44  ;;  %3971 = vmatpush1.bf16.msra.mxu1 %v6781_v45  ;;  %v6849_v44 = vld [vmem:[%s7986_s30 + $0x36c] ss:$16 sps:$4 sm:$0xff]   ;;  %v1118_v45 = vld [vmem:[%s8037_s14 + $0x1c0] sm:$0xff] }
 0x125   : > { %3360 = vmatprep.subr.bf16.mxu0 %v6786_v46  ;;  %3972 = vmatprep.subr.bf16.mxu1 %v6789_v47  ;;  %v1122_v46 = vld [vmem:[%s8037_s14 + $0x1e0] sm:$0xff] }
 0x126   : > { %3247 = vmatprep.mubr.bf16.mxu0 %v5872_v48  ;;  %3859 = vmatprep.mubr.bf16.mxu1 %v5872_v48  ;;  %v6844_v47 = vld [vmem:[%s7986_s30 + $0x360] ss:$16 sps:$4 sm:$0xff]   ;;  %v6847_v48 = vld [vmem:[%s7986_s30 + $0x368] ss:$16 sps:$4 sm:$0xff]   ;;  %v5919_v63 = vcombine.low %v1118_v45, %v1122_v46 }
 0x128   : > { %3361 = vmatpush1.bf16.msra.mxu0 %v6784_v49  ;;  %3973 = vmatpush1.bf16.msra.mxu1 %v6787_v50  ;;  %v6852_v49 = vld [vmem:[%s7986_s30 + $0x384] ss:$16 sps:$4 sm:$0xff]   ;;  %v6855_v50 = vld [vmem:[%s7986_s30 + $0x38c] ss:$16 sps:$4 sm:$0xff]  }
 0x129   : > { %3362 = vmatprep.subr.bf16.mxu0 %v6792_v51  ;;  %3974 = vmatprep.subr.bf16.mxu1 %v6795_v52  ;;  %v5911_v51 = vcombine.low %v1110_v33, %v1114_v34  ;;  %v5920_v52 = vcombine.high %v1118_v45, %v1122_v46  ;;  %v6880_v33 = vld [vmem:[%s7986_s30 + $0x420] ss:$16 sps:$4 sm:$0xff]   ;;  %v6883_v34 = vld [vmem:[%s7986_s30 + $0x428] ss:$16 sps:$4 sm:$0xff]  }
 0x12a   : > { %v6892_v45 = vld [vmem:[%s7986_s30 + $0x460] ss:$16 sps:$4 sm:$0xff]   ;;  %v6895_v46 = vld [vmem:[%s7986_s30 + $0x468] ss:$16 sps:$4 sm:$0xff]  }
 0x12b   : > { %3248 = vmatmul.mubr.bf16.gmra.mrb[4].mxu0 %v5871_v55  ;;  %3860 = vmatmul.mubr.bf16.gmra.mrb[4].mxu1 %v5871_v55  ;;  %v6858_v55 = vld [vmem:[%s7986_s30 + $0x3a4] ss:$16 sps:$4 sm:$0xff]  }
 0x12c   : > { %3363 = vmatpush1.bf16.msra.mxu0 %v6790_v56  ;;  %3975 = vmatpush1.bf16.msra.mxu1 %v6793_v57  ;;  %v6861_v56 = vld [vmem:[%s7986_s30 + $0x3ac] ss:$16 sps:$4 sm:$0xff]   ;;  %v1126_v57 = vld [vmem:[%s8037_s14 + $0x200] sm:$0xff] }
 0x12d   : > { %3257 = vmatprep.mubr.bf16.mxu0 %v5880_v58  ;;  %3869 = vmatprep.mubr.bf16.mxu1 %v5880_v58  ;;  %v1130_v58 = vld [vmem:[%s8037_s14 + $0x220] sm:$0xff] }
 0x12e   : > { %3364 = vmatprep.subr.bf16.mxu0 %v6798_v59  ;;  %3976 = vmatprep.subr.bf16.mxu1 %v6801_v60  ;;  %v6856_v59 = vld [vmem:[%s7986_s30 + $0x3a0] ss:$16 sps:$4 sm:$0xff]   ;;  %v6859_v60 = vld [vmem:[%s7986_s30 + $0x3a8] ss:$16 sps:$4 sm:$0xff]   ;;  %v5928_v0 = vcombine.high %v1126_v57, %v1130_v58  ;;  %v5927_v11 = vcombine.low %v1126_v57, %v1130_v58 }
 0x12f   : > { %v6904_v57 = vld [vmem:[%s7986_s30 + $0x4a0] ss:$16 sps:$4 sm:$0xff]   ;;  %v6907_v58 = vld [vmem:[%s7986_s30 + $0x4a8] ss:$16 sps:$4 sm:$0xff]  }
 0x130   : > { %3365 = vmatpush1.bf16.msra.mxu0 %v6796_v61  ;;  %3977 = vmatpush1.bf16.msra.mxu1 %v6799_v62  ;;  %v6864_v61 = vld [vmem:[%s7986_s30 + $0x3c4] ss:$16 sps:$4 sm:$0xff]   ;;  %v6867_v62 = vld [vmem:[%s7986_s30 + $0x3cc] ss:$16 sps:$4 sm:$0xff]  }
 0x131   : > { %3366 = vmatprep.subr.bf16.mxu0 %v6804_v1  ;;  %3978 = vmatprep.subr.bf16.mxu1 %v6807_v2  ;;  %v6862_v1 = vld [vmem:[%s7986_s30 + $0x3c0] ss:$16 sps:$4 sm:$0xff]   ;;  %v6865_v2 = vld [vmem:[%s7986_s30 + $0x3c8] ss:$16 sps:$4 sm:$0xff]  }
 0x133   : > { %3258 = vmatmul.mubr.bf16.gmra.mrb[8].mxu0 %v5879_v3  ;;  %3870 = vmatmul.mubr.bf16.gmra.mrb[8].mxu1 %v5879_v3  ;;  %v6870_v3 = vld [vmem:[%s7986_s30 + $0x3e4] ss:$16 sps:$4 sm:$0xff]  }
 0x134   : > { %3267 = vmatprep.mubr.bf16.mxu0 %v5888_v4  ;;  %3879 = vmatprep.mubr.bf16.mxu1 %v5888_v4  ;;  %v6873_v4 = vld [vmem:[%s7986_s30 + $0x3ec] ss:$16 sps:$4 sm:$0xff]  }
 0x135   : > { %3367 = vmatpush1.bf16.msra.mxu0 %v6802_v5  ;;  %3979 = vmatpush1.bf16.msra.mxu1 %v6805_v6  ;;  %v1134_v5 = vld [vmem:[%s8037_s14 + $0x240] sm:$0xff] }
 0x136   : > { %3368 = vmatprep.subr.bf16.mxu0 %v6810_v7  ;;  %3980 = vmatprep.subr.bf16.mxu1 %v6813_v8  ;;  %v1138_v6 = vld [vmem:[%s8037_s14 + $0x260] sm:$0xff]  ;;  %v6871_v8 = vld [vmem:[%s7986_s30 + $0x3e8] ss:$16 sps:$4 sm:$0xff]  }
 0x137   : > { %v6868_v7 = vld [vmem:[%s7986_s30 + $0x3e0] ss:$16 sps:$4 sm:$0xff]   ;;  %v5936_v12 = vcombine.high %v1134_v5, %v1138_v6 }
 0x139   : > { %3369 = vmatpush1.bf16.msra.mxu0 %v6808_v9  ;;  %3981 = vmatpush1.bf16.msra.mxu1 %v6811_v10  ;;  %v6876_v9 = vld [vmem:[%s7986_s30 + $0x404] ss:$16 sps:$4 sm:$0xff]   ;;  %v6879_v10 = vld [vmem:[%s7986_s30 + $0x40c] ss:$16 sps:$4 sm:$0xff]  }
 0x13a   : > { %3370 = vmatprep.subr.bf16.mxu0 %v6816_v13  ;;  %3982 = vmatprep.subr.bf16.mxu1 %v6819_v14  ;;  %v1142_v13 = vld [vmem:[%s8037_s14 + $0x280] sm:$0xff] }
 0x13b   : > { %3268 = vmatmul.mubr.bf16.gmra.mrb[12].mxu0 %v5887_v15  ;;  %3880 = vmatmul.mubr.bf16.gmra.mrb[12].mxu1 %v5887_v15  ;;  %v1146_v14 = vld [vmem:[%s8037_s14 + $0x2a0] sm:$0xff]  ;;  %v5935_v15 = vcombine.low %v1134_v5, %v1138_v6  ;;  %v1103_v5 = vld [vmem:[%s8037_s14 + $0x148] sm:$0xff] }
 0x13c   : > { %3277 = vmatprep.mubr.bf16.mxu0 %v5896_v16  ;;  %3889 = vmatprep.mubr.bf16.mxu1 %v5896_v16  ;;  %v5944_v16 = vcombine.high %v1142_v13, %v1146_v14  ;;  %v1107_v6 = vld [vmem:[%s8037_s14 + $0x168] sm:$0xff] }
 0x13d   : > { %3371 = vmatpush1.bf16.msra.mxu0 %v6814_v17  ;;  %3983 = vmatpush1.bf16.msra.mxu1 %v6817_v18  ;;  %v1150_v17 = vld [vmem:[%s8037_s14 + $0x2c0] sm:$0xff] }
 0x13e   : > { %3372 = vmatprep.subr.bf16.mxu0 %v6822_v19  ;;  %3984 = vmatprep.subr.bf16.mxu1 %v6825_v20  ;;  %v1154_v18 = vld [vmem:[%s8037_s14 + $0x2e0] sm:$0xff]  ;;  %v5943_v19 = vcombine.low %v1142_v13, %v1146_v14  ;;  %v6925_v14 = vld [vmem:[%s7986_s30 + $0x508] ss:$16 sps:$4 sm:$0xff]  }
 0x13f   : > { %v5952_v20 = vcombine.high %v1150_v17, %v1154_v18  ;;  %v6922_v13 = vld [vmem:[%s7986_s30 + $0x500] ss:$16 sps:$4 sm:$0xff]  }
 0x141   : > { %3373 = vmatpush1.bf16.msra.mxu0 %v6820_v23  ;;  %3985 = vmatpush1.bf16.msra.mxu1 %v6823_v24  ;;  %v5951_v23 = vcombine.low %v1150_v17, %v1154_v18  ;;  %v5866_v24 = vcombine.high %v1063_v21, %v1067_v22  ;;  %v1111_v17 = vld [vmem:[%s8037_s14 + $0x188] sm:$0xff] }
 0x142   : > { %3374 = vmatprep.subr.bf16.mxu0 %v6828_v25  ;;  %3986 = vmatprep.subr.bf16.mxu1 %v6831_v26  ;;  %v6874_v25 = vld [vmem:[%s7986_s30 + $0x400] ss:$16 sps:$4 sm:$0xff]   ;;  %v6877_v26 = vld [vmem:[%s7986_s30 + $0x408] ss:$16 sps:$4 sm:$0xff]  }
 0x143   : > { %3278 = vmatmul.mubr.bf16.gmra.mrb[16].mxu0 %v5895_v27  ;;  %3890 = vmatmul.mubr.bf16.gmra.mrb[16].mxu1 %v5895_v27  ;;  %v5865_v27 = vcombine.low %v1063_v21, %v1067_v22  ;;  %v1115_v18 = vld [vmem:[%s8037_s14 + $0x1a8] sm:$0xff]  ;;  %v6936_v21 = vld [vmem:[%s7986_s30 + $0x544] ss:$16 sps:$4 sm:$0xff]  }
 0x144   : > { %3287 = vmatprep.mubr.bf16.mxu0 %v5904_v28  ;;  %3899 = vmatprep.mubr.bf16.mxu1 %v5904_v28  ;;  %v1071_v28 = vld [vmem:[%s8037_s14 + $0x48] sm:$0xff] }
 0x145   : > { %3375 = vmatpush1.bf16.msra.mxu0 %v6826_v29  ;;  %3987 = vmatpush1.bf16.msra.mxu1 %v6829_v30  ;;  %v1075_v29 = vld [vmem:[%s8037_s14 + $0x68] sm:$0xff]  ;;  %v6882_v30 = vld [vmem:[%s7986_s30 + $0x424] ss:$16 sps:$4 sm:$0xff]  }
 0x146   : > { %3376 = vmatprep.subr.bf16.mxu0 %v6834_v31  ;;  %3988 = vmatprep.subr.bf16.mxu1 %v6837_v32  ;;  %v6885_v31 = vld [vmem:[%s7986_s30 + $0x42c] ss:$16 sps:$4 sm:$0xff]   ;;  %v5874_v32 = vcombine.high %v1071_v28, %v1075_v29 }
 0x147   : > { %v6939_v22 = vld [vmem:[%s7986_s30 + $0x54c] ss:$16 sps:$4 sm:$0xff]  }
 0x149   : > { %3377 = vmatpush1.bf16.msra.mxu0 %v6832_v35  ;;  %3989 = vmatpush1.bf16.msra.mxu1 %v6835_v36  ;;  %v6888_v35 = vld [vmem:[%s7986_s30 + $0x444] ss:$16 sps:$4 sm:$0xff]   ;;  %v6891_v36 = vld [vmem:[%s7986_s30 + $0x44c] ss:$16 sps:$4 sm:$0xff]  }
 0x14a   : > { %3378 = vmatprep.subr.bf16.mxu0 %v6840_v37  ;;  %3990 = vmatprep.subr.bf16.mxu1 %v6843_v38  ;;  %v6886_v37 = vld [vmem:[%s7986_s30 + $0x440] ss:$16 sps:$4 sm:$0xff]   ;;  %v6889_v38 = vld [vmem:[%s7986_s30 + $0x448] ss:$16 sps:$4 sm:$0xff]  }
 0x14b   : > { %3288 = vmatmul.mubr.bf16.gmra.mrb[20].mxu0 %v5903_v39  ;;  %3900 = vmatmul.mubr.bf16.gmra.mrb[20].mxu1 %v5903_v39  ;;  %v1079_v39 = vld [vmem:[%s8037_s14 + $0x88] sm:$0xff] }
 0x14c   : > { %3297 = vmatprep.mubr.bf16.mxu0 %v5912_v40  ;;  %3909 = vmatprep.mubr.bf16.mxu1 %v5912_v40  ;;  %v1083_v40 = vld [vmem:[%s8037_s14 + $0xa8] sm:$0xff] }
 0x14d   : > { %3379 = vmatpush1.bf16.msra.mxu0 %v6838_v41  ;;  %3991 = vmatpush1.bf16.msra.mxu1 %v6841_v42  ;;  %v5873_v41 = vcombine.low %v1071_v28, %v1075_v29  ;;  %v6894_v42 = vld [vmem:[%s7986_s30 + $0x464] ss:$16 sps:$4 sm:$0xff]   ;;  %v6945_v28 = vld [vmem:[%s7986_s30 + $0x56c] ss:$16 sps:$4 sm:$0xff]  }
 0x14e   : > { %3380 = vmatprep.subr.bf16.mxu0 %v6846_v43  ;;  %3992 = vmatprep.subr.bf16.mxu1 %v6849_v44  ;;  %v6897_v43 = vld [vmem:[%s7986_s30 + $0x46c] ss:$16 sps:$4 sm:$0xff]   ;;  %v5882_v44 = vcombine.high %v1079_v39, %v1083_v40 }
 0x14f   : > { %v1119_v29 = vld [vmem:[%s8037_s14 + $0x1c8] sm:$0xff] }
 0x151   : > { %3381 = vmatpush1.bf16.msra.mxu0 %v6844_v47  ;;  %3993 = vmatpush1.bf16.msra.mxu1 %v6847_v48  ;;  %v1087_v47 = vld [vmem:[%s8037_s14 + $0xc8] sm:$0xff] }
 0x152   : > { %3382 = vmatprep.subr.bf16.mxu0 %v6852_v49  ;;  %3994 = vmatprep.subr.bf16.mxu1 %v6855_v50  ;;  %v1091_v48 = vld [vmem:[%s8037_s14 + $0xe8] sm:$0xff]  ;;  %v6900_v49 = vld [vmem:[%s7986_s30 + $0x484] ss:$16 sps:$4 sm:$0xff]  }
 0x153   : > { %3298 = vmatmul.mubr.bf16.gmra.mrb[24].mxu0 %v5911_v51  ;;  %3910 = vmatmul.mubr.bf16.gmra.mrb[24].mxu1 %v5911_v51  ;;  %v6903_v50 = vld [vmem:[%s7986_s30 + $0x48c] ss:$16 sps:$4 sm:$0xff]   ;;  %v5881_v51 = vcombine.low %v1079_v39, %v1083_v40  ;;  %v6954_v39 = vld [vmem:[%s7986_s30 + $0x5a4] ss:$16 sps:$4 sm:$0xff]  }
 0x154   : > { %3307 = vmatprep.mubr.bf16.mxu0 %v5920_v52  ;;  %3919 = vmatprep.mubr.bf16.mxu1 %v5920_v52  ;;  %v6898_v52 = vld [vmem:[%s7986_s30 + $0x480] ss:$16 sps:$4 sm:$0xff]   ;;  %v6957_v40 = vld [vmem:[%s7986_s30 + $0x5ac] ss:$16 sps:$4 sm:$0xff]  }
 0x155   : > { %3383 = vmatpush1.bf16.msra.mxu0 %v6850_v53  ;;  %3995 = vmatpush1.bf16.msra.mxu1 %v6853_v54  ;;  %v6901_v53 = vld [vmem:[%s7986_s30 + $0x488] ss:$16 sps:$4 sm:$0xff]   ;;  %v5890_v54 = vcombine.high %v1087_v47, %v1091_v48 }
 0x156   : > { %3384 = vmatprep.subr.bf16.mxu0 %v6858_v55  ;;  %3996 = vmatprep.subr.bf16.mxu1 %v6861_v56  ;;  %v6906_v55 = vld [vmem:[%s7986_s30 + $0x4a4] ss:$16 sps:$4 sm:$0xff]   ;;  %v6909_v56 = vld [vmem:[%s7986_s30 + $0x4ac] ss:$16 sps:$4 sm:$0xff]  }
 0x159   : > { %3385 = vmatpush1.bf16.msra.mxu0 %v6856_v59  ;;  %3997 = vmatpush1.bf16.msra.mxu1 %v6859_v60  ;;  %v1095_v59 = vld [vmem:[%s8037_s14 + $0x108] sm:$0xff] }
 0x15a   : > { %3386 = vmatprep.subr.bf16.mxu0 %v6864_v61  ;;  %3998 = vmatprep.subr.bf16.mxu1 %v6867_v62  ;;  %v1099_v60 = vld [vmem:[%s8037_s14 + $0x128] sm:$0xff]  ;;  %v6912_v61 = vld [vmem:[%s7986_s30 + $0x4c4] ss:$16 sps:$4 sm:$0xff]  }
 0x15b   : > { %3308 = vmatmul.mubr.bf16.gmra.mrb[28].mxu0 %v5919_v63  ;;  %3920 = vmatmul.mubr.bf16.gmra.mrb[28].mxu1 %v5919_v63  ;;  %v6915_v62 = vld [vmem:[%s7986_s30 + $0x4cc] ss:$16 sps:$4 sm:$0xff]   ;;  %v5889_v63 = vcombine.low %v1087_v47, %v1091_v48 }
 0x15c   : > { %3317 = vmatprep.mubr.bf16.mxu0 %v5928_v0  ;;  %3929 = vmatprep.mubr.bf16.mxu1 %v5928_v0  ;;  %v5898_v0 = vcombine.high %v1095_v59, %v1099_v60 }
 0x15d   : > { %3387 = vmatpush1.bf16.msra.mxu0 %v6862_v1  ;;  %3999 = vmatpush1.bf16.msra.mxu1 %v6865_v2  ;;  %v6910_v1 = vld [vmem:[%s7986_s30 + $0x4c0] ss:$16 sps:$4 sm:$0xff]   ;;  %v6913_v2 = vld [vmem:[%s7986_s30 + $0x4c8] ss:$16 sps:$4 sm:$0xff]  }
 0x15e   : > { %3388 = vmatprep.subr.bf16.mxu0 %v6870_v3  ;;  %4000 = vmatprep.subr.bf16.mxu1 %v6873_v4  ;;  %v6918_v3 = vld [vmem:[%s7986_s30 + $0x4e4] ss:$16 sps:$4 sm:$0xff]   ;;  %v6921_v4 = vld [vmem:[%s7986_s30 + $0x4ec] ss:$16 sps:$4 sm:$0xff]  }
 0x161   : > { %3389 = vmatpush1.bf16.msra.mxu0 %v6868_v7  ;;  %4001 = vmatpush1.bf16.msra.mxu1 %v6871_v8  ;;  %v6916_v7 = vld [vmem:[%s7986_s30 + $0x4e0] ss:$16 sps:$4 sm:$0xff]   ;;  %v6919_v8 = vld [vmem:[%s7986_s30 + $0x4e8] ss:$16 sps:$4 sm:$0xff]  }
 0x162   : > { %3511 = vmatprep.subr.bf16.mxu0 %v6876_v9  ;;  %4123 = vmatprep.subr.bf16.mxu1 %v6879_v10  ;;  %v6924_v9 = vld [vmem:[%s7986_s30 + $0x504] ss:$16 sps:$4 sm:$0xff]   ;;  %v6927_v10 = vld [vmem:[%s7986_s30 + $0x50c] ss:$16 sps:$4 sm:$0xff]  }
 0x163   : > { %3318 = vmatmul.mubr.bf16.gmra.mrb[32].mxu0 %v5927_v11  ;;  %3930 = vmatmul.mubr.bf16.gmra.mrb[32].mxu1 %v5927_v11  ;;  %v5897_v11 = vcombine.low %v1095_v59, %v1099_v60 }
 0x164   : > { %3327 = vmatprep.mubr.bf16.mxu0 %v5936_v12  ;;  %3939 = vmatprep.mubr.bf16.mxu1 %v5936_v12  ;;  %v5906_v12 = vcombine.high %v1103_v5, %v1107_v6 }
 0x16b   : > { %3328 = vmatmul.mubr.bf16.gmra.mrb[36].mxu0 %v5935_v15  ;;  %3940 = vmatmul.mubr.bf16.gmra.mrb[36].mxu1 %v5935_v15  ;;  %v6930_v15 = vld [vmem:[%s7986_s30 + $0x524] ss:$16 sps:$4 sm:$0xff]  }
 0x16c   : > { %3337 = vmatprep.mubr.bf16.mxu0 %v5944_v16  ;;  %3949 = vmatprep.mubr.bf16.mxu1 %v5944_v16  ;;  %v6933_v16 = vld [vmem:[%s7986_s30 + $0x52c] ss:$16 sps:$4 sm:$0xff]  }
 0x173   : > { %3338 = vmatmul.mubr.bf16.gmra.mrb[40].mxu0 %v5943_v19  ;;  %3950 = vmatmul.mubr.bf16.gmra.mrb[40].mxu1 %v5943_v19  ;;  %v6928_v19 = vld [vmem:[%s7986_s30 + $0x520] ss:$16 sps:$4 sm:$0xff]  }
 0x174   : > { %3347 = vmatprep.mubr.bf16.mxu0 %v5952_v20  ;;  %3959 = vmatprep.mubr.bf16.mxu1 %v5952_v20  ;;  %v6931_v20 = vld [vmem:[%s7986_s30 + $0x528] ss:$16 sps:$4 sm:$0xff]  }
 0x17b   : > { %3348 = vmatmul.mubr.bf16.gmra.mrb[44].mxu0 %v5951_v23  ;;  %3960 = vmatmul.mubr.bf16.gmra.mrb[44].mxu1 %v5951_v23  ;;  %v5905_v23 = vcombine.low %v1103_v5, %v1107_v6  ;;  %v1064_v5 = vld [vmem:[%s8037_s14 + $0x10] sm:$0xff] }
 0x17c   : > { %3390 = vmatprep.mubr.bf16.mxu0 %v5866_v24  ;;  %4002 = vmatprep.mubr.bf16.mxu1 %v5866_v24  ;;  %v5914_v24 = vcombine.high %v1111_v17, %v1115_v18  ;;  %v1068_v6 = vld [vmem:[%s8037_s14 + $0x30] sm:$0xff] }
 0x183   : > { %3391 = vmatmul.mubr.bf16.vlgmr.msra.gmra.mrb[0].mxu0 %v5865_v27  ;;  %4003 = vmatmul.mubr.bf16.vlgmr.msra.gmra.mrb[0].mxu1 %v5865_v27  ;;  %v6942_v27 = vld [vmem:[%s7986_s30 + $0x564] ss:$16 sps:$4 sm:$0xff]  }
 0x184   : > { %3512 = vmatpush1.bf16.msra.mxu0 %v6874_v25  ;;  %4124 = vmatpush1.bf16.msra.mxu1 %v6877_v26  ;;  %v6934_v25 = vld [vmem:[%s7986_s30 + $0x540] ss:$16 sps:$4 sm:$0xff]   ;;  %v6937_v26 = vld [vmem:[%s7986_s30 + $0x548] ss:$16 sps:$4 sm:$0xff]  }
 0x185   : > { %3513 = vmatprep.subr.bf16.mxu0 %v6882_v30  ;;  %4125 = vmatprep.subr.bf16.mxu1 %v6885_v31  ;;  %v1123_v30 = vld [vmem:[%s8037_s14 + $0x1e8] sm:$0xff]  ;;  %v6940_v31 = vld [vmem:[%s7986_s30 + $0x560] ss:$16 sps:$4 sm:$0xff]  }
 0x186   : > { %3400 = vmatprep.mubr.bf16.mxu0 %v5874_v32  ;;  %4012 = vmatprep.mubr.bf16.mxu1 %v5874_v32  ;;  %v6943_v32 = vld [vmem:[%s7986_s30 + $0x568] ss:$16 sps:$4 sm:$0xff]   ;;  %v5921_v47 = vcombine.low %v1119_v29, %v1123_v30 }
 0x188   : > { %3514 = vmatpush1.bf16.msra.mxu0 %v6880_v33  ;;  %4126 = vmatpush1.bf16.msra.mxu1 %v6883_v34  ;;  %v6948_v33 = vld [vmem:[%s7986_s30 + $0x584] ss:$16 sps:$4 sm:$0xff]   ;;  %v6951_v34 = vld [vmem:[%s7986_s30 + $0x58c] ss:$16 sps:$4 sm:$0xff]  }
 0x189   : > { %3515 = vmatprep.subr.bf16.mxu0 %v6888_v35  ;;  %4127 = vmatprep.subr.bf16.mxu1 %v6891_v36  ;;  %v5913_v35 = vcombine.low %v1111_v17, %v1115_v18  ;;  %v5922_v36 = vcombine.high %v1119_v29, %v1123_v30  ;;  %v6976_v17 = vld [vmem:[%s7986_s30 + $0x620] ss:$16 sps:$4 sm:$0xff]   ;;  %v6979_v18 = vld [vmem:[%s7986_s30 + $0x628] ss:$16 sps:$4 sm:$0xff]  }
 0x18a   : > { %v6988_v29 = vld [vmem:[%s7986_s30 + $0x660] ss:$16 sps:$4 sm:$0xff]   ;;  %v6991_v30 = vld [vmem:[%s7986_s30 + $0x668] ss:$16 sps:$4 sm:$0xff]  }
 0x18b   : > { %3401 = vmatmul.mubr.bf16.gmra.mrb[4].mxu0 %v5873_v41  ;;  %4013 = vmatmul.mubr.bf16.gmra.mrb[4].mxu1 %v5873_v41  ;;  %v1127_v41 = vld [vmem:[%s8037_s14 + $0x208] sm:$0xff] }
 0x18c   : > { %3516 = vmatpush1.bf16.msra.mxu0 %v6886_v37  ;;  %4128 = vmatpush1.bf16.msra.mxu1 %v6889_v38  ;;  %v6946_v37 = vld [vmem:[%s7986_s30 + $0x580] ss:$16 sps:$4 sm:$0xff]   ;;  %v6949_v38 = vld [vmem:[%s7986_s30 + $0x588] ss:$16 sps:$4 sm:$0xff]  }
 0x18d   : > { %3410 = vmatprep.mubr.bf16.mxu0 %v5882_v44  ;;  %4022 = vmatprep.mubr.bf16.mxu1 %v5882_v44  ;;  %v6955_v44 = vld [vmem:[%s7986_s30 + $0x5a8] ss:$16 sps:$4 sm:$0xff]  }
 0x18e   : > { %3517 = vmatprep.subr.bf16.mxu0 %v6894_v42  ;;  %4129 = vmatprep.subr.bf16.mxu1 %v6897_v43  ;;  %v1131_v42 = vld [vmem:[%s8037_s14 + $0x228] sm:$0xff]  ;;  %v6952_v43 = vld [vmem:[%s7986_s30 + $0x5a0] ss:$16 sps:$4 sm:$0xff]  }
 0x18f   : > { %v5930_v48 = vcombine.high %v1127_v41, %v1131_v42  ;;  %v5929_v59 = vcombine.low %v1127_v41, %v1131_v42  ;;  %v7000_v41 = vld [vmem:[%s7986_s30 + $0x6a0] ss:$16 sps:$4 sm:$0xff]   ;;  %v7003_v42 = vld [vmem:[%s7986_s30 + $0x6a8] ss:$16 sps:$4 sm:$0xff]  }
 0x190   : > { %3518 = vmatpush1.bf16.msra.mxu0 %v6892_v45  ;;  %4130 = vmatpush1.bf16.msra.mxu1 %v6895_v46  ;;  %v6960_v45 = vld [vmem:[%s7986_s30 + $0x5c4] ss:$16 sps:$4 sm:$0xff]   ;;  %v6963_v46 = vld [vmem:[%s7986_s30 + $0x5cc] ss:$16 sps:$4 sm:$0xff]  }
 0x191   : > { %3519 = vmatprep.subr.bf16.mxu0 %v6900_v49  ;;  %4131 = vmatprep.subr.bf16.mxu1 %v6903_v50  ;;  %v6958_v49 = vld [vmem:[%s7986_s30 + $0x5c0] ss:$16 sps:$4 sm:$0xff]   ;;  %v6961_v50 = vld [vmem:[%s7986_s30 + $0x5c8] ss:$16 sps:$4 sm:$0xff]  }
 0x193   : > { %3411 = vmatmul.mubr.bf16.gmra.mrb[8].mxu0 %v5881_v51  ;;  %4023 = vmatmul.mubr.bf16.gmra.mrb[8].mxu1 %v5881_v51  ;;  %v6966_v51 = vld [vmem:[%s7986_s30 + $0x5e4] ss:$16 sps:$4 sm:$0xff]  }
 0x194   : > { %3420 = vmatprep.mubr.bf16.mxu0 %v5890_v54  ;;  %4032 = vmatprep.mubr.bf16.mxu1 %v5890_v54  ;;  %v1139_v54 = vld [vmem:[%s8037_s14 + $0x268] sm:$0xff] }
 0x195   : > { %3520 = vmatpush1.bf16.msra.mxu0 %v6898_v52  ;;  %4132 = vmatpush1.bf16.msra.mxu1 %v6901_v53  ;;  %v6969_v52 = vld [vmem:[%s7986_s30 + $0x5ec] ss:$16 sps:$4 sm:$0xff]  }
 0x196   : > { %3521 = vmatprep.subr.bf16.mxu0 %v6906_v55  ;;  %4133 = vmatprep.subr.bf16.mxu1 %v6909_v56  ;;  %v1135_v53 = vld [vmem:[%s8037_s14 + $0x248] sm:$0xff]  ;;  %v6964_v55 = vld [vmem:[%s7986_s30 + $0x5e0] ss:$16 sps:$4 sm:$0xff]  }
 0x197   : > { %v6967_v56 = vld [vmem:[%s7986_s30 + $0x5e8] ss:$16 sps:$4 sm:$0xff]   ;;  %v5938_v60 = vcombine.high %v1135_v53, %v1139_v54 }
 0x199   : > { %3522 = vmatpush1.bf16.msra.mxu0 %v6904_v57  ;;  %4134 = vmatpush1.bf16.msra.mxu1 %v6907_v58  ;;  %v6972_v57 = vld [vmem:[%s7986_s30 + $0x604] ss:$16 sps:$4 sm:$0xff]   ;;  %v6975_v58 = vld [vmem:[%s7986_s30 + $0x60c] ss:$16 sps:$4 sm:$0xff]  }
 0x19a   : > { %3523 = vmatprep.subr.bf16.mxu0 %v6912_v61  ;;  %4135 = vmatprep.subr.bf16.mxu1 %v6915_v62  ;;  %v1143_v61 = vld [vmem:[%s8037_s14 + $0x288] sm:$0xff] }
 0x19b   : > { %3421 = vmatmul.mubr.bf16.gmra.mrb[12].mxu0 %v5889_v63  ;;  %4033 = vmatmul.mubr.bf16.gmra.mrb[12].mxu1 %v5889_v63  ;;  %v1147_v62 = vld [vmem:[%s8037_s14 + $0x2a8] sm:$0xff]  ;;  %v5937_v63 = vcombine.low %v1135_v53, %v1139_v54  ;;  %v1104_v53 = vld [vmem:[%s8037_s14 + $0x150] sm:$0xff] }
 0x19c   : > { %3430 = vmatprep.mubr.bf16.mxu0 %v5898_v0  ;;  %4042 = vmatprep.mubr.bf16.mxu1 %v5898_v0  ;;  %v5946_v0 = vcombine.high %v1143_v61, %v1147_v62  ;;  %v1108_v54 = vld [vmem:[%s8037_s14 + $0x170] sm:$0xff] }
 0x19d   : > { %3524 = vmatpush1.bf16.msra.mxu0 %v6910_v1  ;;  %4136 = vmatpush1.bf16.msra.mxu1 %v6913_v2  ;;  %v1151_v1 = vld [vmem:[%s8037_s14 + $0x2c8] sm:$0xff] }
 0x19e   : > { %3525 = vmatprep.subr.bf16.mxu0 %v6918_v3  ;;  %4137 = vmatprep.subr.bf16.mxu1 %v6921_v4  ;;  %v1155_v2 = vld [vmem:[%s8037_s14 + $0x2e8] sm:$0xff]  ;;  %v5945_v3 = vcombine.low %v1143_v61, %v1147_v62  ;;  %v7018_v61 = vld [vmem:[%s7986_s30 + $0x700] ss:$16 sps:$4 sm:$0xff]  }
 0x19f   : > { %v5954_v4 = vcombine.high %v1151_v1, %v1155_v2  ;;  %v7021_v62 = vld [vmem:[%s7986_s30 + $0x708] ss:$16 sps:$4 sm:$0xff]  }
 0x1a1   : > { %3526 = vmatpush1.bf16.msra.mxu0 %v6916_v7  ;;  %4138 = vmatpush1.bf16.msra.mxu1 %v6919_v8  ;;  %v5953_v7 = vcombine.low %v1151_v1, %v1155_v2  ;;  %v5868_v8 = vcombine.high %v1064_v5, %v1068_v6  ;;  %v1112_v1 = vld [vmem:[%s8037_s14 + $0x190] sm:$0xff] }
 0x1a2   : > { %3527 = vmatprep.subr.bf16.mxu0 %v6924_v9  ;;  %4139 = vmatprep.subr.bf16.mxu1 %v6927_v10  ;;  %v5867_v9 = vcombine.low %v1064_v5, %v1068_v6  ;;  %v1072_v10 = vld [vmem:[%s8037_s14 + $0x50] sm:$0xff]  ;;  %v7035_v6 = vld [vmem:[%s7986_s30 + $0x74c] ss:$16 sps:$4 sm:$0xff]  }
 0x1a3   : > { %3431 = vmatmul.mubr.bf16.gmra.mrb[16].mxu0 %v5897_v11  ;;  %4043 = vmatmul.mubr.bf16.gmra.mrb[16].mxu1 %v5897_v11  ;;  %v1076_v11 = vld [vmem:[%s8037_s14 + $0x70] sm:$0xff] }
 0x1a4   : > { %3440 = vmatprep.mubr.bf16.mxu0 %v5906_v12  ;;  %4052 = vmatprep.mubr.bf16.mxu1 %v5906_v12  ;;  %v6970_v12 = vld [vmem:[%s7986_s30 + $0x600] ss:$16 sps:$4 sm:$0xff]   ;;  %v7032_v5 = vld [vmem:[%s7986_s30 + $0x744] ss:$16 sps:$4 sm:$0xff]  }
 0x1a5   : > { %3528 = vmatpush1.bf16.msra.mxu0 %v6922_v13  ;;  %4140 = vmatpush1.bf16.msra.mxu1 %v6925_v14  ;;  %v6973_v13 = vld [vmem:[%s7986_s30 + $0x608] ss:$16 sps:$4 sm:$0xff]   ;;  %v6978_v14 = vld [vmem:[%s7986_s30 + $0x624] ss:$16 sps:$4 sm:$0xff]  }
 0x1a6   : > { %3529 = vmatprep.subr.bf16.mxu0 %v6930_v15  ;;  %4141 = vmatprep.subr.bf16.mxu1 %v6933_v16  ;;  %v6981_v15 = vld [vmem:[%s7986_s30 + $0x62c] ss:$16 sps:$4 sm:$0xff]   ;;  %v5876_v16 = vcombine.high %v1072_v10, %v1076_v11  ;;  %v1116_v2 = vld [vmem:[%s8037_s14 + $0x1b0] sm:$0xff] }
 0x1a9   : > { %3530 = vmatpush1.bf16.msra.mxu0 %v6928_v19  ;;  %4142 = vmatpush1.bf16.msra.mxu1 %v6931_v20  ;;  %v6984_v19 = vld [vmem:[%s7986_s30 + $0x644] ss:$16 sps:$4 sm:$0xff]   ;;  %v6987_v20 = vld [vmem:[%s7986_s30 + $0x64c] ss:$16 sps:$4 sm:$0xff]  }
 0x1aa   : > { %3531 = vmatprep.subr.bf16.mxu0 %v6936_v21  ;;  %4143 = vmatprep.subr.bf16.mxu1 %v6939_v22  ;;  %v1080_v21 = vld [vmem:[%s8037_s14 + $0x90] sm:$0xff] }
 0x1ab   : > { %3441 = vmatmul.mubr.bf16.gmra.mrb[20].mxu0 %v5905_v23  ;;  %4053 = vmatmul.mubr.bf16.gmra.mrb[20].mxu1 %v5905_v23  ;;  %v1084_v22 = vld [vmem:[%s8037_s14 + $0xb0] sm:$0xff]  ;;  %v5875_v23 = vcombine.low %v1072_v10, %v1076_v11  ;;  %v7033_v10 = vld [vmem:[%s7986_s30 + $0x748] ss:$16 sps:$4 sm:$0xff]  }
 0x1ac   : > { %3450 = vmatprep.mubr.bf16.mxu0 %v5914_v24  ;;  %4062 = vmatprep.mubr.bf16.mxu1 %v5914_v24  ;;  %v6982_v24 = vld [vmem:[%s7986_s30 + $0x640] ss:$16 sps:$4 sm:$0xff]   ;;  %v7038_v11 = vld [vmem:[%s7986_s30 + $0x764] ss:$16 sps:$4 sm:$0xff]  }
 0x1ad   : > { %3532 = vmatpush1.bf16.msra.mxu0 %v6934_v25  ;;  %4144 = vmatpush1.bf16.msra.mxu1 %v6937_v26  ;;  %v6985_v25 = vld [vmem:[%s7986_s30 + $0x648] ss:$16 sps:$4 sm:$0xff]   ;;  %v5884_v26 = vcombine.high %v1080_v21, %v1084_v22 }
 0x1ae   : > { %3533 = vmatprep.subr.bf16.mxu0 %v6942_v27  ;;  %4145 = vmatprep.subr.bf16.mxu1 %v6945_v28  ;;  %v6990_v27 = vld [vmem:[%s7986_s30 + $0x664] ss:$16 sps:$4 sm:$0xff]   ;;  %v6993_v28 = vld [vmem:[%s7986_s30 + $0x66c] ss:$16 sps:$4 sm:$0xff]  }
 0x1b1   : > { %3534 = vmatpush1.bf16.msra.mxu0 %v6940_v31  ;;  %4146 = vmatpush1.bf16.msra.mxu1 %v6943_v32  ;;  %v1088_v31 = vld [vmem:[%s8037_s14 + $0xd0] sm:$0xff] }
 0x1b2   : > { %3535 = vmatprep.subr.bf16.mxu0 %v6948_v33  ;;  %4147 = vmatprep.subr.bf16.mxu1 %v6951_v34  ;;  %v1092_v32 = vld [vmem:[%s8037_s14 + $0xf0] sm:$0xff]  ;;  %v6999_v34 = vld [vmem:[%s7986_s30 + $0x68c] ss:$16 sps:$4 sm:$0xff]  }
 0x1b3   : > { %3451 = vmatmul.mubr.bf16.gmra.mrb[24].mxu0 %v5913_v35  ;;  %4063 = vmatmul.mubr.bf16.gmra.mrb[24].mxu1 %v5913_v35  ;;  %v6996_v33 = vld [vmem:[%s7986_s30 + $0x684] ss:$16 sps:$4 sm:$0xff]   ;;  %v5883_v35 = vcombine.low %v1080_v21, %v1084_v22  ;;  %v7042_v21 = vld [vmem:[%s7986_s30 + $0x780] ss:$16 sps:$4 sm:$0xff]   ;;  %v7045_v22 = vld [vmem:[%s7986_s30 + $0x788] ss:$16 sps:$4 sm:$0xff]  }
 0x1b4   : > { %3460 = vmatprep.mubr.bf16.mxu0 %v5922_v36  ;;  %4072 = vmatprep.mubr.bf16.mxu1 %v5922_v36  ;;  %v5892_v36 = vcombine.high %v1088_v31, %v1092_v32 }
 0x1b5   : > { %3536 = vmatpush1.bf16.msra.mxu0 %v6946_v37  ;;  %4148 = vmatpush1.bf16.msra.mxu1 %v6949_v38  ;;  %v6994_v37 = vld [vmem:[%s7986_s30 + $0x680] ss:$16 sps:$4 sm:$0xff]   ;;  %v6997_v38 = vld [vmem:[%s7986_s30 + $0x688] ss:$16 sps:$4 sm:$0xff]  }
 0x1b6   : > { %3537 = vmatprep.subr.bf16.mxu0 %v6954_v39  ;;  %4149 = vmatprep.subr.bf16.mxu1 %v6957_v40  ;;  %v7002_v39 = vld [vmem:[%s7986_s30 + $0x6a4] ss:$16 sps:$4 sm:$0xff]   ;;  %v7005_v40 = vld [vmem:[%s7986_s30 + $0x6ac] ss:$16 sps:$4 sm:$0xff]  }
 0x1b9   : > { %3538 = vmatpush1.bf16.msra.mxu0 %v6952_v43  ;;  %4150 = vmatpush1.bf16.msra.mxu1 %v6955_v44  ;;  %v1096_v43 = vld [vmem:[%s8037_s14 + $0x110] sm:$0xff] }
 0x1ba   : > { %3539 = vmatprep.subr.bf16.mxu0 %v6960_v45  ;;  %4151 = vmatprep.subr.bf16.mxu1 %v6963_v46  ;;  %v1100_v44 = vld [vmem:[%s8037_s14 + $0x130] sm:$0xff]  ;;  %v7011_v46 = vld [vmem:[%s7986_s30 + $0x6cc] ss:$16 sps:$4 sm:$0xff]  }
 0x1bb   : > { %3461 = vmatmul.mubr.bf16.gmra.mrb[28].mxu0 %v5921_v47  ;;  %4073 = vmatmul.mubr.bf16.gmra.mrb[28].mxu1 %v5921_v47  ;;  %v7008_v45 = vld [vmem:[%s7986_s30 + $0x6c4] ss:$16 sps:$4 sm:$0xff]   ;;  %v5891_v47 = vcombine.low %v1088_v31, %v1092_v32 }
 0x1bc   : > { %3470 = vmatprep.mubr.bf16.mxu0 %v5930_v48  ;;  %4082 = vmatprep.mubr.bf16.mxu1 %v5930_v48  ;;  %v5900_v48 = vcombine.high %v1096_v43, %v1100_v44 }
 0x1bd   : > { %3540 = vmatpush1.bf16.msra.mxu0 %v6958_v49  ;;  %4152 = vmatpush1.bf16.msra.mxu1 %v6961_v50  ;;  %v7006_v49 = vld [vmem:[%s7986_s30 + $0x6c0] ss:$16 sps:$4 sm:$0xff]   ;;  %v7009_v50 = vld [vmem:[%s7986_s30 + $0x6c8] ss:$16 sps:$4 sm:$0xff]  }
 0x1be   : > { %3541 = vmatprep.subr.bf16.mxu0 %v6966_v51  ;;  %4153 = vmatprep.subr.bf16.mxu1 %v6969_v52  ;;  %v7014_v51 = vld [vmem:[%s7986_s30 + $0x6e4] ss:$16 sps:$4 sm:$0xff]   ;;  %v7017_v52 = vld [vmem:[%s7986_s30 + $0x6ec] ss:$16 sps:$4 sm:$0xff]  }
 0x1c1   : > { %3542 = vmatpush1.bf16.msra.mxu0 %v6964_v55  ;;  %4154 = vmatpush1.bf16.msra.mxu1 %v6967_v56  ;;  %v7012_v55 = vld [vmem:[%s7986_s30 + $0x6e0] ss:$16 sps:$4 sm:$0xff]   ;;  %v7015_v56 = vld [vmem:[%s7986_s30 + $0x6e8] ss:$16 sps:$4 sm:$0xff]  }
 0x1c2   : > { %3664 = vmatprep.subr.bf16.mxu0 %v6972_v57  ;;  %4276 = vmatprep.subr.bf16.mxu1 %v6975_v58  ;;  %v7020_v57 = vld [vmem:[%s7986_s30 + $0x704] ss:$16 sps:$4 sm:$0xff]   ;;  %v7023_v58 = vld [vmem:[%s7986_s30 + $0x70c] ss:$16 sps:$4 sm:$0xff]  }
 0x1c3   : > { %3471 = vmatmul.mubr.bf16.gmra.mrb[32].mxu0 %v5929_v59  ;;  %4083 = vmatmul.mubr.bf16.gmra.mrb[32].mxu1 %v5929_v59  ;;  %v5899_v59 = vcombine.low %v1096_v43, %v1100_v44 }
 0x1c4   : > { %3480 = vmatprep.mubr.bf16.mxu0 %v5938_v60  ;;  %4092 = vmatprep.mubr.bf16.mxu1 %v5938_v60  ;;  %v5908_v60 = vcombine.high %v1104_v53, %v1108_v54 }
 0x1cb   : > { %3481 = vmatmul.mubr.bf16.gmra.mrb[36].mxu0 %v5937_v63  ;;  %4093 = vmatmul.mubr.bf16.gmra.mrb[36].mxu1 %v5937_v63  ;;  %v7026_v63 = vld [vmem:[%s7986_s30 + $0x724] ss:$16 sps:$4 sm:$0xff]  }
 0x1cc   : > { %3490 = vmatprep.mubr.bf16.mxu0 %v5946_v0  ;;  %4102 = vmatprep.mubr.bf16.mxu1 %v5946_v0  ;;  %v7029_v0 = vld [vmem:[%s7986_s30 + $0x72c] ss:$16 sps:$4 sm:$0xff]  }
 0x1d3   : > { %3491 = vmatmul.mubr.bf16.gmra.mrb[40].mxu0 %v5945_v3  ;;  %4103 = vmatmul.mubr.bf16.gmra.mrb[40].mxu1 %v5945_v3  ;;  %v7024_v3 = vld [vmem:[%s7986_s30 + $0x720] ss:$16 sps:$4 sm:$0xff]  }
 0x1d4   : > { %3500 = vmatprep.mubr.bf16.mxu0 %v5954_v4  ;;  %4112 = vmatprep.mubr.bf16.mxu1 %v5954_v4  ;;  %v7027_v4 = vld [vmem:[%s7986_s30 + $0x728] ss:$16 sps:$4 sm:$0xff]  }
 0x1db   : > { %3501 = vmatmul.mubr.bf16.gmra.mrb[44].mxu0 %v5953_v7  ;;  %4113 = vmatmul.mubr.bf16.gmra.mrb[44].mxu1 %v5953_v7  ;;  %v5907_v7 = vcombine.low %v1104_v53, %v1108_v54 }
 0x1dc   : > { %3543 = vmatprep.mubr.bf16.mxu0 %v5868_v8  ;;  %4155 = vmatprep.mubr.bf16.mxu1 %v5868_v8  ;;  %v5916_v8 = vcombine.high %v1112_v1, %v1116_v2 }
 0x1e3   : > { %3544 = vmatmul.mubr.bf16.vlgmr.msra.gmra.mrb[0].mxu0 %v5867_v9  ;;  %4156 = vmatmul.mubr.bf16.vlgmr.msra.gmra.mrb[0].mxu1 %v5867_v9  ;;  %v7030_v9 = vld [vmem:[%s7986_s30 + $0x740] ss:$16 sps:$4 sm:$0xff]  }
 0x1e4   : > { %3665 = vmatpush1.bf16.msra.mxu0 %v6970_v12  ;;  %4277 = vmatpush1.bf16.msra.mxu1 %v6973_v13  ;;  %v7041_v12 = vld [vmem:[%s7986_s30 + $0x76c] ss:$16 sps:$4 sm:$0xff]   ;;  %v1120_v13 = vld [vmem:[%s8037_s14 + $0x1d0] sm:$0xff] }
 0x1e5   : > { %3666 = vmatprep.subr.bf16.mxu0 %v6978_v14  ;;  %4278 = vmatprep.subr.bf16.mxu1 %v6981_v15  ;;  %v1124_v14 = vld [vmem:[%s8037_s14 + $0x1f0] sm:$0xff] }
 0x1e6   : > { %3553 = vmatprep.mubr.bf16.mxu0 %v5876_v16  ;;  %4165 = vmatprep.mubr.bf16.mxu1 %v5876_v16  ;;  %v7036_v15 = vld [vmem:[%s7986_s30 + $0x760] ss:$16 sps:$4 sm:$0xff]   ;;  %v7039_v16 = vld [vmem:[%s7986_s30 + $0x768] ss:$16 sps:$4 sm:$0xff]   ;;  %v5923_v31 = vcombine.low %v1120_v13, %v1124_v14 }
 0x1e8   : > { %3667 = vmatpush1.bf16.msra.mxu0 %v6976_v17  ;;  %4279 = vmatpush1.bf16.msra.mxu1 %v6979_v18  ;;  %v7044_v17 = vld [vmem:[%s7986_s30 + $0x784] ss:$16 sps:$4 sm:$0xff]   ;;  %v7047_v18 = vld [vmem:[%s7986_s30 + $0x78c] ss:$16 sps:$4 sm:$0xff]  }
 0x1e9   : > { %3668 = vmatprep.subr.bf16.mxu0 %v6984_v19  ;;  %4280 = vmatprep.subr.bf16.mxu1 %v6987_v20  ;;  %v5915_v19 = vcombine.low %v1112_v1, %v1116_v2  ;;  %v5924_v20 = vcombine.high %v1120_v13, %v1124_v14 }
 0x1eb   : > { %3554 = vmatmul.mubr.bf16.gmra.mrb[4].mxu0 %v5875_v23  ;;  %4166 = vmatmul.mubr.bf16.gmra.mrb[4].mxu1 %v5875_v23  ;;  %v7050_v23 = vld [vmem:[%s7986_s30 + $0x7a4] ss:$16 sps:$4 sm:$0xff]  }
 0x1ec   : > { %3669 = vmatpush1.bf16.msra.mxu0 %v6982_v24  ;;  %4281 = vmatpush1.bf16.msra.mxu1 %v6985_v25  ;;  %v7053_v24 = vld [vmem:[%s7986_s30 + $0x7ac] ss:$16 sps:$4 sm:$0xff]   ;;  %v1128_v25 = vld [vmem:[%s8037_s14 + $0x210] sm:$0xff] }
 0x1ed   : > { %3563 = vmatprep.mubr.bf16.mxu0 %v5884_v26  ;;  %4175 = vmatprep.mubr.bf16.mxu1 %v5884_v26  ;;  %v1132_v26 = vld [vmem:[%s8037_s14 + $0x230] sm:$0xff] }
 0x1ee   : > { %3670 = vmatprep.subr.bf16.mxu0 %v6990_v27  ;;  %4282 = vmatprep.subr.bf16.mxu1 %v6993_v28  ;;  %v7048_v27 = vld [vmem:[%s7986_s30 + $0x7a0] ss:$16 sps:$4 sm:$0xff]   ;;  %v7051_v28 = vld [vmem:[%s7986_s30 + $0x7a8] ss:$16 sps:$4 sm:$0xff]   ;;  %v5932_v32 = vcombine.high %v1128_v25, %v1132_v26  ;;  %v5931_v43 = vcombine.low %v1128_v25, %v1132_v26 }
 0x1f0   : > { %3671 = vmatpush1.bf16.msra.mxu0 %v6988_v29  ;;  %4283 = vmatpush1.bf16.msra.mxu1 %v6991_v30  ;;  %v7056_v29 = vld [vmem:[%s7986_s30 + $0x7c4] ss:$16 sps:$4 sm:$0xff]   ;;  %v7059_v30 = vld [vmem:[%s7986_s30 + $0x7cc] ss:$16 sps:$4 sm:$0xff]  }
 0x1f1   : > { %3672 = vmatprep.subr.bf16.mxu0 %v6996_v33  ;;  %4284 = vmatprep.subr.bf16.mxu1 %v6999_v34  ;;  %v7054_v33 = vld [vmem:[%s7986_s30 + $0x7c0] ss:$16 sps:$4 sm:$0xff]   ;;  %v7057_v34 = vld [vmem:[%s7986_s30 + $0x7c8] ss:$16 sps:$4 sm:$0xff]  }
 0x1f3   : > { %3564 = vmatmul.mubr.bf16.gmra.mrb[8].mxu0 %v5883_v35  ;;  %4176 = vmatmul.mubr.bf16.gmra.mrb[8].mxu1 %v5883_v35  ;;  %v7062_v35 = vld [vmem:[%s7986_s30 + $0x7e4] ss:$16 sps:$4 sm:$0xff]  }
 0x1f4   : > { %3573 = vmatprep.mubr.bf16.mxu0 %v5892_v36  ;;  %4185 = vmatprep.mubr.bf16.mxu1 %v5892_v36  ;;  %v7065_v36 = vld [vmem:[%s7986_s30 + $0x7ec] ss:$16 sps:$4 sm:$0xff]  }
 0x1f5   : > { %3673 = vmatpush1.bf16.msra.mxu0 %v6994_v37  ;;  %4285 = vmatpush1.bf16.msra.mxu1 %v6997_v38  ;;  %v1417_v37 = vlaneseq  ;;  %v1136_v38 = vld [vmem:[%s8037_s14 + $0x250] sm:$0xff] }
 0x1f6   : > { %3674 = vmatprep.subr.bf16.mxu0 %v7002_v39  ;;  %4286 = vmatprep.subr.bf16.mxu1 %v7005_v40  ;;  %v7060_v39 = vld [vmem:[%s7986_s30 + $0x7e0] ss:$16 sps:$4 sm:$0xff]  }
 0x1f7   : > { %v1140_v40 = vld [vmem:[%s8037_s14 + $0x270] sm:$0xff]  ;;  %vm1419_vm0 = vcmp.lt.s32.totalorder %v1417_v37, 512 }
 0x1f8   : > { %v5939_v53 = vcombine.low %v1136_v38, %v1140_v40 }
 0x1f9   : > { %3675 = vmatpush1.bf16.msra.mxu0 %v7000_v41  ;;  %4287 = vmatpush1.bf16.msra.mxu1 %v7003_v42  ;;  %v7063_v41 = vld [vmem:[%s7986_s30 + $0x7e8] ss:$16 sps:$4 sm:$0xff]   ;;  %v8326_v42 = vshrl.u32 %v1417_v37, 7  ;;  %s1054_s30 = scalar_lea.vmem %s9418_s3, %s1053_s20 }
 0x1fa   : > { %3676 = vmatprep.subr.bf16.mxu0 %v7008_v45  ;;  %4288 = vmatprep.subr.bf16.mxu1 %v7011_v46  ;;  %v5940_v45 = vcombine.high %v1136_v38, %v1140_v40  ;;  %v1415_v46 = vld [vmem:[%s8330_s23] ss:$8 sm:$0xf] }
 0x1fb   : > { %3574 = vmatmul.mubr.bf16.gmra.mrb[12].mxu0 %v5891_v47  ;;  %4186 = vmatmul.mubr.bf16.gmra.mrb[12].mxu1 %v5891_v47  ;;  %v1427_v44 = vsub.s32 0, %v8326_v42  ;;  %v1414_v47 = vld [vmem:[%s1059_s9] sm:$0xf]  ;;  %v1157_v40 = vld [vmem:[%s8037_s14 + $0x2f8] sm:$0xff] }
 0x1fc   : > { %3583 = vmatprep.mubr.bf16.mxu0 %v5900_v48  ;;  %4195 = vmatprep.mubr.bf16.mxu1 %v5900_v48  ;;  %v8339_v48 = vld [vmem:[%s1054_s30] sm:$0xf] }
 0x1fd   : > { %3677 = vmatpush1.bf16.msra.mxu0 %v7006_v49  ;;  %4289 = vmatpush1.bf16.msra.mxu1 %v7009_v50  ;;  %v1416_v49 = vadd.f32 %v1415_v46, %v1414_v47  ;;  %v8342_v50 = vrot.slane %v8339_v48, %v1427_v44  ;;  %v1435_v44 = vsub.s32 2, %v8326_v42  ;;  %v1439_v46 = vsub.s32 3, %v8326_v42 }
 0x1fe   : > { %3678 = vmatprep.subr.bf16.mxu0 %v7014_v51  ;;  %4290 = vmatprep.subr.bf16.mxu1 %v7017_v52  ;;  %v1144_v51 = vld [vmem:[%s8037_s14 + $0x290] sm:$0xff] }
 0x1ff   : > { %v1148_v52 = vld [vmem:[%s8037_s14 + $0x2b0] sm:$0xff]  ;;  %1421 = vst.msk [vmem:[%s8346_s10] ss:$8 sm:$0xf] %vm1419_vm0, %v1416_v49  ;;  %v8379_v47 = vrot.slane %v8339_v48, %v1435_v44 }
 0x200   : > { %v5948_v54 = vcombine.high %v1144_v51, %v1148_v52 }
 0x201   : > { %3679 = vmatpush1.bf16.msra.mxu0 %v7012_v55  ;;  %4291 = vmatpush1.bf16.msra.mxu1 %v7015_v56  ;;  %v1152_v55 = vld [vmem:[%s8037_s14 + $0x2d0] sm:$0xff] }
 0x202   : > { %3680 = vmatprep.subr.bf16.mxu0 %v7020_v57  ;;  %4292 = vmatprep.subr.bf16.mxu1 %v7023_v58  ;;  %v1156_v56 = vld [vmem:[%s8037_s14 + $0x2f0] sm:$0xff]  ;;  %v5947_v57 = vcombine.low %v1144_v51, %v1148_v52  ;;  %v8385_v52 = vrot.slane %v8339_v48, %v1439_v46 }
 0x203   : > { %3584 = vmatmul.mubr.bf16.gmra.mrb[16].mxu0 %v5899_v59  ;;  %4196 = vmatmul.mubr.bf16.gmra.mrb[16].mxu1 %v5899_v59  ;;  %v5956_v58 = vcombine.high %v1152_v55, %v1156_v56  ;;  %v1065_v59 = vld [vmem:[%s8037_s14 + $0x18] sm:$0xff] }
 0x204   : > { %3593 = vmatprep.mubr.bf16.mxu0 %v5908_v60  ;;  %4205 = vmatprep.mubr.bf16.mxu1 %v5908_v60  ;;  %v1069_v60 = vld [vmem:[%s8037_s14 + $0x38] sm:$0xff] }
 0x205   : > { %3681 = vmatpush1.bf16.msra.mxu0 %v7018_v61  ;;  %4293 = vmatpush1.bf16.msra.mxu1 %v7021_v62  ;;  %v5955_v61 = vcombine.low %v1152_v55, %v1156_v56  ;;  %v5870_v62 = vcombine.high %v1065_v59, %v1069_v60  ;;  %v5869_v1 = vcombine.low %v1065_v59, %v1069_v60  ;;  %v4431_v55 = vld [vmem:[%s8330_s23 + $0x10] sm:$0xfe]  ;;  %v4430_v56 = vld [vmem:[%s8330_s23 + $0x8] sm:$0xfe]  ;;  %v4436_v59 = vld [vmem:[%s8330_s23 + $0x38] sm:$0xff] }
 0x206   : > { %3682 = vmatprep.subr.bf16.mxu0 %v7026_v63  ;;  %4294 = vmatprep.subr.bf16.mxu1 %v7029_v0  ;;  %v1073_v63 = vld [vmem:[%s8037_s14 + $0x58] sm:$0xff]  ;;  %v4437_v60 = vld [vmem:[%s8330_s23 + $0x40] sm:$0xff] }
 0x207   : > { %v1077_v0 = vld [vmem:[%s8037_s14 + $0x78] sm:$0xff] }
 0x208   : > { %v5878_v2 = vcombine.high %v1073_v63, %v1077_v0 }
 0x209   : > { %3683 = vmatpush1.bf16.msra.mxu0 %v7024_v3  ;;  %4295 = vmatpush1.bf16.msra.mxu1 %v7027_v4  ;;  %v1081_v3 = vld [vmem:[%s8037_s14 + $0x98] sm:$0xff] }
 0x20a   : > { %3684 = vmatprep.subr.bf16.mxu0 %v7032_v5  ;;  %4296 = vmatprep.subr.bf16.mxu1 %v7035_v6  ;;  %v1085_v4 = vld [vmem:[%s8037_s14 + $0xb8] sm:$0xff]  ;;  %v5877_v5 = vcombine.low %v1073_v63, %v1077_v0  ;;  %v4438_v63 = vld [vmem:[%s8330_s23 + $0x48] sm:$0xff] }
 0x20b   : > { %3594 = vmatmul.mubr.bf16.gmra.mrb[20].mxu0 %v5907_v7  ;;  %4206 = vmatmul.mubr.bf16.gmra.mrb[20].mxu1 %v5907_v7  ;;  %v5886_v6 = vcombine.high %v1081_v3, %v1085_v4  ;;  %v1089_v7 = vld [vmem:[%s8037_s14 + $0xd8] sm:$0xff] }
 0x20c   : > { %3603 = vmatprep.mubr.bf16.mxu0 %v5916_v8  ;;  %4215 = vmatprep.mubr.bf16.mxu1 %v5916_v8  ;;  %v1093_v8 = vld [vmem:[%s8037_s14 + $0xf8] sm:$0xff] }
 0x20d   : > { %3685 = vmatpush1.bf16.msra.mxu0 %v7030_v9  ;;  %4297 = vmatpush1.bf16.msra.mxu1 %v7033_v10  ;;  %v5885_v9 = vcombine.low %v1081_v3, %v1085_v4  ;;  %v5894_v10 = vcombine.high %v1089_v7, %v1093_v8  ;;  %v5893_v13 = vcombine.low %v1089_v7, %v1093_v8  ;;  %v4441_v3 = vld [vmem:[%s8330_s23 + $0x60] sm:$0xff]  ;;  %v4443_v4 = vld [vmem:[%s8330_s23 + $0x70] sm:$0xff]  ;;  %v4640_v8 = vrot.slane %v4436_v59, 1  ;;  %v4460_v59 = vld [vmem:[%s8330_s23 + $0xf8] sm:$0xff] }
 0x20e   : > { %3686 = vmatprep.subr.bf16.mxu0 %v7038_v11  ;;  %4298 = vmatprep.subr.bf16.mxu1 %v7041_v12  ;;  %v1097_v11 = vld [vmem:[%s8037_s14 + $0x118] sm:$0xff] }
 0x20f   : > { %v1101_v12 = vld [vmem:[%s8037_s14 + $0x138] sm:$0xff] }
 0x210   : > { %v5902_v14 = vcombine.high %v1097_v11, %v1101_v12 }
 0x211   : > { %3687 = vmatpush1.bf16.msra.mxu0 %v7036_v15  ;;  %4299 = vmatpush1.bf16.msra.mxu1 %v7039_v16  ;;  %v1105_v15 = vld [vmem:[%s8037_s14 + $0x158] sm:$0xff] }
 0x212   : > { %3688 = vmatprep.subr.bf16.mxu0 %v7044_v17  ;;  %4300 = vmatprep.subr.bf16.mxu1 %v7047_v18  ;;  %v1109_v16 = vld [vmem:[%s8037_s14 + $0x178] sm:$0xff]  ;;  %v5901_v17 = vcombine.low %v1097_v11, %v1101_v12  ;;  %v4642_v11 = vrot.slane %v4437_v60, 1 }
 0x213   : > { %3604 = vmatmul.mubr.bf16.gmra.mrb[24].mxu0 %v5915_v19  ;;  %4216 = vmatmul.mubr.bf16.gmra.mrb[24].mxu1 %v5915_v19  ;;  %v5910_v18 = vcombine.high %v1105_v15, %v1109_v16  ;;  %v1113_v19 = vld [vmem:[%s8037_s14 + $0x198] sm:$0xff] }
 0x214   : > { %3613 = vmatprep.mubr.bf16.mxu0 %v5924_v20  ;;  %4225 = vmatprep.mubr.bf16.mxu1 %v5924_v20  ;;  %v1117_v20 = vld [vmem:[%s8037_s14 + $0x1b8] sm:$0xff] }
 0x215   : > { %3689 = vmatpush1.bf16.msra.mxu0 %v7042_v21  ;;  %4301 = vmatpush1.bf16.msra.mxu1 %v7045_v22  ;;  %v5909_v21 = vcombine.low %v1105_v15, %v1109_v16  ;;  %v5918_v22 = vcombine.high %v1113_v19, %v1117_v20  ;;  %v5917_v25 = vcombine.low %v1113_v19, %v1117_v20  ;;  %v4650_v15 = vrot.slane %v4441_v3, 1  ;;  %v4445_v19 = vld [vmem:[%s8330_s23 + $0x80] sm:$0xff]  ;;  %v4447_v20 = vld [vmem:[%s8330_s23 + $0x90] sm:$0xff] }
 0x216   : > { %3690 = vmatprep.subr.bf16.mxu0 %v7050_v23  ;;  %4302 = vmatprep.subr.bf16.mxu1 %v7053_v24  ;;  %v1121_v23 = vld [vmem:[%s8037_s14 + $0x1d8] sm:$0xff]  ;;  %v4654_v16 = vrot.slane %v4443_v4, 1 }
 0x217   : > { %v1125_v24 = vld [vmem:[%s8037_s14 + $0x1f8] sm:$0xff] }
 0x218   : > { %v5926_v26 = vcombine.high %v1121_v23, %v1125_v24 }
 0x219   : > { %3691 = vmatpush1.bf16.msra.mxu0 %v7048_v27  ;;  %4303 = vmatpush1.bf16.msra.mxu1 %v7051_v28  ;;  %v1129_v27 = vld [vmem:[%s8037_s14 + $0x218] sm:$0xff] }
 0x21a   : > { %3692 = vmatprep.subr.bf16.mxu0 %v7056_v29  ;;  %4304 = vmatprep.subr.bf16.mxu1 %v7059_v30  ;;  %v1133_v28 = vld [vmem:[%s8037_s14 + $0x238] sm:$0xff]  ;;  %v5925_v29 = vcombine.low %v1121_v23, %v1125_v24 }
 0x21b   : > { %3614 = vmatmul.mubr.bf16.gmra.mrb[28].mxu0 %v5923_v31  ;;  %4226 = vmatmul.mubr.bf16.gmra.mrb[28].mxu1 %v5923_v31  ;;  %v5934_v30 = vcombine.high %v1129_v27, %v1133_v28  ;;  %v1137_v31 = vld [vmem:[%s8037_s14 + $0x258] sm:$0xff] }
 0x21c   : > { %3623 = vmatprep.mubr.bf16.mxu0 %v5932_v32  ;;  %4235 = vmatprep.mubr.bf16.mxu1 %v5932_v32  ;;  %v1141_v32 = vld [vmem:[%s8037_s14 + $0x278] sm:$0xff] }
 0x21d   : > { %3693 = vmatpush1.bf16.msra.mxu0 %v7054_v33  ;;  %4305 = vmatpush1.bf16.msra.mxu1 %v7057_v34  ;;  %v5933_v33 = vcombine.low %v1129_v27, %v1133_v28  ;;  %v5942_v34 = vcombine.high %v1137_v31, %v1141_v32  ;;  %v5941_v37 = vcombine.low %v1137_v31, %v1141_v32  ;;  %v4449_v27 = vld [vmem:[%s8330_s23 + $0xa0] sm:$0xff]  ;;  %v4451_v28 = vld [vmem:[%s8330_s23 + $0xb0] sm:$0xff] }
 0x21e   : > { %3694 = vmatprep.subr.bf16.mxu0 %v7062_v35  ;;  %4306 = vmatprep.subr.bf16.mxu1 %v7065_v36  ;;  %v1145_v35 = vld [vmem:[%s8037_s14 + $0x298] sm:$0xff] }
 0x21f   : > { %v1149_v36 = vld [vmem:[%s8037_s14 + $0x2b8] sm:$0xff] }
 0x220   : > { %v5950_v38 = vcombine.high %v1145_v35, %v1149_v36 }
 0x221   : > { %3695 = vmatpush1.bf16.msra.mxu0 %v7060_v39  ;;  %4307 = vmatpush1.bf16.msra.mxu1 %v7063_v41  ;;  %v1153_v39 = vld [vmem:[%s8037_s14 + $0x2d8] sm:$0xff]  ;;  %v5949_v41 = vcombine.low %v1145_v35, %v1149_v36  ;;  %v4453_v35 = vld [vmem:[%s8330_s23 + $0xc0] sm:$0xff]  ;;  %v8437_v36 = vsel %vm4629_vm1, %v4642_v11, %v4650_v15  ;;  %s6609_s14 = smul.u32 (%p7236_p9), 200, %s7120_s22 }
 0x222   : > { %v5957_v51 = vcombine.low %v1153_v39, %v1157_v40  ;;  %v4674_v60 = vrot.slane %v4453_v35, 1 }
 0x223   : > { %3624 = vmatmul.mubr.bf16.gmra.mrb[32].mxu0 %v5931_v43  ;;  %4236 = vmatmul.mubr.bf16.gmra.mrb[32].mxu1 %v5931_v43  ;;  %v5958_v43 = vcombine.high %v1153_v39, %v1157_v40  ;;  %v4662_v39 = vrot.slane %v4447_v20, 1  ;;  %v4455_v40 = vld [vmem:[%s8330_s23 + $0xd0] sm:$0xff]  ;;  %s5512_s11 = sadd.s32 (%p7236_p9), %s6609_s14, %s8320_s16 }
 0x224   : > { %3633 = vmatprep.mubr.bf16.mxu0 %v5940_v45  ;;  %4245 = vmatprep.mubr.bf16.mxu1 %v5940_v45  ;;  %v1431_v45 = vsub.s32 1, %v8326_v42  ;;  %v4435_v42 = vld [vmem:[%s8330_s23 + $0x30] sm:$0xff]  ;;  %s6216_s15 = sshll.u32 (%p7236_p9), %s5512_s11, 3 }
 0x225   : > { %s9198_s22 = scalar_lea.vmem (%p7236_p9), %s9420_s5, %s6216_s15 }
 0x226   : > { %v8382_v49 = vrot.slane %v8339_v48, %v1431_v45  ;;  %v4440_v48 = vld [vmem:[%s8330_s23 + $0x58] sm:$0xff] }
 0x22b   : > { %3634 = vmatmul.mubr.bf16.gmra.mrb[36].mxu0 %v5939_v53  ;;  %4246 = vmatmul.mubr.bf16.gmra.mrb[36].mxu1 %v5939_v53  ;;  %v4429_v53 = vld [vmem:[%s8330_s23] sm:$0xfe] }
 0x22c   : > { %3643 = vmatprep.mubr.bf16.mxu0 %v5948_v54  ;;  %4255 = vmatprep.mubr.bf16.mxu1 %v5948_v54  ;;  %v4433_v54 = vld [vmem:[%s8330_s23 + $0x20] sm:$0xff] }
 0x22d   : > { %v4631_v0 = vrot.slane %v4433_v54, 1  ;;  %v4459_v54 = vld [vmem:[%s8330_s23 + $0xf0] sm:$0xff] }
 0x233   : > { %3644 = vmatmul.mubr.bf16.gmra.mrb[40].mxu0 %v5947_v57  ;;  %4256 = vmatmul.mubr.bf16.gmra.mrb[40].mxu1 %v5947_v57  ;;  %v4434_v57 = vld [vmem:[%s8330_s23 + $0x28] sm:$0xff] }
 0x234   : > { %3653 = vmatprep.mubr.bf16.mxu0 %v5956_v58  ;;  %4265 = vmatprep.mubr.bf16.mxu1 %v5956_v58  ;;  %v4432_v58 = vld [vmem:[%s8330_s23 + $0x18] sm:$0xfe] }
 0x235   : > { %v4639_v7 = vrot.slane %v4432_v58, 1  ;;  %v4458_v58 = vld [vmem:[%s8330_s23 + $0xe8] sm:$0xff] }
 0x23b   : > { %3654 = vmatmul.mubr.bf16.gmra.mrb[44].mxu0 %v5955_v61  ;;  %4266 = vmatmul.mubr.bf16.gmra.mrb[44].mxu1 %v5955_v61  ;;  %v4630_v61 = vrot.slane %v4429_v53, 1  ;;  %v4457_v53 = vld [vmem:[%s8330_s23 + $0xe0] sm:$0xff] }
 0x23c   : > { %3696 = vmatprep.mubr.bf16.mxu0 %v5870_v62  ;;  %4308 = vmatprep.mubr.bf16.mxu1 %v5870_v62  ;;  %v4439_v62 = vld [vmem:[%s8330_s23 + $0x50] sm:$0xff] }
 0x23d   : > { %v4646_v12 = vrot.slane %v4439_v62, 1 }
 0x243   : > { %3697 = vmatmul.mubr.bf16.vlgmr.msra.gmra.mrb[0].mxu0 %v5869_v1  ;;  %4309 = vmatmul.mubr.bf16.vlgmr.msra.gmra.mrb[0].mxu1 %v5869_v1  ;;  %v4636_v1 = vrot.slane %v4431_v55, 1  ;;  %v4666_v55 = vrot.slane %v4449_v27, 1  ;;  %v4469_v27 = vld [vmem:[%s8330_s23 + $0x140] sm:$0xff] }
 0x244   : > { %3706 = vmatprep.mubr.bf16.mxu0 %v5878_v2  ;;  %4318 = vmatprep.mubr.bf16.mxu1 %v5878_v2  ;;  %v4637_v2 = vrot.slane %v4435_v42, 1  ;;  %v4670_v42 = vrot.slane %v4451_v28, 1 }
 0x246   : > { %v8410_v23 = vsel %vm4629_vm1, %v4636_v1, %v4637_v2  ;;  %v4682_v1 = vrot.slane %v4457_v53, 1  ;;  %v4473_v53 = vld [vmem:[%s8330_s23 + $0x160] sm:$0xff] }
 0x248   : > { %v8501_v28 = vsel %vm4629_vm1, %v4674_v60, %v4682_v1 }
 0x24b   : > { %3707 = vmatmul.mubr.bf16.gmra.mrb[4].mxu0 %v5877_v5  ;;  %4319 = vmatmul.mubr.bf16.gmra.mrb[4].mxu1 %v5877_v5  ;;  %v4633_v5 = vrot.slane %v4430_v56, 1 }
 0x24c   : > { %3716 = vmatprep.mubr.bf16.mxu0 %v5886_v6  ;;  %4328 = vmatprep.mubr.bf16.mxu1 %v5886_v6  ;;  %v4634_v6 = vrot.slane %v4434_v57, 1 }
 0x24e   : > { %v8413_v24 = vsel %vm4629_vm1, %v4633_v5, %v4634_v6  ;;  %v4684_v5 = vrot.slane %v4458_v58, 1  ;;  %v4474_v58 = vld [vmem:[%s8330_s23 + $0x168] sm:$0xff] }
 0x253   : > { %3717 = vmatmul.mubr.bf16.gmra.mrb[8].mxu0 %v5885_v9  ;;  %4329 = vmatmul.mubr.bf16.gmra.mrb[8].mxu1 %v5885_v9  ;;  %v4442_v9 = vld [vmem:[%s8330_s23 + $0x68] sm:$0xff] }
 0x254   : > { %3726 = vmatprep.mubr.bf16.mxu0 %v5894_v10  ;;  %4338 = vmatprep.mubr.bf16.mxu1 %v5894_v10  ;;  %v4444_v10 = vld [vmem:[%s8330_s23 + $0x78] sm:$0xff] }
 0x25b   : > { %3727 = vmatmul.mubr.bf16.gmra.mrb[12].mxu0 %v5893_v13  ;;  %4339 = vmatmul.mubr.bf16.gmra.mrb[12].mxu1 %v5893_v13  ;;  %v4644_v13 = vrot.slane %v4438_v63, 1 }
 0x25c   : > { %3736 = vmatprep.mubr.bf16.mxu0 %v5902_v14  ;;  %4348 = vmatprep.mubr.bf16.mxu1 %v5902_v14  ;;  %v4648_v14 = vrot.slane %v4440_v48, 1 }
 0x25d   : > { %v8428_v31 = vsel %vm4629_vm1, %v4634_v6, %v4644_v13  ;;  %v4688_v6 = vrot.slane %v4460_v59, 1  ;;  %v4476_v59 = vld [vmem:[%s8330_s23 + $0x178] sm:$0xff] }
 0x25e   : > { %v8431_v32 = vsel %vm4629_vm1, %v4640_v8, %v4648_v14 }
 0x263   : > { %3737 = vmatmul.mubr.bf16.gmra.mrb[16].mxu0 %v5901_v17  ;;  %4349 = vmatmul.mubr.bf16.gmra.mrb[16].mxu1 %v5901_v17  ;;  %v4652_v17 = vrot.slane %v4442_v9, 1  ;;  %v4462_v9 = vld [vmem:[%s8330_s23 + $0x108] sm:$0xff] }
 0x264   : > { %3746 = vmatprep.mubr.bf16.mxu0 %v5910_v18  ;;  %4358 = vmatprep.mubr.bf16.mxu1 %v5910_v18  ;;  %v4656_v18 = vrot.slane %v4444_v10, 1 }
 0x265   : > { %v8446_v44 = vsel %vm4629_vm1, %v4644_v13, %v4652_v17 }
 0x266   : > { %v8449_v45 = vsel %vm4629_vm1, %v4648_v14, %v4656_v18  ;;  %v4464_v14 = vld [vmem:[%s8330_s23 + $0x118] sm:$0xff] }
 0x26b   : > { %3747 = vmatmul.mubr.bf16.gmra.mrb[20].mxu0 %v5909_v21  ;;  %4359 = vmatmul.mubr.bf16.gmra.mrb[20].mxu1 %v5909_v21  ;;  %v4446_v21 = vld [vmem:[%s8330_s23 + $0x88] sm:$0xff] }
 0x26c   : > { %3756 = vmatprep.mubr.bf16.mxu0 %v5918_v22  ;;  %4368 = vmatprep.mubr.bf16.mxu1 %v5918_v22  ;;  %v8407_v22 = vsel %vm4629_vm1, %v4630_v61, %v4631_v0  ;;  %v4660_v46 = vrot.slane %v4446_v21, 1  ;;  %v4678_v61 = vrot.slane %v4455_v40, 1  ;;  %v4466_v21 = vld [vmem:[%s8330_s23 + $0x128] sm:$0xff]  ;;  %v4472_v40 = vld [vmem:[%s8330_s23 + $0x158] sm:$0xff] }
 0x26e   : > { %v8462_v3 = vsel %vm4629_vm1, %v4652_v17, %v4660_v46  ;;  %v8486_v17 = vsel %vm4629_vm1, %v4666_v55, %v4674_v60  ;;  %v4706_v60 = vrot.slane %v4469_v27, 1  ;;  %v4477_v27 = vld [vmem:[%s8330_s23 + $0x180] sm:$0xff] }
 0x273   : > { %3757 = vmatmul.mubr.bf16.gmra.mrb[24].mxu0 %v5917_v25  ;;  %4369 = vmatmul.mubr.bf16.gmra.mrb[24].mxu1 %v5917_v25  ;;  %v8416_v25 = vsel %vm4629_vm1, %v4639_v7, %v4640_v8  ;;  %v4461_v7 = vld [vmem:[%s8330_s23 + $0x100] sm:$0xff]  ;;  %v4463_v8 = vld [vmem:[%s8330_s23 + $0x110] sm:$0xff] }
 0x274   : > { %3766 = vmatprep.mubr.bf16.mxu0 %v5926_v26  ;;  %4378 = vmatprep.mubr.bf16.mxu1 %v5926_v26  ;;  %v4448_v26 = vld [vmem:[%s8330_s23 + $0x98] sm:$0xff]  ;;  %v4694_v35 = vrot.slane %v4463_v8, 1 }
 0x27b   : > { %3767 = vmatmul.mubr.bf16.gmra.mrb[28].mxu0 %v5925_v29  ;;  %4379 = vmatmul.mubr.bf16.gmra.mrb[28].mxu1 %v5925_v29  ;;  %v8422_v29 = vsel %vm4629_vm1, %v4631_v0, %v4642_v11  ;;  %v8459_v0 = vsel %vm4629_vm1, %v4654_v16, %v4662_v39  ;;  %v8474_v11 = vsel %vm4629_vm1, %v4662_v39, %v4670_v42  ;;  %v4470_v39 = vld [vmem:[%s8330_s23 + $0x148] sm:$0xff] }
 0x27c   : > { %3776 = vmatprep.mubr.bf16.mxu0 %v5934_v30  ;;  %4388 = vmatprep.mubr.bf16.mxu1 %v5934_v30  ;;  %v8425_v30 = vsel %vm4629_vm1, %v4637_v2, %v4646_v12  ;;  %v4686_v2 = vrot.slane %v4459_v54, 1  ;;  %v4475_v54 = vld [vmem:[%s8330_s23 + $0x170] sm:$0xff] }
 0x27e   : > { %v8523_v8 = vsel %vm4629_vm1, %v4686_v2, %v4694_v35 }
 0x27f   : > { %9424 = vst [vmem:[#allocation6_spill] sm:$0xff] %v8523_v8 }
 0x283   : > { %3777 = vmatmul.mubr.bf16.gmra.mrb[32].mxu0 %v5933_v33  ;;  %4389 = vmatmul.mubr.bf16.gmra.mrb[32].mxu1 %v5933_v33  ;;  %v4450_v33 = vld [vmem:[%s8330_s23 + $0xa8] sm:$0xff] }
 0x284   : > { %3786 = vmatprep.mubr.bf16.mxu0 %v5942_v34  ;;  %4398 = vmatprep.mubr.bf16.mxu1 %v5942_v34  ;;  %v4452_v34 = vld [vmem:[%s8330_s23 + $0xb8] sm:$0xff]  ;;  %v4668_v56 = vrot.slane %v4450_v33, 1  ;;  %v8504_v33 = vsel %vm4629_vm1, %v4678_v61, %v4686_v2 }
 0x285   : > { %v4672_v57 = vrot.slane %v4452_v34, 1  ;;  %v4690_v34 = vrot.slane %v4461_v7, 1  ;;  %v4712_v7 = vrot.slane %v4472_v40, 1  ;;  %v4480_v40 = vld [vmem:[%s8330_s23 + $0x198] sm:$0xff] }
 0x28b   : > { %3787 = vmatmul.mubr.bf16.gmra.mrb[36].mxu0 %v5941_v37  ;;  %4399 = vmatmul.mubr.bf16.gmra.mrb[36].mxu1 %v5941_v37  ;;  %v8440_v37 = vsel %vm4629_vm1, %v4646_v12, %v4654_v16  ;;  %v8477_v12 = vsel %vm4629_vm1, %v4660_v46, %v4668_v56  ;;  %v4467_v16 = vld [vmem:[%s8330_s23 + $0x130] sm:$0xff]  ;;  %v4692_v46 = vrot.slane %v4462_v9, 1  ;;  %v4714_v9 = vrot.slane %v4473_v53, 1  ;;  %v4481_v53 = vld [vmem:[%s8330_s23 + $0x1a0] sm:$0xff] }
 0x28c   : > { %3796 = vmatprep.mubr.bf16.mxu0 %v5950_v38  ;;  %4408 = vmatprep.mubr.bf16.mxu1 %v5950_v38  ;;  %v4658_v38 = vrot.slane %v4445_v19, 1 }
 0x28e   : > { %v8456_v48 = vsel %vm4629_vm1, %v4650_v15, %v4658_v38  ;;  %v8471_v10 = vsel %vm4629_vm1, %v4658_v38, %v4666_v55  ;;  %v4465_v15 = vld [vmem:[%s8330_s23 + $0x120] sm:$0xff]  ;;  %v4471_v38 = vld [vmem:[%s8330_s23 + $0x150] sm:$0xff] }
 0x28f   : > { %v4698_v55 = vrot.slane %v4465_v15, 1  ;;  %v8526_v15 = vsel %vm4629_vm1, %v4684_v5, %v4692_v46 }
 0x290   : > { %9425 = vst [vmem:[#allocation7_spill] sm:$0xff] %v8526_v15  ;;  %v4492_v15 = vld [vmem:[%s8330_s23 + $0x1f8] sm:$0xff] }
 0x291   : > { %v8535_v2 = vsel %vm4629_vm1, %v4690_v34, %v4698_v55 }
 0x292   : > { %9427 = vst [vmem:[#allocation9_spill] sm:$0xff] %v8535_v2  ;;  %v4728_v2 = vrot.slane %v4480_v40, 1 }
 0x293   : > { %3797 = vmatmul.mubr.bf16.gmra.mrb[40].mxu0 %v5949_v41  ;;  %4409 = vmatmul.mubr.bf16.gmra.mrb[40].mxu1 %v5949_v41  ;;  %v4454_v41 = vld [vmem:[%s8330_s23 + $0xc8] sm:$0xff] }
 0x294   : > { %3806 = vmatprep.mubr.bf16.mxu0 %v5958_v43  ;;  %4418 = vmatprep.mubr.bf16.mxu1 %v5958_v43  ;;  %v4456_v43 = vld [vmem:[%s8330_s23 + $0xd8] sm:$0xff]  ;;  %v4676_v62 = vrot.slane %v4454_v41, 1 }
 0x295   : > { %v4680_v63 = vrot.slane %v4456_v43, 1 }
 0x296   : > { %v8492_v19 = vsel %vm4629_vm1, %v4668_v56, %v4676_v62  ;;  %v8510_v41 = vsel %vm4629_vm1, %v4676_v62, %v4684_v5  ;;  %v4700_v56 = vrot.slane %v4466_v21, 1  ;;  %v4708_v62 = vrot.slane %v4470_v39, 1 }
 0x297   : > { %v8495_v20 = vsel %vm4629_vm1, %v4672_v57, %v4680_v63  ;;  %v8513_v43 = vsel %vm4629_vm1, %v4680_v63, %v4688_v6  ;;  %v8520_v63 = vsel %vm4629_vm1, %v4682_v1, %v4690_v34  ;;  %v4716_v21 = vrot.slane %v4474_v58, 1  ;;  %v4479_v1 = vld [vmem:[%s8330_s23 + $0x190] sm:$0xff] }
 0x298   : > { %9423 = vst [vmem:[#allocation5_spill] sm:$0xff] %v8520_v63  ;;  %v8541_v5 = vsel %vm4629_vm1, %v4692_v46, %v4700_v56  ;;  %v8550_v58 = vsel %vm4629_vm1, %v4698_v55, %v4706_v60 }
 0x299   : > { %9429 = vst [vmem:[#allocation11_spill] sm:$0xff] %v8541_v5  ;;  %9431 = vst [vmem:[#allocation13_spill] sm:$0xff] %v8550_v58  ;;  %v8565_v5 = vsel %vm4629_vm1, %v4706_v60, %v4714_v9  ;;  %v4488_v58 = vld [vmem:[%s8330_s23 + $0x1d8] sm:$0xff]  ;;  %v4489_v60 = vld [vmem:[%s8330_s23 + $0x1e0] sm:$0xff] }
 0x29a   : > { %9435 = vst [vmem:[#allocation17_spill] sm:$0xff] %v8565_v5  ;;  %v4491_v5 = vld [vmem:[%s8330_s23 + $0x1f0] sm:$0xff]  ;;  %v4746_v40 = vrot.slane %v4489_v60, 1 }
 0x29b   : > { %3807 = vmatmul.mubr.bf16.gmra.mrb[44].mxu0 %v5957_v51  ;;  %4419 = vmatmul.mubr.bf16.gmra.mrb[44].mxu1 %v5957_v51  ;;  %v4664_v51 = vrot.slane %v4448_v26, 1  ;;  %v4468_v26 = vld [vmem:[%s8330_s23 + $0x138] sm:$0xff]  ;;  %v4499_v60 = vld [vmem:[%s8330_s23 + $0x230] sm:$0xff] }
 0x29d   : > { %v8465_v4 = vsel %vm4629_vm1, %v4656_v18, %v4664_v51  ;;  %v8480_v13 = vsel %vm4629_vm1, %v4664_v51, %v4672_v57  ;;  %v8489_v18 = vsel %vm4629_vm1, %v4670_v42, %v4678_v61  ;;  %v4696_v51 = vrot.slane %v4464_v14, 1 }
 0x29e   : > { %v4702_v42 = vrot.slane %v4467_v16, 1  ;;  %v4704_v57 = vrot.slane %v4468_v26, 1  ;;  %v4710_v61 = vrot.slane %v4471_v38, 1  ;;  %v4718_v14 = vrot.slane %v4475_v54, 1  ;;  %v4478_v38 = vld [vmem:[%s8330_s23 + $0x188] sm:$0xff]  ;;  %v4483_v54 = vld [vmem:[%s8330_s23 + $0x1b0] sm:$0xff] }
 0x29f   : > { %v8529_v16 = vsel %vm4629_vm1, %v4688_v6, %v4696_v51  ;;  %v4720_v26 = vrot.slane %v4476_v59, 1  ;;  %v4484_v59 = vld [vmem:[%s8330_s23 + $0x1b8] sm:$0xff] }
 0x2a0   : > { %9426 = vst [vmem:[#allocation8_spill] sm:$0xff] %v8529_v16  ;;  %v8538_v39 = vsel %vm4629_vm1, %v4694_v35, %v4702_v42  ;;  %v8544_v6 = vsel %vm4629_vm1, %v4696_v51, %v4704_v57  ;;  %v8553_v34 = vsel %vm4629_vm1, %v4702_v42, %v4710_v61  ;;  %v8556_v35 = vsel %vm4629_vm1, %v4700_v56, %v4708_v62  ;;  %v4482_v51 = vld [vmem:[%s8330_s23 + $0x1a8] sm:$0xff]  ;;  %v4487_v56 = vld [vmem:[%s8330_s23 + $0x1d0] sm:$0xff] }
 0x2a1   : > { %9428 = vst [vmem:[#allocation10_spill] sm:$0xff] %v8538_v39  ;;  %9430 = vst [vmem:[#allocation12_spill] sm:$0xff] %v8544_v6  ;;  %v8559_v46 = vsel %vm4629_vm1, %v4704_v57, %v4712_v7  ;;  %v4485_v6 = vld [vmem:[%s8330_s23 + $0x1c0] sm:$0xff]  ;;  %v8568_v55 = vsel %vm4629_vm1, %v4710_v61, %v4718_v14  ;;  %v4722_v42 = vrot.slane %v4477_v27, 1  ;;  %v8574_v57 = vsel %vm4629_vm1, %v4708_v62, %v4716_v21 }
 0x2a2   : > { %9432 = vst [vmem:[#allocation14_spill] sm:$0xff] %v8553_v34  ;;  %9433 = vst [vmem:[#allocation15_spill] sm:$0xff] %v8556_v35  ;;  %v4726_v34 = vrot.slane %v4479_v1, 1  ;;  %v4486_v35 = vld [vmem:[%s8330_s23 + $0x1c8] sm:$0xff]  ;;  %v4724_v39 = vrot.slane %v4478_v38, 1  ;;  %v4730_v16 = vrot.slane %v4481_v53, 1 }
 0x2a3   : > { %9434 = vst [vmem:[#allocation16_spill] sm:$0xff] %v8559_v46  ;;  %9436 = vst [vmem:[#allocation18_spill] sm:$0xff] %v8568_v55  ;;  %v8577_v46 = vsel %vm4629_vm1, %v4712_v7, %v4720_v26  ;;  %v4734_v61 = vrot.slane %v4483_v54, 1  ;;  %v4732_v55 = vrot.slane %v4482_v51, 1  ;;  %v4736_v27 = vrot.slane %v4484_v59, 1  ;;  %v4490_v1 = vld [vmem:[%s8330_s23 + $0x1e8] sm:$0xff] }
 0x2a4   : > { %9437 = vst [vmem:[#allocation19_spill] sm:$0xff] %v8574_v57  ;;  %9438 = vst [vmem:[#allocation20_spill] sm:$0xff] %v8577_v46  ;;  %v4738_v8 = vrot.slane %v4485_v6, 1  ;;  %v4742_v63 = vrot.slane %v4487_v56, 1  ;;  %v4740_v62 = vrot.slane %v4486_v35, 1  ;;  %v4744_v57 = vrot.slane %v4488_v58, 1 }
 0x2a5   : > { %v8584_v7 = vsel %vm4629_vm1, %v4714_v9, %v4722_v42  ;;  %v8587_v38 = vsel %vm4629_vm1, %v4718_v14, %v4726_v34  ;;  %v4750_v53 = vrot.slane %v4491_v5, 1  ;;  %v8590_v54 = vsel %vm4629_vm1, %v4716_v21, %v4724_v39  ;;  %v4493_v35 = vld [vmem:[%s8330_s23 + $0x200] sm:$0xff]  ;;  %v4495_v9 = vld [vmem:[%s8330_s23 + $0x210] sm:$0xff]  ;;  %v4494_v59 = vld [vmem:[%s8330_s23 + $0x208] sm:$0xff] }
 0x2a6   : > { %9439 = vst [vmem:[#allocation21_spill] sm:$0xff] %v8584_v7  ;;  %9440 = vst [vmem:[#allocation22_spill] sm:$0xff] %v8587_v38  ;;  %v8593_v51 = vsel %vm4629_vm1, %v4720_v26, %v4728_v2  ;;  %v4748_v6 = vrot.slane %v4490_v1, 1  ;;  %v4752_v58 = vrot.slane %v4492_v15, 1  ;;  %v8599_v14 = vsel %vm4629_vm1, %v4722_v42, %v4730_v16  ;;  %v4496_v15 = vld [vmem:[%s8330_s23 + $0x218] sm:$0xff]  ;;  %v4497_v5 = vld [vmem:[%s8330_s23 + $0x220] sm:$0xff] }
 0x2a7   : > { %9441 = vst [vmem:[#allocation23_spill] sm:$0xff] %v8590_v54  ;;  %9442 = vst [vmem:[#allocation24_spill] sm:$0xff] %v8593_v51  ;;  %v8602_v56 = vsel %vm4629_vm1, %v4726_v34, %v4734_v61  ;;  %v8605_v21 = vsel %vm4629_vm1, %v4724_v39, %v4732_v55  ;;  %v8608_v26 = vsel %vm4629_vm1, %v4728_v2, %v4736_v27  ;;  %v4498_v2 = vld [vmem:[%s8330_s23 + $0x228] sm:$0xff]  ;;  %v4760_v51 = vrot.slane %v4496_v15, 1  ;;  %v4508_v38 = vld [vmem:[%s8330_s23 + $0x278] sm:$0xff] }
 0x2a8   : > { %9443 = vst [vmem:[#allocation25_spill] sm:$0xff] %v8599_v14  ;;  %9444 = vst [vmem:[#allocation26_spill] sm:$0xff] %v8602_v56  ;;  %v8614_v1 = vsel %vm4629_vm1, %v4730_v16, %v4738_v8  ;;  %v8617_v42 = vsel %vm4629_vm1, %v4734_v61, %v4742_v63  ;;  %v8620_v34 = vsel %vm4629_vm1, %v4732_v55, %v4740_v62  ;;  %v4754_v61 = vrot.slane %v4493_v35, 1  ;;  %v4503_v55 = vld [vmem:[%s8330_s23 + $0x250] sm:$0xff] }
 0x2a9   : > { %9445 = vst [vmem:[#allocation27_spill] sm:$0xff] %v8605_v21  ;;  %9446 = vst [vmem:[#allocation28_spill] sm:$0xff] %v8608_v26  ;;  %v8623_v39 = vsel %vm4629_vm1, %v4736_v27, %v4744_v57  ;;  %v4500_v26 = vld [vmem:[%s8330_s23 + $0x238] sm:$0xff]  ;;  %v4501_v21 = vld [vmem:[%s8330_s23 + $0x240] sm:$0xff]  ;;  %v8629_v56 = vsel %vm4629_vm1, %v4738_v8, %v4746_v40  ;;  %v8632_v16 = vsel %vm4629_vm1, %v4742_v63, %v4750_v53  ;;  %v4756_v14 = vrot.slane %v4494_v59, 1 }
 0x2aa   : > { %9447 = vst [vmem:[#allocation29_spill] sm:$0xff] %v8614_v1  ;;  %9448 = vst [vmem:[#allocation30_spill] sm:$0xff] %v8617_v42  ;;  %v4758_v42 = vrot.slane %v4495_v9, 1  ;;  %v4504_v1 = vld [vmem:[%s8330_s23 + $0x258] sm:$0xff]  ;;  %v8638_v27 = vsel %vm4629_vm1, %v4740_v62, %v4748_v6  ;;  %v4505_v8 = vld [vmem:[%s8330_s23 + $0x260] sm:$0xff]  ;;  %v4762_v54 = vrot.slane %v4497_v5, 1 }
 0x2ab   : > { %9449 = vst [vmem:[#allocation31_spill] sm:$0xff] %v8620_v34  ;;  %9450 = vst [vmem:[#allocation32_spill] sm:$0xff] %v8623_v39  ;;  %v4502_v34 = vld [vmem:[%s8330_s23 + $0x248] sm:$0xff]  ;;  %v8641_v39 = vsel %vm4629_vm1, %v4744_v57, %v4752_v58  ;;  %v4766_v63 = vrot.slane %v4499_v60, 1  ;;  %v4768_v35 = vrot.slane %v4500_v26, 1  ;;  %v4770_v7 = vrot.slane %v4501_v21, 1 }
 0x2ac   : > { %9451 = vst [vmem:[#allocation33_spill] sm:$0xff] %v8629_v56  ;;  %9452 = vst [vmem:[#allocation34_spill] sm:$0xff] %v8632_v16  ;;  %v4507_v56 = vld [vmem:[%s8330_s23 + $0x270] sm:$0xff]  ;;  %v4764_v16 = vrot.slane %v4498_v2, 1  ;;  %v4506_v9 = vld [vmem:[%s8330_s23 + $0x268] sm:$0xff]  ;;  %v4774_v46 = vrot.slane %v4503_v55, 1  ;;  %v8648_v57 = vsel %vm4629_vm1, %v4746_v40, %v4754_v61  ;;  %v8651_v59 = vsel %vm4629_vm1, %v4750_v53, %v4758_v42 }
 0x2ad   : > { %9453 = vst [vmem:[#allocation35_spill] sm:$0xff] %v8638_v27  ;;  %v4772_v62 = vrot.slane %v4502_v34, 1  ;;  %v4776_v27 = vrot.slane %v4504_v1, 1  ;;  %9454 = vst [vmem:[#allocation36_spill] sm:$0xff] %v8651_v59  ;;  %v4778_v15 = vrot.slane %v4505_v8, 1  ;;  %v4782_v5 = vrot.slane %v4507_v56, 1 }
 0x2ae   : > { %v8654_v26 = vsel %vm4629_vm1, %v4748_v6, %v4756_v14  ;;  %v8657_v60 = vsel %vm4629_vm1, %v4752_v58, %v4760_v51  ;;  %v4780_v21 = vrot.slane %v4506_v9, 1  ;;  %v4784_v1 = vrot.slane %v4508_v38, 1  ;;  %v4509_v34 = vld [vmem:[%s8330_s23 + $0x280] sm:$0xff]  ;;  %v4511_v40 = vld [vmem:[%s8330_s23 + $0x290] sm:$0xff]  ;;  %v4510_v2 = vld [vmem:[%s8330_s23 + $0x288] sm:$0xff] }
 0x2af   : > { %9455 = vst [vmem:[#allocation37_spill] sm:$0xff] %v8654_v26  ;;  %9456 = vst [vmem:[#allocation38_spill] sm:$0xff] %v8657_v60  ;;  %v8663_v53 = vsel %vm4629_vm1, %v4754_v61, %v4762_v54  ;;  %v8666_v55 = vsel %vm4629_vm1, %v4758_v42, %v4766_v63  ;;  %v8669_v6 = vsel %vm4629_vm1, %v4756_v14, %v4764_v16  ;;  %v4512_v38 = vld [vmem:[%s8330_s23 + $0x298] sm:$0xff]  ;;  %v4513_v56 = vld [vmem:[%s8330_s23 + $0x2a0] sm:$0xff] }
 0x2b0   : > { %9457 = vst [vmem:[#allocation39_spill] sm:$0xff] %v8663_v53  ;;  %9458 = vst [vmem:[#allocation40_spill] sm:$0xff] %v8666_v55  ;;  %v8672_v58 = vsel %vm4629_vm1, %v4760_v51, %v4768_v35  ;;  %v4515_v8 = vld [vmem:[%s8330_s23 + $0x2b0] sm:$0xff]  ;;  %v8678_v9 = vsel %vm4629_vm1, %v4762_v54, %v4770_v7  ;;  %v8681_v61 = vsel %vm4629_vm1, %v4766_v63, %v4774_v46  ;;  %v4514_v51 = vld [vmem:[%s8330_s23 + $0x2a8] sm:$0xff]  ;;  %v4786_v63 = vrot.slane %v4509_v34, 1 }
 0x2b1   : > { %9459 = vst [vmem:[#allocation41_spill] sm:$0xff] %v8669_v6  ;;  %9460 = vst [vmem:[#allocation42_spill] sm:$0xff] %v8672_v58  ;;  %v8684_v42 = vsel %vm4629_vm1, %v4764_v16, %v4772_v62  ;;  %v8687_v14 = vsel %vm4629_vm1, %v4768_v35, %v4776_v27  ;;  %v4516_v58 = vld [vmem:[%s8330_s23 + $0x2b8] sm:$0xff]  ;;  %v4517_v6 = vld [vmem:[%s8330_s23 + $0x2c0] sm:$0xff]  ;;  %v8693_v55 = vsel %vm4629_vm1, %v4770_v7, %v4778_v15  ;;  %v4788_v53 = vrot.slane %v4510_v2, 1 }
 0x2b2   : > { %9461 = vst [vmem:[#allocation43_spill] sm:$0xff] %v8678_v9  ;;  %9462 = vst [vmem:[#allocation44_spill] sm:$0xff] %v8681_v61  ;;  %v8696_v54 = vsel %vm4629_vm1, %v4774_v46, %v4782_v5  ;;  %v4790_v61 = vrot.slane %v4511_v40, 1  ;;  %v4519_v16 = vld [vmem:[%s8330_s23 + $0x2d0] sm:$0xff]  ;;  %v4520_v9 = vld [vmem:[%s8330_s23 + $0x2d8] sm:$0xff]  ;;  %v8702_v35 = vsel %vm4629_vm1, %v4772_v62, %v4780_v21  ;;  %v4792_v60 = vrot.slane %v4512_v38, 1 }
 0x2b3   : > { %9463 = vst [vmem:[#allocation45_spill] sm:$0xff] %v8684_v42  ;;  %9464 = vst [vmem:[#allocation46_spill] sm:$0xff] %v8687_v14  ;;  %v4518_v42 = vld [vmem:[%s8330_s23 + $0x2c8] sm:$0xff]  ;;  %v8705_v14 = vsel %vm4629_vm1, %v4776_v27, %v4784_v1  ;;  %v8708_v7 = vld [vmem:[%s8330_s23 + $0x2e0] sm:$0xff]  ;;  %v4794_v46 = vrot.slane %v4513_v56, 1  ;;  %v4796_v34 = vrot.slane %v4514_v51, 1  ;;  %v8720_v2 = vsel %vm4629_vm1, %v4778_v15, %v4786_v63 }
 0x2b4   : > { %9465 = vst [vmem:[#allocation47_spill] sm:$0xff] %v8693_v55  ;;  %9466 = vst [vmem:[#allocation48_spill] sm:$0xff] %v8696_v54  ;;  %v8711_v55 = vld [vmem:[%s8330_s23 + $0x2f0] sm:$0xff]  ;;  %v4798_v54 = vrot.slane %v4515_v8, 1  ;;  %v4800_v40 = vrot.slane %v4516_v58, 1  ;;  %v8714_v26 = vld [vmem:[%s8330_s23 + $0x2e8] sm:$0xff]  ;;  %v8723_v38 = vsel %vm4629_vm1, %v4782_v5, %v4790_v61  ;;  %v8728_v58 = vsel %vm4629_vm1, %v4780_v21, %v4788_v53 }
 0x2b5   : > { %9467 = vst [vmem:[#allocation49_spill] sm:$0xff] %v8702_v35  ;;  %9468 = vst [vmem:[#allocation50_spill] sm:$0xff] %v8705_v14  ;;  %v8717_v59 = vld [vmem:[%s8330_s23 + $0x2f8] sm:$0xff]  ;;  %v4802_v62 = vrot.slane %v4517_v6, 1  ;;  %v4806_v35 = vrot.slane %v4519_v16, 1  ;;  %v4804_v27 = vrot.slane %v4518_v42, 1  ;;  %v8731_v6 = vsel %vm4629_vm1, %v4784_v1, %v4792_v60 }
 0x2b6   : > { %v4808_v14 = vrot.slane %v4520_v9, 1  ;;  %v4810_v56 = vrot.slane %v8708_v7, 1  ;;  %v4814_v8 = vrot.slane %v8711_v55, 1  ;;  %v4525_v42 = vld [vmem:[%s8330_s23 + $0x300] sm:$0x1]  ;;  %v8738_v5 = vsel %vm4629_vm1, %v4786_v63, %v4794_v46 }
 0x2b7   : > { %v4527_v51 = vld [vmem:[%s8330_s23 + $0x310] sm:$0x1]  ;;  %9469 = vst [vmem:[#allocation51_spill] sm:$0xff] %v8738_v5  ;;  %v8741_v55 = vsel %vm4629_vm1, %v4790_v61, %v4798_v54  ;;  %v8744_v21 = vsel %vm4629_vm1, %v4788_v53, %v4796_v34  ;;  %v8747_v16 = vsel %vm4629_vm1, %v4792_v60, %v4800_v40  ;;  %v8750_v1 = vsel %vm4629_vm1, %v4794_v46, %v4802_v62  ;;  %v4526_v61 = vld [vmem:[%s8330_s23 + $0x308] sm:$0x1] }
 0x2b8   : > { %9470 = vst [vmem:[#allocation52_spill] sm:$0xff] %v8741_v55  ;;  %9471 = vst [vmem:[#allocation53_spill] sm:$0xff] %v8744_v21  ;;  %v8753_v7 = vsel %vm4629_vm1, %v4798_v54, %v4806_v35  ;;  %v8756_v15 = vsel %vm4629_vm1, %v4796_v34, %v4804_v27  ;;  %v8759_v63 = vsel %vm4629_vm1, %v4800_v40, %v4808_v14  ;;  %v4528_v9 = vld [vmem:[%s8330_s23 + $0x318] sm:$0x1]  ;;  %v4818_v46 = vrot.slane %v4525_v42, 1 }
 0x2b9   : > { %9472 = vst [vmem:[#allocation54_spill] sm:$0xff] %v8747_v16  ;;  %9473 = vst [vmem:[#allocation55_spill] sm:$0xff] %v8750_v1  ;;  %v8764_v21 = vsel %vm4629_vm1, %v4802_v62, %v4810_v56  ;;  %v8767_v60 = vsel %vm4629_vm1, %v4806_v35, %v4814_v8  ;;  %v4822_v1 = vrot.slane %v4527_v51, 1  ;;  %v9479_v40 = vrot.slane %v8714_v26, 1 }
 0x2ba   : > { %9474 = vst [vmem:[#allocation56_spill] sm:$0xff] %v8753_v7  ;;  %9475 = vst [vmem:[#allocation57_spill] sm:$0xff] %v8756_v15  ;;  %v9480_v16 = vrot.slane %v8717_v59, 1 }
 0x2bb   : > { %9476 = vst [vmem:[#allocation58_spill] sm:$0xff] %v8759_v63  ;;  %9477 = vst [vmem:[#allocation59_spill] sm:$0xff] %v8764_v21  ;;  %v8774_v63 = vsel %vm4629_vm1, %v4804_v27, %v9479_v40 }
 0x2bc   : > { %9478 = vst [vmem:[#allocation60_spill] sm:$0xff] %v8767_v60  ;;  %v8779_v62 = vsel %vm4629_vm1, %v4808_v14, %v9480_v16  ;;  %v4820_v60 = vrot.slane %v4526_v61, 1 }
 0x2bd   : > { %9481 = vst [vmem:[#allocation61_spill] sm:$0xff] %v8779_v62 }
 0x316   : > { %v3698_v55 = vpop.f32.mrb[0].mxu0  ;;  %v4310_v53 = vpop.f32.mrb[0].mxu1 }
 0x317   : > { %v6221_v54 = vadd.f32 %v3698_v55, %v8342_v50  ;;  %v6269_v34 = vadd.f32 %v4310_v53, %v8379_v47  ;;  %v3700_v15 = vpop.f32.mrb[1].mxu0  ;;  %v4312_v7 = vpop.f32.mrb[1].mxu1  ;;  %v4824_v53 = vrot.slane %v4528_v9, 1 }
 0x318   : > { %v6222_v35 = vadd.f32 %v3700_v15, %v8382_v49  ;;  %v6270_v42 = vadd.f32 %v4312_v7, %v8385_v52  ;;  %v3702_v51 = vpop.f32.mrb[2].mxu0  ;;  %v4314_v55 = vpop.f32.mrb[2].mxu1 }
 0x319   : > { %v4922_v21 = vadd.f32 %v6221_v54, %v8407_v22  ;;  %v4924_v5 = vadd.f32 %v6269_v34, %v8410_v23  ;;  %v6223_v27 = vadd.f32 %v3702_v51, %v8342_v50  ;;  %v6271_v40 = vadd.f32 %v4314_v55, %v8379_v47  ;;  %v3704_v14 = vpop.f32.mrb[3].mxu0  ;;  %v4316_v16 = vpop.f32.mrb[3].mxu1 }
 0x31a   : > { %v4923_v15 = vadd.f32 %v6222_v35, %v8413_v24  ;;  %v4925_v7 = vadd.f32 %v6270_v42, %v8416_v25  ;;  %v6224_v62 = vadd.f32 %v3704_v14, %v8382_v49  ;;  %v6272_v9 = vadd.f32 %v4316_v16, %v8385_v52 }
 0x31b   : > { %v5115_v22 = vrot.slane %v4922_v21, 7  ;;  %v5117_v23 = vrot.slane %v4924_v5, 7  ;;  %v4926_v61 = vadd.f32 %v6223_v27, %v8422_v29  ;;  %v4928_v54 = vadd.f32 %v6271_v40, %v8425_v30 }
 0x31c   : > { %v5116_v34 = vrot.slane %v4923_v15, 7  ;;  %v5118_v51 = vrot.slane %v4925_v7, 7  ;;  %v4927_v55 = vadd.f32 %v6224_v62, %v8428_v31  ;;  %v4929_v24 = vadd.f32 %v6272_v9, %v8431_v32 }
 0x31d   : > { %5403 = vst [vmem:[%s8346_s10] sm:$0xfe] %v5115_v22  ;;  %5405 = vst [vmem:[%s8346_s10 + $0x10] sm:$0xfe] %v5117_v23  ;;  %v5119_v25 = vrot.slane %v4926_v61, 7  ;;  %v5123_v35 = vrot.slane %v4928_v54, 7  ;;  %v8798_v42 = vsel %vm4629_vm1, %v4810_v56, %v4818_v46  ;;  %v8801_v5 = vsel %vm4629_vm1, %v4814_v8, %v4822_v1 }
 0x31e   : > { %5404 = vst [vmem:[%s8346_s10 + $0x8] sm:$0xfe] %v5116_v34  ;;  %5406 = vst [vmem:[%s8346_s10 + $0x18] sm:$0xfe] %v5118_v51  ;;  %v5121_v29 = vrot.slane %v4927_v55, 7  ;;  %v5125_v30 = vrot.slane %v4929_v24, 7 }
 0x31f   : > { %v3708_v21 = vpop.f32.mrb[4].mxu0  ;;  %v4320_v31 = vpop.f32.mrb[4].mxu1  ;;  %v9482_v32 = vrot.slane %v8714_v26, 1  ;;  %v9483_v27 = vrot.slane %v8717_v59, 1  ;;  %v5120_v8 = vsel %vm5114_vm2, %v5115_v22, %v5119_v25  ;;  %v5124_v1 = vsel %vm5114_vm2, %v5117_v23, %v5123_v35 }
 0x320   : > { %v6225_v46 = vadd.f32 %v3708_v21, %v8342_v50  ;;  %v6273_v40 = vadd.f32 %v4320_v31, %v8379_v47  ;;  %v3710_v14 = vpop.f32.mrb[5].mxu0  ;;  %v4322_v26 = vpop.f32.mrb[5].mxu1  ;;  %5407 = vst [vmem:[%s8346_s10 + $0x20] sm:$0xff] %v5120_v8  ;;  %5409 = vst [vmem:[%s8346_s10 + $0x30] sm:$0xff] %v5124_v1  ;;  %v5126_v59 = vsel %vm5114_vm2, %v5118_v51, %v5125_v30 }
 0x321   : > { %v8808_v62 = vsel %vm4629_vm1, %v9482_v32, %v4820_v60  ;;  %v8813_v56 = vsel %vm4629_vm1, %v9483_v27, %v4824_v53  ;;  %v5122_v60 = vsel %vm5114_vm2, %v5116_v34, %v5121_v29  ;;  %v6226_v53 = vadd.f32 %v3710_v14, %v8382_v49  ;;  %v3712_v15 = vpop.f32.mrb[6].mxu0  ;;  %v4324_v7 = vpop.f32.mrb[6].mxu1  ;;  %5410 = vst [vmem:[%s8346_s10 + $0x38] sm:$0xff] %v5126_v59 }
 0x322   : > { %v6274_v16 = vadd.f32 %v4322_v26, %v8385_v52  ;;  %5408 = vst [vmem:[%s8346_s10 + $0x28] sm:$0xff] %v5122_v60  ;;  %v4930_v9 = vadd.f32 %v6225_v46, %v8437_v36  ;;  %v4932_v22 = vadd.f32 %v6273_v40, %v8440_v37  ;;  %v6227_v23 = vadd.f32 %v3712_v15, %v8342_v50  ;;  %v3714_v54 = vpop.f32.mrb[7].mxu0  ;;  %v4326_v34 = vpop.f32.mrb[7].mxu1 }
 0x323   : > { %v6275_v61 = vadd.f32 %v4324_v7, %v8379_v47  ;;  %v4931_v51 = vadd.f32 %v6226_v53, %v8446_v44  ;;  %v6228_v24 = vadd.f32 %v3714_v54, %v8382_v49  ;;  %v6276_v21 = vadd.f32 %v4326_v34, %v8385_v52 }
 0x324   : > { %v4933_v55 = vadd.f32 %v6274_v16, %v8449_v45  ;;  %v5127_v31 = vrot.slane %v4930_v9, 7  ;;  %v5131_v36 = vrot.slane %v4932_v22, 7  ;;  %v4934_v37 = vadd.f32 %v6227_v23, %v8456_v48 }
 0x325   : > { %v4936_v32 = vadd.f32 %v6275_v61, %v8459_v0  ;;  %v5129_v27 = vrot.slane %v4931_v51, 7  ;;  %v4935_v44 = vadd.f32 %v6228_v24, %v8462_v3  ;;  %v4937_v1 = vadd.f32 %v6276_v21, %v8465_v4 }
 0x326   : > { %v5133_v8 = vrot.slane %v4933_v55, 7  ;;  %v5128_v45 = vsel %vm5114_vm2, %v5119_v25, %v5127_v31  ;;  %v5132_v46 = vsel %vm5114_vm2, %v5123_v35, %v5131_v36  ;;  %v5135_v40 = vrot.slane %v4934_v37, 7  ;;  %v3718_v59 = vpop.f32.mrb[8].mxu0  ;;  %v4330_v3 = vpop.f32.mrb[8].mxu1 }
 0x327   : > { %v5139_v14 = vrot.slane %v4936_v32, 7  ;;  %5411 = vst [vmem:[%s8346_s10 + $0x40] sm:$0xff] %v5128_v45  ;;  %5413 = vst [vmem:[%s8346_s10 + $0x50] sm:$0xff] %v5132_v46  ;;  %v5130_v48 = vsel %vm5114_vm2, %v5121_v29, %v5129_v27  ;;  %v5137_v26 = vrot.slane %v4935_v44, 7  ;;  %v5141_v60 = vrot.slane %v4937_v1, 7  ;;  %v3720_v16 = vpop.f32.mrb[9].mxu0 }
 0x328   : > { %v5134_v0 = vsel %vm5114_vm2, %v5125_v30, %v5133_v8  ;;  %5412 = vst [vmem:[%s8346_s10 + $0x48] sm:$0xff] %v5130_v48  ;;  %v5136_v4 = vsel %vm5114_vm2, %v5127_v31, %v5135_v40  ;;  %v6229_v35 = vadd.f32 %v3718_v59, %v8342_v50  ;;  %v6277_v53 = vadd.f32 %v4330_v3, %v8379_v47  ;;  %v4332_v29 = vpop.f32.mrb[9].mxu1  ;;  %v3722_v22 = vpop.f32.mrb[10].mxu0 }
 0x329   : > { %5414 = vst [vmem:[%s8346_s10 + $0x58] sm:$0xff] %v5134_v0  ;;  %v5140_v25 = vsel %vm5114_vm2, %v5131_v36, %v5139_v14  ;;  %5415 = vst [vmem:[%s8346_s10 + $0x60] sm:$0xff] %v5136_v4  ;;  %v5138_v30 = vsel %vm5114_vm2, %v5129_v27, %v5137_v26  ;;  %v5142_v15 = vsel %vm5114_vm2, %v5133_v8, %v5141_v60  ;;  %v4334_v23 = vpop.f32.mrb[10].mxu1  ;;  %v3724_v55 = vpop.f32.mrb[11].mxu0 }
 0x32a   : > { %5417 = vst [vmem:[%s8346_s10 + $0x70] sm:$0xff] %v5140_v25  ;;  %v6230_v7 = vadd.f32 %v3720_v16, %v8382_v49  ;;  %v6278_v9 = vadd.f32 %v4332_v29, %v8385_v52  ;;  %5416 = vst [vmem:[%s8346_s10 + $0x68] sm:$0xff] %v5138_v30  ;;  %v4938_v61 = vadd.f32 %v6229_v35, %v8471_v10  ;;  %v4336_v24 = vpop.f32.mrb[11].mxu1 }
 0x32b   : > { %5418 = vst [vmem:[%s8346_s10 + $0x78] sm:$0xff] %v5142_v15  ;;  %v4940_v54 = vadd.f32 %v6277_v53, %v8474_v11  ;;  %v6231_v34 = vadd.f32 %v3722_v22, %v8342_v50  ;;  %v6279_v51 = vadd.f32 %v4334_v23, %v8379_v47  ;;  %v6232_v36 = vadd.f32 %v3724_v55, %v8382_v49 }
 0x32c   : > { %v4939_v21 = vadd.f32 %v6230_v7, %v8477_v12  ;;  %v4941_v31 = vadd.f32 %v6278_v9, %v8480_v13  ;;  %v6280_v37 = vadd.f32 %v4336_v24, %v8385_v52  ;;  %v5143_v32 = vrot.slane %v4938_v61, 7 }
 0x32d   : > { %v5147_v10 = vrot.slane %v4940_v54, 7  ;;  %v4942_v11 = vadd.f32 %v6231_v34, %v8486_v17  ;;  %v4944_v27 = vadd.f32 %v6279_v51, %v8489_v18  ;;  %v4943_v12 = vadd.f32 %v6232_v36, %v8492_v19 }
 0x32e   : > { %v5145_v8 = vrot.slane %v4939_v21, 7  ;;  %v5149_v44 = vrot.slane %v4941_v31, 7  ;;  %v4945_v1 = vadd.f32 %v6280_v37, %v8495_v20  ;;  %v5144_v13 = vsel %vm5114_vm2, %v5135_v40, %v5143_v32  ;;  %v3728_v3 = vpop.f32.mrb[12].mxu0  ;;  %v4340_v19 = vpop.f32.mrb[12].mxu1  ;;  %v9484_v21 = vld [vmem:[#allocation5_spill] sm:$0xff]  ;;  %v9485_v31 = vld [vmem:[#allocation6_spill] sm:$0xff] }
 0x32f   : > { %v5148_v45 = vsel %vm5114_vm2, %v5139_v14, %v5147_v10  ;;  %v5151_v46 = vrot.slane %v4942_v11, 7  ;;  %v5155_v48 = vrot.slane %v4944_v27, 7  ;;  %5419 = vst [vmem:[%s8346_s10 + $0x80] sm:$0xff] %v5144_v13  ;;  %v5153_v0 = vrot.slane %v4943_v12, 7  ;;  %v3730_v25 = vpop.f32.mrb[13].mxu0  ;;  %v9487_v11 = vld [vmem:[#allocation8_spill] sm:$0xff] }
 0x330   : > { %5421 = vst [vmem:[%s8346_s10 + $0x90] sm:$0xff] %v5148_v45  ;;  %v5146_v17 = vsel %vm5114_vm2, %v5137_v26, %v5145_v8  ;;  %v5150_v18 = vsel %vm5114_vm2, %v5141_v60, %v5149_v44  ;;  %v5157_v59 = vrot.slane %v4945_v1, 7  ;;  %v6233_v14 = vadd.f32 %v3728_v3, %v8342_v50  ;;  %v4342_v26 = vpop.f32.mrb[13].mxu1  ;;  %v3732_v29 = vpop.f32.mrb[14].mxu0 }
 0x331   : > { %5420 = vst [vmem:[%s8346_s10 + $0x88] sm:$0xff] %v5146_v17  ;;  %5422 = vst [vmem:[%s8346_s10 + $0x98] sm:$0xff] %v5150_v18  ;;  %v5152_v20 = vsel %vm5114_vm2, %v5143_v32, %v5151_v46  ;;  %v5156_v40 = vsel %vm5114_vm2, %v5147_v10, %v5155_v48  ;;  %v6281_v4 = vadd.f32 %v4340_v19, %v8379_v47  ;;  %v4344_v30 = vpop.f32.mrb[14].mxu1  ;;  %v3734_v23 = vpop.f32.mrb[15].mxu0  ;;  %v9486_v10 = vld [vmem:[#allocation7_spill] sm:$0xff] }
 0x332   : > { %5423 = vst [vmem:[%s8346_s10 + $0xa0] sm:$0xff] %v5152_v20  ;;  %5425 = vst [vmem:[%s8346_s10 + $0xb0] sm:$0xff] %v5156_v40  ;;  %v5154_v60 = vsel %vm5114_vm2, %v5145_v8, %v5153_v0  ;;  %v5158_v35 = vsel %vm5114_vm2, %v5149_v44, %v5157_v59  ;;  %v6234_v53 = vadd.f32 %v3730_v25, %v8382_v49  ;;  %v4346_v61 = vpop.f32.mrb[15].mxu1 }
 0x333   : > { %v6282_v16 = vadd.f32 %v4342_v26, %v8385_v52  ;;  %5424 = vst [vmem:[%s8346_s10 + $0xa8] sm:$0xff] %v5154_v60  ;;  %5426 = vst [vmem:[%s8346_s10 + $0xb8] sm:$0xff] %v5158_v35  ;;  %v4946_v15 = vadd.f32 %v6233_v14, %v8501_v28  ;;  %v4948_v7 = vadd.f32 %v6281_v4, %v8504_v33  ;;  %v9488_v35 = vld [vmem:[#allocation9_spill] sm:$0xff] }
 0x334   : > { %v6235_v9 = vadd.f32 %v3732_v29, %v8342_v50  ;;  %v6283_v22 = vadd.f32 %v4344_v30, %v8379_v47  ;;  %v4947_v54 = vadd.f32 %v6234_v53, %v8510_v41  ;;  %v6236_v51 = vadd.f32 %v3734_v23, %v8382_v49 }
 0x335   : > { %v4949_v34 = vadd.f32 %v6282_v16, %v8513_v43  ;;  %v6284_v55 = vadd.f32 %v4346_v61, %v8385_v52  ;;  %v5159_v24 = vrot.slane %v4946_v15, 7  ;;  %v5163_v28 = vrot.slane %v4948_v7, 7  ;;  %v9489_v16 = vld [vmem:[#allocation10_spill] sm:$0xff]  ;;  %v9491_v61 = vld [vmem:[#allocation12_spill] sm:$0xff] }
 0x336   : > { %v4950_v33 = vadd.f32 %v6235_v9, %v9484_v21  ;;  %v4952_v36 = vadd.f32 %v6283_v22, %v9485_v31  ;;  %v5161_v37 = vrot.slane %v4947_v54, 7  ;;  %v4951_v41 = vadd.f32 %v6236_v51, %v9486_v10  ;;  %v3738_v18 = vpop.f32.mrb[16].mxu0  ;;  %v4350_v3 = vpop.f32.mrb[16].mxu1  ;;  %v9490_v22 = vld [vmem:[#allocation11_spill] sm:$0xff] }
 0x337   : > { %v5165_v32 = vrot.slane %v4949_v34, 7  ;;  %v4953_v27 = vadd.f32 %v6284_v55, %v9487_v11  ;;  %v5160_v43 = vsel %vm5114_vm2, %v5151_v46, %v5159_v24  ;;  %v5164_v8 = vsel %vm5114_vm2, %v5155_v48, %v5163_v28  ;;  %v3740_v40 = vpop.f32.mrb[17].mxu0 }
 0x338   : > { %v5167_v44 = vrot.slane %v4950_v33, 7  ;;  %v5171_v12 = vrot.slane %v4952_v36, 7  ;;  %5427 = vst [vmem:[%s8346_s10 + $0xc0] sm:$0xff] %v5160_v43  ;;  %5429 = vst [vmem:[%s8346_s10 + $0xd0] sm:$0xff] %v5164_v8  ;;  %v5162_v1 = vsel %vm5114_vm2, %v5153_v0, %v5161_v37  ;;  %v5169_v45 = vrot.slane %v4951_v41, 7  ;;  %v4352_v0 = vpop.f32.mrb[17].mxu1 }
 0x339   : > { %v5166_v13 = vsel %vm5114_vm2, %v5157_v59, %v5165_v32  ;;  %v5173_v17 = vrot.slane %v4953_v27, 7  ;;  %5428 = vst [vmem:[%s8346_s10 + $0xc8] sm:$0xff] %v5162_v1  ;;  %v6237_v19 = vadd.f32 %v3738_v18, %v8342_v50  ;;  %v6285_v20 = vadd.f32 %v4350_v3, %v8379_v47  ;;  %v3742_v26 = vpop.f32.mrb[18].mxu0  ;;  %v4354_v60 = vpop.f32.mrb[18].mxu1  ;;  %v9493_v33 = vld [vmem:[#allocation14_spill] sm:$0xff]  ;;  %v9495_v41 = vld [vmem:[#allocation16_spill] sm:$0xff] }
 0x33a   : > { %5430 = vst [vmem:[%s8346_s10 + $0xd8] sm:$0xff] %v5166_v13  ;;  %v5168_v46 = vsel %vm5114_vm2, %v5159_v24, %v5167_v44  ;;  %v5172_v48 = vsel %vm5114_vm2, %v5163_v28, %v5171_v12  ;;  %v5170_v59 = vsel %vm5114_vm2, %v5161_v37, %v5169_v45  ;;  %v6238_v4 = vadd.f32 %v3740_v40, %v8382_v49  ;;  %v3744_v7 = vpop.f32.mrb[19].mxu0  ;;  %v4356_v9 = vpop.f32.mrb[19].mxu1  ;;  %v9492_v28 = vld [vmem:[#allocation13_spill] sm:$0xff] }
 0x33b   : > { %5431 = vst [vmem:[%s8346_s10 + $0xe0] sm:$0xff] %v5168_v46  ;;  %5433 = vst [vmem:[%s8346_s10 + $0xf0] sm:$0xff] %v5172_v48  ;;  %v5174_v14 = vsel %vm5114_vm2, %v5165_v32, %v5173_v17  ;;  %v6286_v25 = vadd.f32 %v4352_v0, %v8385_v52  ;;  %v4954_v53 = vadd.f32 %v6237_v19, %v9488_v35  ;;  %v9494_v32 = vld [vmem:[#allocation15_spill] sm:$0xff] }
 0x33c   : > { %5432 = vst [vmem:[%s8346_s10 + $0xe8] sm:$0xff] %v5170_v59  ;;  %5434 = vst [vmem:[%s8346_s10 + $0xf8] sm:$0xff] %v5174_v14  ;;  %v4956_v29 = vadd.f32 %v6285_v20, %v9489_v16  ;;  %v6239_v30 = vadd.f32 %v3742_v26, %v8342_v50  ;;  %v6287_v15 = vadd.f32 %v4354_v60, %v8379_v47  ;;  %v9496_v60 = vld [vmem:[#allocation17_spill] sm:$0xff] }
 0x33d   : > { %v4955_v23 = vadd.f32 %v6238_v4, %v9490_v22  ;;  %v4957_v54 = vadd.f32 %v6286_v25, %v9491_v61  ;;  %v6240_v34 = vadd.f32 %v3744_v7, %v8382_v49  ;;  %v6288_v51 = vadd.f32 %v4356_v9, %v8385_v52  ;;  %v9498_v9 = vld [vmem:[#allocation19_spill] sm:$0xff] }
 0x33e   : > { %v5175_v55 = vrot.slane %v4954_v53, 7  ;;  %v5179_v24 = vrot.slane %v4956_v29, 7  ;;  %v4958_v21 = vadd.f32 %v6239_v30, %v9492_v28  ;;  %v4960_v31 = vadd.f32 %v6287_v15, %v9493_v33  ;;  %v3748_v48 = vpop.f32.mrb[20].mxu0  ;;  %v4360_v19 = vpop.f32.mrb[20].mxu1  ;;  %v9497_v53 = vld [vmem:[#allocation18_spill] sm:$0xff] }
 0x33f   : > { %v5177_v36 = vrot.slane %v4955_v23, 7  ;;  %v5181_v37 = vrot.slane %v4957_v54, 7  ;;  %v4959_v10 = vadd.f32 %v6240_v34, %v9494_v32  ;;  %v4961_v11 = vadd.f32 %v6288_v51, %v9495_v41  ;;  %v3750_v0 = vpop.f32.mrb[21].mxu0  ;;  %v9499_v23 = vld [vmem:[#allocation20_spill] sm:$0xff] }
 0x340   : > { %v5176_v27 = vsel %vm5114_vm2, %v5167_v44, %v5175_v55  ;;  %v5180_v43 = vsel %vm5114_vm2, %v5171_v12, %v5179_v24  ;;  %v5183_v8 = vrot.slane %v4958_v21, 7  ;;  %v5187_v1 = vrot.slane %v4960_v31, 7  ;;  %v3752_v25 = vpop.f32.mrb[22].mxu0  ;;  %v9501_v21 = vld [vmem:[#allocation22_spill] sm:$0xff] }
 0x341   : > { %5435 = vst [vmem:[%s8346_s10 + $0x100] sm:$0xff] %v5176_v27  ;;  %5437 = vst [vmem:[%s8346_s10 + $0x110] sm:$0xff] %v5180_v43  ;;  %v5178_v13 = vsel %vm5114_vm2, %v5169_v45, %v5177_v36  ;;  %v5182_v18 = vsel %vm5114_vm2, %v5173_v17, %v5181_v37  ;;  %v5185_v3 = vrot.slane %v4959_v10, 7  ;;  %v5189_v46 = vrot.slane %v4961_v11, 7  ;;  %v4362_v45 = vpop.f32.mrb[21].mxu1  ;;  %v3754_v15 = vpop.f32.mrb[23].mxu0 }
 0x342   : > { %5436 = vst [vmem:[%s8346_s10 + $0x108] sm:$0xff] %v5178_v13  ;;  %5438 = vst [vmem:[%s8346_s10 + $0x118] sm:$0xff] %v5182_v18  ;;  %v5184_v44 = vsel %vm5114_vm2, %v5175_v55, %v5183_v8  ;;  %v5188_v12 = vsel %vm5114_vm2, %v5179_v24, %v5187_v1  ;;  %v6241_v20 = vadd.f32 %v3748_v48, %v8342_v50  ;;  %v4364_v26 = vpop.f32.mrb[22].mxu1  ;;  %v9500_v24 = vld [vmem:[#allocation21_spill] sm:$0xff]  ;;  %v9503_v10 = vld [vmem:[#allocation24_spill] sm:$0xff] }
 0x343   : > { %v6289_v40 = vadd.f32 %v4360_v19, %v8379_v47  ;;  %5439 = vst [vmem:[%s8346_s10 + $0x120] sm:$0xff] %v5184_v44  ;;  %5441 = vst [vmem:[%s8346_s10 + $0x130] sm:$0xff] %v5188_v12  ;;  %v5186_v17 = vsel %vm5114_vm2, %v5177_v36, %v5185_v3  ;;  %v5190_v59 = vsel %vm5114_vm2, %v5181_v37, %v5189_v46  ;;  %v4366_v7 = vpop.f32.mrb[23].mxu1  ;;  %v9502_v37 = vld [vmem:[#allocation23_spill] sm:$0xff] }
 0x344   : > { %v6242_v14 = vadd.f32 %v3750_v0, %v8382_v49  ;;  %v6290_v4 = vadd.f32 %v4362_v45, %v8385_v52  ;;  %5440 = vst [vmem:[%s8346_s10 + $0x128] sm:$0xff] %v5186_v17  ;;  %5442 = vst [vmem:[%s8346_s10 + $0x138] sm:$0xff] %v5190_v59  ;;  %v4962_v35 = vadd.f32 %v6241_v20, %v9496_v60 }
 0x345   : > { %v4964_v16 = vadd.f32 %v6289_v40, %v9497_v53  ;;  %v6243_v29 = vadd.f32 %v3752_v25, %v8342_v50  ;;  %v6291_v30 = vadd.f32 %v4364_v26, %v8379_v47  ;;  %v6244_v54 = vadd.f32 %v3754_v15, %v8382_v49  ;;  %v9504_v26 = vld [vmem:[#allocation25_spill] sm:$0xff] }
 0x346   : > { %v4963_v22 = vadd.f32 %v6242_v14, %v9498_v9  ;;  %v4965_v61 = vadd.f32 %v6290_v4, %v9499_v23  ;;  %v6292_v34 = vadd.f32 %v4366_v7, %v8385_v52  ;;  %v5191_v51 = vrot.slane %v4962_v35, 7  ;;  %v3758_v12 = vpop.f32.mrb[24].mxu0  ;;  %v4370_v20 = vpop.f32.mrb[24].mxu1  ;;  %v9505_v35 = vld [vmem:[#allocation26_spill] sm:$0xff]  ;;  %v9506_v7 = vld [vmem:[#allocation27_spill] sm:$0xff] }
 0x347   : > { %v5195_v55 = vrot.slane %v4964_v16, 7  ;;  %v4966_v28 = vadd.f32 %v6243_v29, %v9500_v24  ;;  %v4968_v33 = vadd.f32 %v6291_v30, %v9501_v21  ;;  %v4967_v32 = vadd.f32 %v6244_v54, %v9502_v37  ;;  %v3760_v45 = vpop.f32.mrb[25].mxu0 }
 0x348   : > { %v5193_v31 = vrot.slane %v4963_v22, 7  ;;  %v5197_v36 = vrot.slane %v4965_v61, 7  ;;  %v4969_v41 = vadd.f32 %v6292_v34, %v9503_v10  ;;  %v5192_v11 = vsel %vm5114_vm2, %v5183_v8, %v5191_v51  ;;  %v3762_v4 = vpop.f32.mrb[26].mxu0  ;;  %v9507_v22 = vld [vmem:[#allocation28_spill] sm:$0xff] }
 0x349   : > { %v5196_v27 = vsel %vm5114_vm2, %v5187_v1, %v5195_v55  ;;  %v5199_v43 = vrot.slane %v4966_v28, 7  ;;  %v5203_v13 = vrot.slane %v4968_v33, 7  ;;  %5443 = vst [vmem:[%s8346_s10 + $0x140] sm:$0xff] %v5192_v11  ;;  %v5201_v19 = vrot.slane %v4967_v32, 7  ;;  %v3764_v30 = vpop.f32.mrb[27].mxu0  ;;  %v9509_v28 = vld [vmem:[#allocation30_spill] sm:$0xff] }
 0x34a   : > { %5445 = vst [vmem:[%s8346_s10 + $0x150] sm:$0xff] %v5196_v27  ;;  %v5194_v18 = vsel %vm5114_vm2, %v5185_v3, %v5193_v31  ;;  %v5198_v48 = vsel %vm5114_vm2, %v5189_v46, %v5197_v36  ;;  %v5205_v44 = vrot.slane %v4969_v41, 7  ;;  %v6245_v40 = vadd.f32 %v3758_v12, %v8342_v50  ;;  %v4372_v3 = vpop.f32.mrb[25].mxu1  ;;  %v9511_v32 = vld [vmem:[#allocation32_spill] sm:$0xff] }
 0x34b   : > { %5444 = vst [vmem:[%s8346_s10 + $0x148] sm:$0xff] %v5194_v18  ;;  %5446 = vst [vmem:[%s8346_s10 + $0x158] sm:$0xff] %v5198_v48  ;;  %v5200_v8 = vsel %vm5114_vm2, %v5191_v51, %v5199_v43  ;;  %v5204_v1 = vsel %vm5114_vm2, %v5195_v55, %v5203_v13  ;;  %v6293_v0 = vadd.f32 %v4370_v20, %v8379_v47  ;;  %v4374_v25 = vpop.f32.mrb[26].mxu1  ;;  %v9508_v55 = vld [vmem:[#allocation29_spill] sm:$0xff] }
 0x34c   : > { %5447 = vst [vmem:[%s8346_s10 + $0x160] sm:$0xff] %v5200_v8  ;;  %5449 = vst [vmem:[%s8346_s10 + $0x170] sm:$0xff] %v5204_v1  ;;  %v5202_v46 = vsel %vm5114_vm2, %v5193_v31, %v5201_v19  ;;  %v5206_v17 = vsel %vm5114_vm2, %v5197_v36, %v5205_v44  ;;  %v6246_v59 = vadd.f32 %v3760_v45, %v8382_v49  ;;  %v4376_v15 = vpop.f32.mrb[27].mxu1  ;;  %v9510_v36 = vld [vmem:[#allocation31_spill] sm:$0xff] }
 0x34d   : > { %v6294_v14 = vadd.f32 %v4372_v3, %v8385_v52  ;;  %5448 = vst [vmem:[%s8346_s10 + $0x168] sm:$0xff] %v5202_v46  ;;  %5450 = vst [vmem:[%s8346_s10 + $0x178] sm:$0xff] %v5206_v17  ;;  %v4970_v60 = vadd.f32 %v6245_v40, %v9504_v26  ;;  %v4972_v53 = vadd.f32 %v6293_v0, %v9505_v35 }
 0x34e   : > { %v6247_v16 = vadd.f32 %v3762_v4, %v8342_v50  ;;  %v6295_v29 = vadd.f32 %v4374_v25, %v8379_v47  ;;  %v4971_v9 = vadd.f32 %v6246_v59, %v9506_v7  ;;  %v6248_v61 = vadd.f32 %v3764_v30, %v8382_v49  ;;  %v3768_v1 = vpop.f32.mrb[28].mxu0  ;;  %v4380_v40 = vpop.f32.mrb[28].mxu1  ;;  %v9512_v25 = vld [vmem:[#allocation33_spill] sm:$0xff] }
 0x34f   : > { %v4973_v23 = vadd.f32 %v6294_v14, %v9507_v22  ;;  %v6296_v54 = vadd.f32 %v4376_v15, %v8385_v52  ;;  %v5207_v34 = vrot.slane %v4970_v60, 7  ;;  %v5211_v51 = vrot.slane %v4972_v53, 7  ;;  %v3770_v3 = vpop.f32.mrb[29].mxu0  ;;  %v9513_v60 = vld [vmem:[#allocation34_spill] sm:$0xff]  ;;  %v9514_v15 = vld [vmem:[#allocation35_spill] sm:$0xff] }
 0x350   : > { %v4974_v24 = vadd.f32 %v6247_v16, %v9508_v55  ;;  %v4976_v21 = vadd.f32 %v6295_v29, %v9509_v28  ;;  %v5209_v33 = vrot.slane %v4971_v9, 7  ;;  %v4975_v37 = vadd.f32 %v6248_v61, %v9510_v36  ;;  %v3772_v14 = vpop.f32.mrb[30].mxu0 }
 0x351   : > { %v5213_v31 = vrot.slane %v4973_v23, 7  ;;  %v4977_v10 = vadd.f32 %v6296_v54, %v9511_v32  ;;  %v5208_v41 = vsel %vm5114_vm2, %v5199_v43, %v5207_v34  ;;  %v5212_v11 = vsel %vm5114_vm2, %v5203_v13, %v5211_v51  ;;  %v3774_v29 = vpop.f32.mrb[31].mxu0 }
 0x352   : > { %v5215_v27 = vrot.slane %v4974_v24, 7  ;;  %v5219_v18 = vrot.slane %v4976_v21, 7  ;;  %5451 = vst [vmem:[%s8346_s10 + $0x180] sm:$0xff] %v5208_v41  ;;  %5453 = vst [vmem:[%s8346_s10 + $0x190] sm:$0xff] %v5212_v11  ;;  %v5210_v48 = vsel %vm5114_vm2, %v5201_v19, %v5209_v33  ;;  %v5217_v20 = vrot.slane %v4975_v37, 7  ;;  %v4382_v19 = vpop.f32.mrb[29].mxu1 }
 0x353   : > { %v5214_v12 = vsel %vm5114_vm2, %v5205_v44, %v5213_v31  ;;  %v5221_v8 = vrot.slane %v4977_v10, 7  ;;  %5452 = vst [vmem:[%s8346_s10 + $0x188] sm:$0xff] %v5210_v48  ;;  %v6249_v0 = vadd.f32 %v3768_v1, %v8342_v50  ;;  %v6297_v45 = vadd.f32 %v4380_v40, %v8379_v47  ;;  %v4384_v4 = vpop.f32.mrb[30].mxu1  ;;  %v9516_v21 = vld [vmem:[#allocation37_spill] sm:$0xff] }
 0x354   : > { %5454 = vst [vmem:[%s8346_s10 + $0x198] sm:$0xff] %v5214_v12  ;;  %v5216_v43 = vsel %vm5114_vm2, %v5207_v34, %v5215_v27  ;;  %v5220_v13 = vsel %vm5114_vm2, %v5211_v51, %v5219_v18  ;;  %v5218_v44 = vsel %vm5114_vm2, %v5209_v33, %v5217_v20  ;;  %v6250_v17 = vadd.f32 %v3770_v3, %v8382_v49  ;;  %v4386_v30 = vpop.f32.mrb[31].mxu1  ;;  %v9515_v51 = vld [vmem:[#allocation36_spill] sm:$0xff] }
 0x355   : > { %5455 = vst [vmem:[%s8346_s10 + $0x1a0] sm:$0xff] %v5216_v43  ;;  %5457 = vst [vmem:[%s8346_s10 + $0x1b0] sm:$0xff] %v5220_v13  ;;  %v5222_v46 = vsel %vm5114_vm2, %v5213_v31, %v5221_v8  ;;  %v6298_v59 = vadd.f32 %v4382_v19, %v8385_v52  ;;  %v4978_v26 = vadd.f32 %v6249_v0, %v9512_v25  ;;  %v9517_v31 = vld [vmem:[#allocation38_spill] sm:$0xff] }
 0x356   : > { %5456 = vst [vmem:[%s8346_s10 + $0x1a8] sm:$0xff] %v5218_v44  ;;  %5458 = vst [vmem:[%s8346_s10 + $0x1b8] sm:$0xff] %v5222_v46  ;;  %v4980_v35 = vadd.f32 %v6297_v45, %v9513_v60  ;;  %v6251_v53 = vadd.f32 %v3772_v14, %v8342_v50  ;;  %v6299_v16 = vadd.f32 %v4384_v4, %v8379_v47  ;;  %v3778_v12 = vpop.f32.mrb[32].mxu0  ;;  %v4390_v1 = vpop.f32.mrb[32].mxu1  ;;  %v9518_v46 = vld [vmem:[#allocation39_spill] sm:$0xff] }
 0x357   : > { %v4979_v7 = vadd.f32 %v6250_v17, %v9514_v15  ;;  %v4981_v9 = vadd.f32 %v6298_v59, %v8641_v39  ;;  %v6252_v22 = vadd.f32 %v3774_v29, %v8382_v49  ;;  %v6300_v23 = vadd.f32 %v4386_v30, %v8385_v52  ;;  %v3780_v13 = vpop.f32.mrb[33].mxu0  ;;  %v9519_v59 = vld [vmem:[#allocation40_spill] sm:$0xff] }
 0x358   : > { %v5223_v61 = vrot.slane %v4978_v26, 7  ;;  %v5227_v54 = vrot.slane %v4980_v35, 7  ;;  %v4982_v34 = vadd.f32 %v6251_v53, %v8648_v57  ;;  %v4984_v55 = vadd.f32 %v6299_v16, %v9515_v51  ;;  %v3782_v19 = vpop.f32.mrb[34].mxu0  ;;  %v9520_v35 = vld [vmem:[#allocation41_spill] sm:$0xff]  ;;  %v9521_v16 = vld [vmem:[#allocation42_spill] sm:$0xff] }
 0x359   : > { %v5225_v24 = vrot.slane %v4979_v7, 7  ;;  %v5229_v28 = vrot.slane %v4981_v9, 7  ;;  %v4983_v33 = vadd.f32 %v6252_v22, %v9516_v21  ;;  %v4985_v36 = vadd.f32 %v6300_v23, %v9517_v31  ;;  %v3784_v26 = vpop.f32.mrb[35].mxu0  ;;  %v9522_v22 = vld [vmem:[#allocation43_spill] sm:$0xff] }
 0x35a   : > { %v5224_v39 = vsel %vm5114_vm2, %v5215_v27, %v5223_v61  ;;  %v5228_v37 = vsel %vm5114_vm2, %v5219_v18, %v5227_v54  ;;  %v5231_v32 = vrot.slane %v4982_v34, 7  ;;  %v5235_v10 = vrot.slane %v4984_v55, 7  ;;  %v9524_v55 = vld [vmem:[#allocation45_spill] sm:$0xff] }
 0x35b   : > { %5459 = vst [vmem:[%s8346_s10 + $0x1c0] sm:$0xff] %v5224_v39  ;;  %5461 = vst [vmem:[%s8346_s10 + $0x1d0] sm:$0xff] %v5228_v37  ;;  %v5226_v57 = vsel %vm5114_vm2, %v5217_v20, %v5225_v24  ;;  %v5230_v41 = vsel %vm5114_vm2, %v5221_v8, %v5229_v28  ;;  %v5233_v11 = vrot.slane %v4983_v33, 7  ;;  %v5237_v48 = vrot.slane %v4985_v36, 7  ;;  %v4392_v20 = vpop.f32.mrb[33].mxu1 }
 0x35c   : > { %5460 = vst [vmem:[%s8346_s10 + $0x1c8] sm:$0xff] %v5226_v57  ;;  %5462 = vst [vmem:[%s8346_s10 + $0x1d8] sm:$0xff] %v5230_v41  ;;  %v5232_v27 = vsel %vm5114_vm2, %v5223_v61, %v5231_v32  ;;  %v5236_v18 = vsel %vm5114_vm2, %v5227_v54, %v5235_v10  ;;  %v6253_v40 = vadd.f32 %v3778_v12, %v8342_v50  ;;  %v4394_v44 = vpop.f32.mrb[34].mxu1  ;;  %v9523_v61 = vld [vmem:[#allocation44_spill] sm:$0xff] }
 0x35d   : > { %v6301_v43 = vadd.f32 %v4390_v1, %v8379_v47  ;;  %5463 = vst [vmem:[%s8346_s10 + $0x1e0] sm:$0xff] %v5232_v27  ;;  %5465 = vst [vmem:[%s8346_s10 + $0x1f0] sm:$0xff] %v5236_v18  ;;  %v5234_v8 = vsel %vm5114_vm2, %v5225_v24, %v5233_v11  ;;  %v5238_v0 = vsel %vm5114_vm2, %v5229_v28, %v5237_v48  ;;  %v4396_v60 = vpop.f32.mrb[35].mxu1  ;;  %v9525_v28 = vld [vmem:[#allocation46_spill] sm:$0xff] }
 0x35e   : > { %v6254_v45 = vadd.f32 %v3780_v13, %v8382_v49  ;;  %v6302_v3 = vadd.f32 %v4392_v20, %v8385_v52  ;;  %5464 = vst [vmem:[%s8346_s10 + $0x1e8] sm:$0xff] %v5234_v8  ;;  %5466 = vst [vmem:[%s8346_s10 + $0x1f8] sm:$0xff] %v5238_v0  ;;  %v4986_v17 = vadd.f32 %v6253_v40, %v9518_v46  ;;  %v3788_v1 = vpop.f32.mrb[36].mxu0  ;;  %v4400_v27 = vpop.f32.mrb[36].mxu1 }
 0x35f   : > { %v4988_v14 = vadd.f32 %v6301_v43, %v9519_v59  ;;  %v6255_v4 = vadd.f32 %v3782_v19, %v8342_v50  ;;  %v6303_v25 = vadd.f32 %v4394_v44, %v8379_v47  ;;  %v6256_v30 = vadd.f32 %v3784_v26, %v8382_v49  ;;  %v3790_v43 = vpop.f32.mrb[37].mxu0  ;;  %v9527_v44 = vld [vmem:[#allocation48_spill] sm:$0xff] }
 0x360   : > { %v4987_v53 = vadd.f32 %v6254_v45, %v9520_v35  ;;  %v4989_v29 = vadd.f32 %v6302_v3, %v9521_v16  ;;  %v6304_v15 = vadd.f32 %v4396_v60, %v8385_v52  ;;  %v5239_v7 = vrot.slane %v4986_v17, 7  ;;  %v3792_v0 = vpop.f32.mrb[38].mxu0  ;;  %v9526_v3 = vld [vmem:[#allocation47_spill] sm:$0xff]  ;;  %v9529_v60 = vld [vmem:[#allocation50_spill] sm:$0xff] }
 0x361   : > { %v5243_v9 = vrot.slane %v4988_v14, 7  ;;  %v4990_v23 = vadd.f32 %v6255_v4, %v9522_v22  ;;  %v4992_v54 = vadd.f32 %v6303_v25, %v9523_v61  ;;  %v4991_v24 = vadd.f32 %v6256_v30, %v9524_v55  ;;  %v3794_v14 = vpop.f32.mrb[39].mxu0  ;;  %v9528_v25 = vld [vmem:[#allocation49_spill] sm:$0xff] }
 0x362   : > { %v5241_v34 = vrot.slane %v4987_v53, 7  ;;  %v5245_v51 = vrot.slane %v4989_v29, 7  ;;  %v4993_v21 = vadd.f32 %v6304_v15, %v9525_v28  ;;  %v5240_v33 = vsel %vm5114_vm2, %v5231_v32, %v5239_v7 }
 0x363   : > { %v5244_v31 = vsel %vm5114_vm2, %v5235_v10, %v5243_v9  ;;  %v5247_v36 = vrot.slane %v4990_v23, 7  ;;  %v5251_v39 = vrot.slane %v4992_v54, 7  ;;  %5467 = vst [vmem:[%s8346_s10 + $0x200] sm:$0xff] %v5240_v33  ;;  %v5249_v41 = vrot.slane %v4991_v24, 7 }
 0x364   : > { %5469 = vst [vmem:[%s8346_s10 + $0x210] sm:$0xff] %v5244_v31  ;;  %v5242_v37 = vsel %vm5114_vm2, %v5233_v11, %v5241_v34  ;;  %v5246_v57 = vsel %vm5114_vm2, %v5237_v48, %v5245_v51  ;;  %v5253_v12 = vrot.slane %v4993_v21, 7  ;;  %v6257_v18 = vadd.f32 %v3788_v1, %v8342_v50  ;;  %v4402_v11 = vpop.f32.mrb[37].mxu1 }
 0x365   : > { %5468 = vst [vmem:[%s8346_s10 + $0x208] sm:$0xff] %v5242_v37  ;;  %5470 = vst [vmem:[%s8346_s10 + $0x218] sm:$0xff] %v5246_v57  ;;  %v5248_v32 = vsel %vm5114_vm2, %v5239_v7, %v5247_v36  ;;  %v5252_v10 = vsel %vm5114_vm2, %v5243_v9, %v5251_v39  ;;  %v6305_v40 = vadd.f32 %v4400_v27, %v8379_v47  ;;  %v4404_v45 = vpop.f32.mrb[38].mxu1 }
 0x366   : > { %5471 = vst [vmem:[%s8346_s10 + $0x220] sm:$0xff] %v5248_v32  ;;  %5473 = vst [vmem:[%s8346_s10 + $0x230] sm:$0xff] %v5252_v10  ;;  %v5250_v48 = vsel %vm5114_vm2, %v5241_v34, %v5249_v41  ;;  %v5254_v13 = vsel %vm5114_vm2, %v5245_v51, %v5253_v12  ;;  %v6258_v20 = vadd.f32 %v3790_v43, %v8382_v49  ;;  %v4406_v4 = vpop.f32.mrb[39].mxu1  ;;  %v3798_v21 = vpop.f32.mrb[40].mxu0  ;;  %v9530_v10 = vld [vmem:[#allocation51_spill] sm:$0xff] }
 0x367   : > { %v6306_v8 = vadd.f32 %v4402_v11, %v8385_v52  ;;  %5472 = vst [vmem:[%s8346_s10 + $0x228] sm:$0xff] %v5250_v48  ;;  %5474 = vst [vmem:[%s8346_s10 + $0x238] sm:$0xff] %v5254_v13  ;;  %v4994_v19 = vadd.f32 %v6257_v18, %v9526_v3  ;;  %v4996_v46 = vadd.f32 %v6305_v40, %v9527_v44  ;;  %v9531_v40 = vld [vmem:[#allocation52_spill] sm:$0xff] }
 0x368   : > { %v6259_v17 = vadd.f32 %v3792_v0, %v8342_v50  ;;  %v6307_v59 = vadd.f32 %v4404_v45, %v8379_v47  ;;  %v4995_v26 = vadd.f32 %v6258_v20, %v9528_v25  ;;  %v6260_v53 = vadd.f32 %v3794_v14, %v8382_v49  ;;  %v9533_v45 = vld [vmem:[#allocation54_spill] sm:$0xff] }
 0x369   : > { %v4997_v35 = vadd.f32 %v6306_v8, %v9529_v60  ;;  %v6308_v16 = vadd.f32 %v4406_v4, %v8385_v52  ;;  %v5255_v29 = vrot.slane %v4994_v19, 7  ;;  %v5259_v30 = vrot.slane %v4996_v46, 7  ;;  %v9532_v8 = vld [vmem:[#allocation53_spill] sm:$0xff]  ;;  %v9535_v4 = vld [vmem:[#allocation56_spill] sm:$0xff] }
 0x36a   : > { %v4998_v15 = vadd.f32 %v6259_v17, %v8720_v2  ;;  %v5000_v7 = vadd.f32 %v6307_v59, %v8723_v38  ;;  %v5257_v9 = vrot.slane %v4995_v26, 7  ;;  %v4999_v23 = vadd.f32 %v6260_v53, %v8728_v58  ;;  %v4410_v58 = vpop.f32.mrb[40].mxu1  ;;  %v9534_v59 = vld [vmem:[#allocation55_spill] sm:$0xff] }
 0x36b   : > { %v5261_v22 = vrot.slane %v4997_v35, 7  ;;  %v5001_v61 = vadd.f32 %v6308_v16, %v8731_v6  ;;  %v5256_v54 = vsel %vm5114_vm2, %v5247_v36, %v5255_v29  ;;  %v5260_v34 = vsel %vm5114_vm2, %v5251_v39, %v5259_v30  ;;  %v3800_v39 = vpop.f32.mrb[41].mxu0  ;;  %v4412_v37 = vpop.f32.mrb[41].mxu1  ;;  %v9536_v35 = vld [vmem:[#allocation57_spill] sm:$0xff]  ;;  %v9537_v16 = vld [vmem:[#allocation58_spill] sm:$0xff] }
 0x36c   : > { %v5263_v51 = vrot.slane %v4998_v15, 7  ;;  %v5267_v55 = vrot.slane %v5000_v7, 7  ;;  %5475 = vst [vmem:[%s8346_s10 + $0x240] sm:$0xff] %v5256_v54  ;;  %5477 = vst [vmem:[%s8346_s10 + $0x250] sm:$0xff] %v5260_v34  ;;  %v5258_v2 = vsel %vm5114_vm2, %v5249_v41, %v5257_v9  ;;  %v5265_v24 = vrot.slane %v4999_v23, 7  ;;  %v3802_v27 = vpop.f32.mrb[42].mxu0 }
 0x36d   : > { %v5262_v38 = vsel %vm5114_vm2, %v5253_v12, %v5261_v22  ;;  %v5269_v28 = vrot.slane %v5001_v61, 7  ;;  %5476 = vst [vmem:[%s8346_s10 + $0x248] sm:$0xff] %v5258_v2  ;;  %v6261_v31 = vadd.f32 %v3798_v21, %v8342_v50  ;;  %v6309_v36 = vadd.f32 %v4410_v58, %v8379_v47  ;;  %v4414_v32 = vpop.f32.mrb[42].mxu1  ;;  %v3804_v13 = vpop.f32.mrb[43].mxu0 }
 0x36e   : > { %5478 = vst [vmem:[%s8346_s10 + $0x258] sm:$0xff] %v5262_v38  ;;  %v5264_v6 = vsel %vm5114_vm2, %v5255_v29, %v5263_v51  ;;  %v5268_v33 = vsel %vm5114_vm2, %v5259_v30, %v5267_v55  ;;  %v5266_v57 = vsel %vm5114_vm2, %v5257_v9, %v5265_v24  ;;  %v6262_v12 = vadd.f32 %v3800_v39, %v8382_v49  ;;  %v4416_v20 = vpop.f32.mrb[43].mxu1  ;;  %v3808_v34 = vpop.f32.mrb[44].mxu0 }
 0x36f   : > { %5479 = vst [vmem:[%s8346_s10 + $0x260] sm:$0xff] %v5264_v6  ;;  %5481 = vst [vmem:[%s8346_s10 + $0x270] sm:$0xff] %v5268_v33  ;;  %v5270_v41 = vsel %vm5114_vm2, %v5261_v22, %v5269_v28  ;;  %v6310_v1 = vadd.f32 %v4412_v37, %v8385_v52  ;;  %v5002_v18 = vadd.f32 %v6261_v31, %v9530_v10  ;;  %v4420_v2 = vpop.f32.mrb[44].mxu1  ;;  %v3810_v58 = vpop.f32.mrb[45].mxu0  ;;  %v9538_v37 = vld [vmem:[#allocation59_spill] sm:$0xff] }
 0x370   : > { %5480 = vst [vmem:[%s8346_s10 + $0x268] sm:$0xff] %v5266_v57  ;;  %5482 = vst [vmem:[%s8346_s10 + $0x278] sm:$0xff] %v5270_v41  ;;  %v5004_v43 = vadd.f32 %v6309_v36, %v9531_v40  ;;  %v6263_v11 = vadd.f32 %v3802_v27, %v8342_v50  ;;  %v6311_v48 = vadd.f32 %v4414_v32, %v8379_v47  ;;  %v3812_v36 = vpop.f32.mrb[46].mxu0  ;;  %v9539_v41 = vld [vmem:[#allocation60_spill] sm:$0xff]  ;;  %v9540_v40 = vld [vmem:[#allocation61_spill] sm:$0xff] }
 0x371   : > { %v5003_v0 = vadd.f32 %v6262_v12, %v9532_v8  ;;  %v5005_v3 = vadd.f32 %v6310_v1, %v9533_v45  ;;  %v6264_v19 = vadd.f32 %v3804_v13, %v8382_v49  ;;  %v6312_v44 = vadd.f32 %v4416_v20, %v8385_v52  ;;  %v3814_v32 = vpop.f32.mrb[47].mxu0 }
 0x372   : > { %v5271_v46 = vrot.slane %v5002_v18, 7  ;;  %v5275_v17 = vrot.slane %v5004_v43, 7  ;;  %v5006_v14 = vadd.f32 %v6263_v11, %v9534_v59  ;;  %v5008_v25 = vadd.f32 %v6311_v48, %v9535_v4  ;;  %v5529_v4 = vld [vmem:[%s8346_s10 + $0x8] sm:$0xff] (%p7236_p9) }
 0x373   : > { %v5273_v26 = vrot.slane %v5003_v0, 7  ;;  %v5277_v60 = vrot.slane %v5005_v3, 7  ;;  %v5007_v53 = vadd.f32 %v6264_v19, %v9536_v35  ;;  %v5009_v29 = vadd.f32 %v6312_v44, %v9537_v16  ;;  %v5537_v35 = vld [vmem:[%s8346_s10 + $0x28] sm:$0xff] (%p7236_p9)  ;;  %v5541_v16 = vld [vmem:[%s8346_s10 + $0x38] sm:$0xff] (%p7236_p9)  ;;  %5530 = vst [vmem:[%s9198_s22 + $0x8] sm:$0xff] (%p7236_p9), %v5529_v4 }
 0x374   : > { %v5272_v30 = vsel %vm5114_vm2, %v5263_v51, %v5271_v46  ;;  %v5276_v15 = vsel %vm5114_vm2, %v5267_v55, %v5275_v17  ;;  %v5279_v7 = vrot.slane %v5006_v14, 7  ;;  %v5283_v9 = vrot.slane %v5008_v25, 7  ;;  %v5527_v14 = vld [vmem:[%s8346_s10] sm:$0xff] (%p7236_p9)  ;;  %v5531_v25 = vld [vmem:[%s8346_s10 + $0x10] sm:$0xff] (%p7236_p9)  ;;  %5538 = vst [vmem:[%s9198_s22 + $0x48] sm:$0xff] (%p7236_p9), %v5537_v35  ;;  %5542 = vst [vmem:[%s9198_s22 + $0x58] sm:$0xff] (%p7236_p9), %v5541_v16 }
 0x375   : > { %5483 = vst [vmem:[%s8346_s10 + $0x280] sm:$0xff] %v5272_v30  ;;  %5485 = vst [vmem:[%s8346_s10 + $0x290] sm:$0xff] %v5276_v15  ;;  %v5274_v22 = vsel %vm5114_vm2, %v5265_v24, %v5273_v26  ;;  %v5278_v23 = vsel %vm5114_vm2, %v5269_v28, %v5277_v60  ;;  %v5281_v61 = vrot.slane %v5007_v53, 7  ;;  %v5285_v54 = vrot.slane %v5009_v29, 7  ;;  %v4422_v24 = vpop.f32.mrb[45].mxu1  ;;  %v5539_v53 = vld [vmem:[%s8346_s10 + $0x30] sm:$0xff] (%p7236_p9) }
 0x376   : > { %5484 = vst [vmem:[%s8346_s10 + $0x288] sm:$0xff] %v5274_v22  ;;  %5486 = vst [vmem:[%s8346_s10 + $0x298] sm:$0xff] %v5278_v23  ;;  %v5280_v51 = vsel %vm5114_vm2, %v5271_v46, %v5279_v7  ;;  %v5284_v55 = vsel %vm5114_vm2, %v5275_v17, %v5283_v9  ;;  %v6265_v38 = vadd.f32 %v3808_v34, %v8342_v50  ;;  %v4424_v39 = vpop.f32.mrb[46].mxu1  ;;  %v5543_v29 = vld [vmem:[%s8346_s10 + $0x40] sm:$0xff] (%p7236_p9)  ;;  %v5545_v30 = vld [vmem:[%s8346_s10 + $0x48] sm:$0xff] (%p7236_p9) }
 0x377   : > { %v6313_v21 = vadd.f32 %v4420_v2, %v8379_v47  ;;  %5487 = vst [vmem:[%s8346_s10 + $0x2a0] sm:$0xff] %v5280_v51  ;;  %5489 = vst [vmem:[%s8346_s10 + $0x2b0] sm:$0xff] %v5284_v55  ;;  %v5282_v28 = vsel %vm5114_vm2, %v5273_v26, %v5281_v61  ;;  %v5286_v6 = vsel %vm5114_vm2, %v5277_v60, %v5285_v54  ;;  %v4426_v10 = vpop.f32.mrb[47].mxu1  ;;  %v5533_v26 = vld [vmem:[%s8346_s10 + $0x18] sm:$0xff] (%p7236_p9)  ;;  %v5535_v60 = vld [vmem:[%s8346_s10 + $0x20] sm:$0xff] (%p7236_p9) }
 0x378   : > { %v6266_v33 = vadd.f32 %v3810_v58, %v8382_v49  ;;  %v6314_v31 = vadd.f32 %v4422_v24, %v8385_v52  ;;  %5488 = vst [vmem:[%s8346_s10 + $0x2a8] sm:$0xff] %v5282_v28  ;;  %5490 = vst [vmem:[%s8346_s10 + $0x2b8] sm:$0xff] %v5286_v6  ;;  %v5010_v57 = vadd.f32 %v6265_v38, %v9538_v37  ;;  %v5547_v15 = vld [vmem:[%s8346_s10 + $0x50] sm:$0xff] (%p7236_p9)  ;;  %v5553_v22 = vld [vmem:[%s8346_s10 + $0x68] sm:$0xff] (%p7236_p9) }
 0x379   : > { %v5012_v12 = vadd.f32 %v6313_v21, %v9539_v41  ;;  %v6267_v1 = vadd.f32 %v3812_v36, %v8342_v50  ;;  %v6315_v27 = vadd.f32 %v4424_v39, %v8379_v47  ;;  %v6268_v11 = vadd.f32 %v3814_v32, %v8382_v49  ;;  %v5555_v23 = vld [vmem:[%s8346_s10 + $0x70] sm:$0xff] (%p7236_p9)  ;;  %5528 = vst [vmem:[%s9198_s22] sm:$0xff] (%p7236_p9), %v5527_v14  ;;  %v5561_v34 = vld [vmem:[%s8346_s10 + $0x88] sm:$0xff] (%p7236_p9)  ;;  %v5565_v51 = vld [vmem:[%s8346_s10 + $0x98] sm:$0xff] (%p7236_p9) }
 0x37a   : > { %v5011_v18 = vadd.f32 %v6266_v33, %v8774_v63  ;;  %v5013_v43 = vadd.f32 %v6314_v31, %v9540_v40  ;;  %v6316_v48 = vadd.f32 %v4426_v10, %v8385_v52  ;;  %v5287_v13 = vrot.slane %v5010_v57, 7  ;;  %5532 = vst [vmem:[%s9198_s22 + $0x10] sm:$0xff] (%p7236_p9), %v5531_v25  ;;  %5534 = vst [vmem:[%s9198_s22 + $0x18] sm:$0xff] (%p7236_p9), %v5533_v26  ;;  %v5563_v2 = vld [vmem:[%s8346_s10 + $0x90] sm:$0xff] (%p7236_p9)  ;;  %v5567_v55 = vld [vmem:[%s8346_s10 + $0xa0] sm:$0xff] (%p7236_p9) }
 0x37b   : > { %v5291_v20 = vrot.slane %v5012_v12, 7  ;;  %v5014_v8 = vadd.f32 %v6267_v1, %v8798_v42  ;;  %v5016_v50 = vadd.f32 %v6315_v27, %v8801_v5  ;;  %v5015_v63 = vadd.f32 %v6268_v11, %v8808_v62  ;;  %5536 = vst [vmem:[%s9198_s22 + $0x40] sm:$0xff] (%p7236_p9), %v5535_v60  ;;  %5540 = vst [vmem:[%s9198_s22 + $0x50] sm:$0xff] (%p7236_p9), %v5539_v53  ;;  %v5569_v38 = vld [vmem:[%s8346_s10 + $0xa8] sm:$0xff] (%p7236_p9)  ;;  %v5571_v21 = vld [vmem:[%s8346_s10 + $0xb0] sm:$0xff] (%p7236_p9) }
 0x37c   : > { %v5289_v47 = vrot.slane %v5011_v18, 7  ;;  %v5293_v0 = vrot.slane %v5013_v43, 7  ;;  %v5017_v45 = vadd.f32 %v6316_v48, %v8813_v56  ;;  %v5288_v49 = vsel %vm5114_vm2, %v5279_v7, %v5287_v13  ;;  %v5549_v7 = vld [vmem:[%s8346_s10 + $0x58] sm:$0xff] (%p7236_p9)  ;;  %5544 = vst [vmem:[%s9198_s22 + $0x80] sm:$0xff] (%p7236_p9), %v5543_v29  ;;  %5546 = vst [vmem:[%s9198_s22 + $0x88] sm:$0xff] (%p7236_p9), %v5545_v30  ;;  %v5575_v24 = vld [vmem:[%s8346_s10 + $0xc0] sm:$0xff] (%p7236_p9) }
 0x37d   : > { %v5292_v52 = vsel %vm5114_vm2, %v5283_v9, %v5291_v20  ;;  %v5295_v3 = vrot.slane %v5014_v8, 7  ;;  %v5299_v42 = vrot.slane %v5016_v50, 7  ;;  %5491 = vst [vmem:[%s8346_s10 + $0x2c0] sm:$0xff] %v5288_v49  ;;  %v5297_v56 = vrot.slane %v5015_v63, 7  ;;  %5509 = sbr.rel (!%p7236_p9) target bundleno = 945 (0x3b1), region = 90  ;;  %v5551_v9 = vld [vmem:[%s8346_s10 + $0x60] sm:$0xff] (%p7236_p9) }
 0x37e   : > { %5493 = vst [vmem:[%s8346_s10 + $0x2d0] sm:$0xff] %v5292_v52  ;;  %v5290_v5 = vsel %vm5114_vm2, %v5281_v61, %v5289_v47  ;;  %v5294_v62 = vsel %vm5114_vm2, %v5285_v54, %v5293_v0  ;;  %v5301_v19 = vrot.slane %v5017_v45, 7  ;;  %5548 = vst [vmem:[%s9198_s22 + $0x90] sm:$0xff] (%p7236_p9), %v5547_v15  ;;  %v5557_v61 = vld [vmem:[%s8346_s10 + $0x78] sm:$0xff] (%p7236_p9)  ;;  %v5559_v54 = vld [vmem:[%s8346_s10 + $0x80] sm:$0xff] (%p7236_p9) }
 0x37f   : > { %5492 = vst [vmem:[%s8346_s10 + $0x2c8] sm:$0xff] %v5290_v5  ;;  %5494 = vst [vmem:[%s8346_s10 + $0x2d8] sm:$0xff] %v5294_v62  ;;  %v5296_v44 = vsel %vm5114_vm2, %v5287_v13, %v5295_v3  ;;  %v5300_v46 = vsel %vm5114_vm2, %v5291_v20, %v5299_v42  ;;  %v5298_v17 = vsel %vm5114_vm2, %v5289_v47, %v5297_v56  ;;  %v5573_v58 = vld [vmem:[%s8346_s10 + $0xb8] sm:$0xff] (%p7236_p9)  ;;  %v5577_v28 = vld [vmem:[%s8346_s10 + $0xc8] sm:$0xff] (%p7236_p9) }
 0x380   : > { %5499 = vst [vmem:[%s8346_s10 + $0x300] sm:$0x1] %v5295_v3  ;;  %5501 = vst [vmem:[%s8346_s10 + $0x310] sm:$0x1] %v5299_v42  ;;  %v5302_v59 = vsel %vm5114_vm2, %v5293_v0, %v5301_v19  ;;  %v5579_v6 = vld [vmem:[%s8346_s10 + $0xd0] sm:$0xff] (%p7236_p9)  ;;  %v5581_v33 = vld [vmem:[%s8346_s10 + $0xd8] sm:$0xff] (%p7236_p9) }
 0x381   : > { %5495 = vst [vmem:[%s8346_s10 + $0x2e0] sm:$0xff] %v5296_v44  ;;  %5497 = vst [vmem:[%s8346_s10 + $0x2f0] sm:$0xff] %v5300_v46  ;;  %v5583_v31 = vld [vmem:[%s8346_s10 + $0xe0] sm:$0xff] (%p7236_p9)  ;;  %v5585_v36 = vld [vmem:[%s8346_s10 + $0xe8] sm:$0xff] (%p7236_p9) }
 0x382   : > { %5500 = vst [vmem:[%s8346_s10 + $0x308] sm:$0x1] %v5297_v56  ;;  %5502 = vst [vmem:[%s8346_s10 + $0x318] sm:$0x1] %v5301_v19  ;;  %v5587_v39 = vld [vmem:[%s8346_s10 + $0xf0] sm:$0xff] (%p7236_p9)  ;;  %v5589_v37 = vld [vmem:[%s8346_s10 + $0xf8] sm:$0xff] (%p7236_p9) }
 0x383   : > { %5496 = vst [vmem:[%s8346_s10 + $0x2e8] sm:$0xff] %v5298_v17  ;;  %5498 = vst [vmem:[%s8346_s10 + $0x2f8] sm:$0xff] %v5302_v59  ;;  %v5591_v57 = vld [vmem:[%s8346_s10 + $0x100] sm:$0xff] (%p7236_p9)  ;;  %v5593_v41 = vld [vmem:[%s8346_s10 + $0x108] sm:$0xff] (%p7236_p9) }
 0x384   : > { %5550 = vst [vmem:[%s9198_s22 + $0x98] sm:$0xff] %v5549_v7  ;;  %5552 = vst [vmem:[%s9198_s22 + $0xc0] sm:$0xff] %v5551_v9  ;;  %v5595_v12 = vld [vmem:[%s8346_s10 + $0x110] sm:$0xff]  ;;  %v5597_v1 = vld [vmem:[%s8346_s10 + $0x118] sm:$0xff] }
 0x385   : > { %5554 = vst [vmem:[%s9198_s22 + $0xc8] sm:$0xff] %v5553_v22  ;;  %5556 = vst [vmem:[%s9198_s22 + $0xd0] sm:$0xff] %v5555_v23  ;;  %v5599_v27 = vld [vmem:[%s8346_s10 + $0x120] sm:$0xff]  ;;  %v5601_v32 = vld [vmem:[%s8346_s10 + $0x128] sm:$0xff] }
 0x386   : > { %5558 = vst [vmem:[%s9198_s22 + $0xd8] sm:$0xff] %v5557_v61  ;;  %5560 = vst [vmem:[%s9198_s22 + $0x100] sm:$0xff] %v5559_v54  ;;  %v5603_v10 = vld [vmem:[%s8346_s10 + $0x130] sm:$0xff]  ;;  %v5605_v18 = vld [vmem:[%s8346_s10 + $0x138] sm:$0xff] }
 0x387   : > { %5562 = vst [vmem:[%s9198_s22 + $0x108] sm:$0xff] %v5561_v34  ;;  %5564 = vst [vmem:[%s9198_s22 + $0x110] sm:$0xff] %v5563_v2  ;;  %v5607_v40 = vld [vmem:[%s8346_s10 + $0x140] sm:$0xff]  ;;  %v5609_v43 = vld [vmem:[%s8346_s10 + $0x148] sm:$0xff] }
 0x388   : > { %5566 = vst [vmem:[%s9198_s22 + $0x118] sm:$0xff] %v5565_v51  ;;  %5568 = vst [vmem:[%s9198_s22 + $0x140] sm:$0xff] %v5567_v55  ;;  %v5611_v11 = vld [vmem:[%s8346_s10 + $0x150] sm:$0xff]  ;;  %v5613_v48 = vld [vmem:[%s8346_s10 + $0x158] sm:$0xff] }
 0x389   : > { %5570 = vst [vmem:[%s9198_s22 + $0x148] sm:$0xff] %v5569_v38  ;;  %5572 = vst [vmem:[%s9198_s22 + $0x150] sm:$0xff] %v5571_v21  ;;  %v5615_v13 = vld [vmem:[%s8346_s10 + $0x160] sm:$0xff]  ;;  %v5617_v20 = vld [vmem:[%s8346_s10 + $0x168] sm:$0xff] }
 0x38a   : > { %5574 = vst [vmem:[%s9198_s22 + $0x158] sm:$0xff] %v5573_v58  ;;  %5576 = vst [vmem:[%s9198_s22 + $0x180] sm:$0xff] %v5575_v24  ;;  %v5619_v8 = vld [vmem:[%s8346_s10 + $0x170] sm:$0xff]  ;;  %v5621_v50 = vld [vmem:[%s8346_s10 + $0x178] sm:$0xff] }
 0x38b   : > { %5578 = vst [vmem:[%s9198_s22 + $0x188] sm:$0xff] %v5577_v28  ;;  %5580 = vst [vmem:[%s9198_s22 + $0x190] sm:$0xff] %v5579_v6  ;;  %v5623_v47 = vld [vmem:[%s8346_s10 + $0x180] sm:$0xff]  ;;  %v5625_v0 = vld [vmem:[%s8346_s10 + $0x188] sm:$0xff] }
 0x38c   : > { %5582 = vst [vmem:[%s9198_s22 + $0x198] sm:$0xff] %v5581_v33  ;;  %5584 = vst [vmem:[%s9198_s22 + $0x1c0] sm:$0xff] %v5583_v31  ;;  %v5627_v63 = vld [vmem:[%s8346_s10 + $0x190] sm:$0xff]  ;;  %v5629_v45 = vld [vmem:[%s8346_s10 + $0x198] sm:$0xff] }
 0x38d   : > { %5586 = vst [vmem:[%s9198_s22 + $0x1c8] sm:$0xff] %v5585_v36  ;;  %5588 = vst [vmem:[%s9198_s22 + $0x1d0] sm:$0xff] %v5587_v39  ;;  %v5631_v49 = vld [vmem:[%s8346_s10 + $0x1a0] sm:$0xff]  ;;  %v5633_v52 = vld [vmem:[%s8346_s10 + $0x1a8] sm:$0xff] }
 0x38e   : > { %5590 = vst [vmem:[%s9198_s22 + $0x1d8] sm:$0xff] %v5589_v37  ;;  %5592 = vst [vmem:[%s9198_s22 + $0x200] sm:$0xff] %v5591_v57  ;;  %v5635_v3 = vld [vmem:[%s8346_s10 + $0x1b0] sm:$0xff]  ;;  %v5637_v42 = vld [vmem:[%s8346_s10 + $0x1b8] sm:$0xff] }
 0x38f   : > { %5594 = vst [vmem:[%s9198_s22 + $0x208] sm:$0xff] %v5593_v41  ;;  %5596 = vst [vmem:[%s9198_s22 + $0x210] sm:$0xff] %v5595_v12  ;;  %v5639_v5 = vld [vmem:[%s8346_s10 + $0x1c0] sm:$0xff]  ;;  %v5641_v62 = vld [vmem:[%s8346_s10 + $0x1c8] sm:$0xff] }
 0x390   : > { %5598 = vst [vmem:[%s9198_s22 + $0x218] sm:$0xff] %v5597_v1  ;;  %5600 = vst [vmem:[%s9198_s22 + $0x240] sm:$0xff] %v5599_v27  ;;  %v5643_v56 = vld [vmem:[%s8346_s10 + $0x1d0] sm:$0xff]  ;;  %v5645_v19 = vld [vmem:[%s8346_s10 + $0x1d8] sm:$0xff] }
 0x391   : > { %5602 = vst [vmem:[%s9198_s22 + $0x248] sm:$0xff] %v5601_v32  ;;  %5604 = vst [vmem:[%s9198_s22 + $0x250] sm:$0xff] %v5603_v10  ;;  %v5647_v44 = vld [vmem:[%s8346_s10 + $0x1e0] sm:$0xff]  ;;  %v5649_v46 = vld [vmem:[%s8346_s10 + $0x1e8] sm:$0xff] }
 0x392   : > { %5606 = vst [vmem:[%s9198_s22 + $0x258] sm:$0xff] %v5605_v18  ;;  %5608 = vst [vmem:[%s9198_s22 + $0x280] sm:$0xff] %v5607_v40  ;;  %v5651_v17 = vld [vmem:[%s8346_s10 + $0x1f0] sm:$0xff]  ;;  %v5653_v59 = vld [vmem:[%s8346_s10 + $0x1f8] sm:$0xff] }
 0x393   : > { %5610 = vst [vmem:[%s9198_s22 + $0x288] sm:$0xff] %v5609_v43  ;;  %5612 = vst [vmem:[%s9198_s22 + $0x290] sm:$0xff] %v5611_v11  ;;  %v5655_v14 = vld [vmem:[%s8346_s10 + $0x200] sm:$0xff]  ;;  %v5657_v4 = vld [vmem:[%s8346_s10 + $0x208] sm:$0xff] }
 0x394   : > { %5614 = vst [vmem:[%s9198_s22 + $0x298] sm:$0xff] %v5613_v48  ;;  %5616 = vst [vmem:[%s9198_s22 + $0x2c0] sm:$0xff] %v5615_v13  ;;  %v5659_v25 = vld [vmem:[%s8346_s10 + $0x210] sm:$0xff]  ;;  %v5661_v26 = vld [vmem:[%s8346_s10 + $0x218] sm:$0xff] }
 0x395   : > { %5618 = vst [vmem:[%s9198_s22 + $0x2c8] sm:$0xff] %v5617_v20  ;;  %5620 = vst [vmem:[%s9198_s22 + $0x2d0] sm:$0xff] %v5619_v8  ;;  %v5663_v60 = vld [vmem:[%s8346_s10 + $0x220] sm:$0xff]  ;;  %v5665_v35 = vld [vmem:[%s8346_s10 + $0x228] sm:$0xff] }
 0x396   : > { %5622 = vst [vmem:[%s9198_s22 + $0x2d8] sm:$0xff] %v5621_v50  ;;  %5624 = vst [vmem:[%s9198_s22 + $0x300] sm:$0xff] %v5623_v47  ;;  %v5667_v53 = vld [vmem:[%s8346_s10 + $0x230] sm:$0xff]  ;;  %v5669_v16 = vld [vmem:[%s8346_s10 + $0x238] sm:$0xff] }
 0x397   : > { %5626 = vst [vmem:[%s9198_s22 + $0x308] sm:$0xff] %v5625_v0  ;;  %5628 = vst [vmem:[%s9198_s22 + $0x310] sm:$0xff] %v5627_v63  ;;  %v5671_v29 = vld [vmem:[%s8346_s10 + $0x240] sm:$0xff]  ;;  %v5673_v30 = vld [vmem:[%s8346_s10 + $0x248] sm:$0xff] }
 0x398   : > { %5630 = vst [vmem:[%s9198_s22 + $0x318] sm:$0xff] %v5629_v45  ;;  %5632 = vst [vmem:[%s9198_s22 + $0x340] sm:$0xff] %v5631_v49  ;;  %v5675_v15 = vld [vmem:[%s8346_s10 + $0x250] sm:$0xff]  ;;  %v5677_v7 = vld [vmem:[%s8346_s10 + $0x258] sm:$0xff] }
 0x399   : > { %5634 = vst [vmem:[%s9198_s22 + $0x348] sm:$0xff] %v5633_v52  ;;  %5636 = vst [vmem:[%s9198_s22 + $0x350] sm:$0xff] %v5635_v3  ;;  %v5679_v9 = vld [vmem:[%s8346_s10 + $0x260] sm:$0xff]  ;;  %v5681_v22 = vld [vmem:[%s8346_s10 + $0x268] sm:$0xff] }
 0x39a   : > { %5638 = vst [vmem:[%s9198_s22 + $0x358] sm:$0xff] %v5637_v42  ;;  %5640 = vst [vmem:[%s9198_s22 + $0x380] sm:$0xff] %v5639_v5  ;;  %v5683_v23 = vld [vmem:[%s8346_s10 + $0x270] sm:$0xff]  ;;  %v5685_v61 = vld [vmem:[%s8346_s10 + $0x278] sm:$0xff] }
 0x39b   : > { %5642 = vst [vmem:[%s9198_s22 + $0x388] sm:$0xff] %v5641_v62  ;;  %5644 = vst [vmem:[%s9198_s22 + $0x390] sm:$0xff] %v5643_v56  ;;  %v5687_v54 = vld [vmem:[%s8346_s10 + $0x280] sm:$0xff]  ;;  %v5689_v34 = vld [vmem:[%s8346_s10 + $0x288] sm:$0xff] }
 0x39c   : > { %5646 = vst [vmem:[%s9198_s22 + $0x398] sm:$0xff] %v5645_v19  ;;  %5648 = vst [vmem:[%s9198_s22 + $0x3c0] sm:$0xff] %v5647_v44  ;;  %v5691_v2 = vld [vmem:[%s8346_s10 + $0x290] sm:$0xff]  ;;  %v5693_v51 = vld [vmem:[%s8346_s10 + $0x298] sm:$0xff] }
 0x39d   : > { %5650 = vst [vmem:[%s9198_s22 + $0x3c8] sm:$0xff] %v5649_v46  ;;  %5652 = vst [vmem:[%s9198_s22 + $0x3d0] sm:$0xff] %v5651_v17  ;;  %v5695_v55 = vld [vmem:[%s8346_s10 + $0x2a0] sm:$0xff]  ;;  %v5697_v38 = vld [vmem:[%s8346_s10 + $0x2a8] sm:$0xff] }
 0x39e   : > { %5654 = vst [vmem:[%s9198_s22 + $0x3d8] sm:$0xff] %v5653_v59  ;;  %5656 = vst [vmem:[%s9198_s22 + $0x400] sm:$0xff] %v5655_v14  ;;  %v5699_v21 = vld [vmem:[%s8346_s10 + $0x2b0] sm:$0xff]  ;;  %v5701_v58 = vld [vmem:[%s8346_s10 + $0x2b8] sm:$0xff] }
 0x39f   : > { %5658 = vst [vmem:[%s9198_s22 + $0x408] sm:$0xff] %v5657_v4  ;;  %5660 = vst [vmem:[%s9198_s22 + $0x410] sm:$0xff] %v5659_v25  ;;  %v5703_v24 = vld [vmem:[%s8346_s10 + $0x2c0] sm:$0xff]  ;;  %v5705_v28 = vld [vmem:[%s8346_s10 + $0x2c8] sm:$0xff] }
 0x3a0   : > { %5662 = vst [vmem:[%s9198_s22 + $0x418] sm:$0xff] %v5661_v26  ;;  %5664 = vst [vmem:[%s9198_s22 + $0x440] sm:$0xff] %v5663_v60  ;;  %v5707_v6 = vld [vmem:[%s8346_s10 + $0x2d0] sm:$0xff]  ;;  %v5709_v33 = vld [vmem:[%s8346_s10 + $0x2d8] sm:$0xff] }
 0x3a1   : > { %5666 = vst [vmem:[%s9198_s22 + $0x448] sm:$0xff] %v5665_v35  ;;  %5668 = vst [vmem:[%s9198_s22 + $0x450] sm:$0xff] %v5667_v53  ;;  %v5711_v31 = vld [vmem:[%s8346_s10 + $0x2e0] sm:$0xff]  ;;  %v5713_v36 = vld [vmem:[%s8346_s10 + $0x2e8] sm:$0xff] }
 0x3a2   : > { %5670 = vst [vmem:[%s9198_s22 + $0x458] sm:$0xff] %v5669_v16  ;;  %5672 = vst [vmem:[%s9198_s22 + $0x480] sm:$0xff] %v5671_v29  ;;  %v5715_v39 = vld [vmem:[%s8346_s10 + $0x2f0] sm:$0xff]  ;;  %v5717_v37 = vld [vmem:[%s8346_s10 + $0x2f8] sm:$0xff] }
 0x3a3   : > { %5674 = vst [vmem:[%s9198_s22 + $0x488] sm:$0xff] %v5673_v30  ;;  %5676 = vst [vmem:[%s9198_s22 + $0x490] sm:$0xff] %v5675_v15  ;;  %v5719_v57 = vld [vmem:[%s8346_s10 + $0x300] sm:$0xff]  ;;  %v5721_v41 = vld [vmem:[%s8346_s10 + $0x308] sm:$0xff] }
 0x3a4   : > { %5678 = vst [vmem:[%s9198_s22 + $0x498] sm:$0xff] %v5677_v7  ;;  %5680 = vst [vmem:[%s9198_s22 + $0x4c0] sm:$0xff] %v5679_v9  ;;  %v5723_v12 = vld [vmem:[%s8346_s10 + $0x310] sm:$0xff]  ;;  %v5725_v1 = vld [vmem:[%s8346_s10 + $0x318] sm:$0xff] }
 0x3a5   : > { %5682 = vst [vmem:[%s9198_s22 + $0x4c8] sm:$0xff] %v5681_v22  ;;  %5684 = vst [vmem:[%s9198_s22 + $0x4d0] sm:$0xff] %v5683_v23 }
 0x3a6   : > { %5686 = vst [vmem:[%s9198_s22 + $0x4d8] sm:$0xff] %v5685_v61  ;;  %5688 = vst [vmem:[%s9198_s22 + $0x500] sm:$0xff] %v5687_v54 }
 0x3a7   : > { %5690 = vst [vmem:[%s9198_s22 + $0x508] sm:$0xff] %v5689_v34  ;;  %5692 = vst [vmem:[%s9198_s22 + $0x510] sm:$0xff] %v5691_v2 }
 0x3a8   : > { %5694 = vst [vmem:[%s9198_s22 + $0x518] sm:$0xff] %v5693_v51  ;;  %5696 = vst [vmem:[%s9198_s22 + $0x540] sm:$0xff] %v5695_v55 }
 0x3a9   : > { %5698 = vst [vmem:[%s9198_s22 + $0x548] sm:$0xff] %v5697_v38  ;;  %5700 = vst [vmem:[%s9198_s22 + $0x550] sm:$0xff] %v5699_v21 }
 0x3aa   : > { %5702 = vst [vmem:[%s9198_s22 + $0x558] sm:$0xff] %v5701_v58  ;;  %5704 = vst [vmem:[%s9198_s22 + $0x580] sm:$0xff] %v5703_v24 }
 0x3ab   : > { %5706 = vst [vmem:[%s9198_s22 + $0x588] sm:$0xff] %v5705_v28  ;;  %5708 = vst [vmem:[%s9198_s22 + $0x590] sm:$0xff] %v5707_v6 }
 0x3ac   : > { %5710 = vst [vmem:[%s9198_s22 + $0x598] sm:$0xff] %v5709_v33  ;;  %5712 = vst [vmem:[%s9198_s22 + $0x5c0] sm:$0xff] %v5711_v31 }
 0x3ad   : > { %5714 = vst [vmem:[%s9198_s22 + $0x5c8] sm:$0xff] %v5713_v36  ;;  %5716 = vst [vmem:[%s9198_s22 + $0x5d0] sm:$0xff] %v5715_v39 }
 0x3ae   : > { %5718 = vst [vmem:[%s9198_s22 + $0x5d8] sm:$0xff] %v5717_v37  ;;  %5720 = vst [vmem:[%s9198_s22 + $0x600] sm:$0xff] %v5719_v57 }
 0x3af   : > { %5722 = vst [vmem:[%s9198_s22 + $0x608] sm:$0xff] %v5721_v41  ;;  %5724 = vst [vmem:[%s9198_s22 + $0x610] sm:$0xff] %v5723_v12 }
 0x3b0   : > { %5726 = vst [vmem:[%s9198_s22 + $0x618] sm:$0xff] %v5725_v1 }
 0x3b1 PF: > { %s15_s26 = sadd.s32 1, %s7136_s26   ;;  %s9541_s18 = smov %s7108_s19 }
 0x3b2   : > { %p12_p2 = scmp.ge.s32.totalorder %s15_s26, 6   ;;  %s9542_s19 = smov %s7244_s13 }
 0x3b3   : > { %s9543_s20 = smov %s7116_s21  ;;  %s9544_s21 = smov %s7241_s12 }
 0x3b4   : > { %s9545_s22 = smov %s7128_s24  ;;  %s9546_s23 = smov %s7132_s25 }
 0x3b5   : > { %s9547_s24 = smov %s9550_s27  ;;  %s9548_s25 = smov %s9554_s28 }
 0x3b6   :  { %14 = sbr.rel (!%p12_p2) target bundleno = 5 (0x5), region = 161 }

</bundles_post_ra>
